<compile_context>
chip_gen: v5e
topology: v5e:2x2
jax: 0.10.0
libtpu: 0.0.40
codegen_flags: <defaults>
</compile_context>

<pallas_src>
import functools
import math

import jax
import jax.numpy as jnp
from jax.experimental import pallas as pl
from jax.experimental.pallas import tpu as pltpu


# ----------------------------------------------------------------------------
# Generation-dependent limits
# ----------------------------------------------------------------------------
def _scoped_vmem_limit():
    try:
        cap = int(pltpu.get_tpu_info().vmem_capacity_bytes)
    except Exception:
        cap = 0
    if cap <= 0:
        cap = 64 * 1024 * 1024          # conservative fallback (v7x-sized)
    return int(min(cap * 3 // 4, 100 * 1024 * 1024))


_VMEM_LIMIT = _scoped_vmem_limit()                      # ~96 MiB v5e/v6e, ~48 MiB v7x
_TM_TARGET = 512 if _VMEM_LIMIT >= 80 * 1024 * 1024 else 256   # 16-row multiples


def _row_tiling(M, target=_TM_TARGET):
    """Row tile + padded row count.  Full extent when small (always legal block)."""
    if M <= target:
        return M, M
    tm = target
    Mp = ((M + tm - 1) // tm) * tm
    return tm, Mp


def _pad_rows(a, Mp):
    M = a.shape[0]
    if Mp == M:
        return a
    return jnp.pad(a, ((0, Mp - M), (0, 0)))


# ----------------------------------------------------------------------------
# Fused [LayerNorm] -> matmul -> bias -> [QuickGELU] -> [residual] kernel
# Weight (K, N) stays fully resident in VMEM; grid only over M rows.
# ----------------------------------------------------------------------------
def _fused_linear_kernel(*refs, has_ln, has_res, act, eps):
    idx = 0
    x_ref = refs[idx]; idx += 1
    if has_ln:
        g_ref, bl_ref = refs[idx], refs[idx + 1]; idx += 2
    w_ref, b_ref = refs[idx], refs[idx + 1]; idx += 2
    if has_res:
        r_ref = refs[idx]; idx += 1
    o_ref = refs[idx]

    x = x_ref[...]
    if has_ln:
        xf = x.astype(jnp.float32)
        mu = jnp.mean(xf, axis=-1, keepdims=True)
        xc = xf - mu
        var = jnp.mean(xc * xc, axis=-1, keepdims=True)
        xn = (xc * jax.lax.rsqrt(var + eps)) * g_ref[...] + bl_ref[...]
        x = xn.astype(w_ref.dtype)                      # bf16 into the MXU
    y = jnp.dot(x, w_ref[...], preferred_element_type=jnp.float32)
    y = y + b_ref[...]
    if act == "quickgelu":                              # CLIP QuickGELU
        y = y * jax.nn.sigmoid(1.702 * y)
    if has_res:
        y = y + r_ref[...].astype(jnp.float32)
    o_ref[...] = y.astype(o_ref.dtype)


def fused_linear(x, w, b, *, ln=None, residual=None, act=None,
                 out_dtype=jnp.bfloat16, eps=1e-5):
    """y = [LN(x)] @ w + b, optional QuickGELU, optional + residual.

    x:(M,K) bf16, w:(K,N) bf16, b:(1,N) f32, ln=(gamma,beta) each (1,K) f32,
    residual:(M,N) bf16.  Weight is fully VMEM-resident; grid tiles only M.
    Non-divisible M is zero-padded (row-independent math) and cropped.
    """
    M, K = x.shape
    N = w.shape[1]
    tm, Mp = _row_tiling(M)
    grid = (Mp // tm,)

    xp = _pad_rows(x, Mp)
    args = [xp]
    in_specs = [pl.BlockSpec((tm, K), lambda i: (i, 0))]
    if ln is not None:
        g, bl = ln
        args += [g, bl]
        in_specs += [pl.BlockSpec((1, K), lambda i: (0, 0)),
                     pl.BlockSpec((1, K), lambda i: (0, 0))]
    args += [w, b]
    in_specs += [pl.BlockSpec((K, N), lambda i: (0, 0)),      # resident weight
                 pl.BlockSpec((1, N), lambda i: (0, 0))]
    if residual is not None:
        args.append(_pad_rows(residual, Mp))
        in_specs.append(pl.BlockSpec((tm, N), lambda i: (i, 0)))

    kernel = functools.partial(_fused_linear_kernel, has_ln=ln is not None,
                               has_res=residual is not None, act=act, eps=eps)
    out = pl.pallas_call(
        kernel,
        out_shape=jax.ShapeDtypeStruct((Mp, N), out_dtype),
        grid=grid,
        in_specs=in_specs,
        out_specs=pl.BlockSpec((tm, N), lambda i: (i, 0)),
        compiler_params=pltpu.CompilerParams(
            dimension_semantics=("parallel",),
            vmem_limit_bytes=_VMEM_LIMIT),
    )(*args)
    return out if Mp == M else out[:M]


# ----------------------------------------------------------------------------
# Standalone LayerNorm (only ln_pre needs it; ln_post / ln_final are fused above)
# ----------------------------------------------------------------------------
def _layernorm_kernel(x_ref, g_ref, b_ref, o_ref, *, eps):
    x = x_ref[...].astype(jnp.float32)
    mu = jnp.mean(x, axis=-1, keepdims=True)
    xc = x - mu
    var = jnp.mean(xc * xc, axis=-1, keepdims=True)
    y = xc * jax.lax.rsqrt(var + eps)
    o_ref[...] = (y * g_ref[...] + b_ref[...]).astype(o_ref.dtype)


def layernorm(x, g, b, eps=1e-5, out_dtype=jnp.bfloat16):
    M, D = x.shape
    tm, Mp = _row_tiling(M)
    out = pl.pallas_call(
        functools.partial(_layernorm_kernel, eps=eps),
        out_shape=jax.ShapeDtypeStruct((Mp, D), out_dtype),
        grid=(Mp // tm,),
        in_specs=[pl.BlockSpec((tm, D), lambda i: (i, 0)),
                  pl.BlockSpec((1, D), lambda i: (0, 0)),
                  pl.BlockSpec((1, D), lambda i: (0, 0))],
        out_specs=pl.BlockSpec((tm, D), lambda i: (i, 0)),
        compiler_params=pltpu.CompilerParams(
            dimension_semantics=("parallel",), vmem_limit_bytes=_VMEM_LIMIT),
    )(_pad_rows(x, Mp), g, b)
    return out if Mp == M else out[:M]


# ----------------------------------------------------------------------------
# Multi-head attention on fused qkv (B, S, 3*D) bf16
# ----------------------------------------------------------------------------
def _attn_head(q, k, v, dh, neg):
    """One head: q,k,v (S, dh) bf16 -> (S, dh) f32 (softmax-normalised)."""
    scale = 1.0 / math.sqrt(dh)
    qh = q * scale                                          # fold scale into q (S*dh)
    s = jax.lax.dot_general(qh, k, (((1,), (1,)), ((), ())),
                            preferred_element_type=jnp.float32)
    if neg is not None:
        s = s + neg
    s = s - jnp.max(s, axis=-1, keepdims=True)
    p = jnp.exp(s)
    inv = pl.reciprocal(jnp.sum(p, axis=-1, keepdims=True), approx=True)
    o = jnp.dot(p.astype(jnp.bfloat16), v, preferred_element_type=jnp.float32)
    return o * inv                                          # deferred softmax norm


def _causal_neg(S):
    row = jax.lax.broadcasted_iota(jnp.int32, (S, S), 0)
    col = jax.lax.broadcasted_iota(jnp.int32, (S, S), 1)
    return jnp.where(col > row, jnp.float32(-1e30), jnp.float32(0.0))


def _attn_group_kernel(q_ref, k_ref, v_ref, o_ref, *, hg, dh, causal):
    """q/k/v blocks are lane-aligned (1, S, hg*dh) slabs of the fused qkv tensor."""
    S = q_ref.shape[1]
    q, k, v = q_ref[0], k_ref[0], v_ref[0]
    neg = _causal_neg(S) if causal else None
    for h in range(hg):                                     # small static unroll (<=2)
        sl = slice(h * dh, (h + 1) * dh)
        o = _attn_head(q[:, sl], k[:, sl], v[:, sl], dh, neg)
        o_ref[0, :, sl] = o.astype(o_ref.dtype)             # direct per-head store


def _attn_full_kernel(qkv_ref, o_ref, *, num_heads, causal):
    """Fallback for widths not divisible into 128-lane head groups (tiny models)."""
    S = qkv_ref.shape[1]
    D = qkv_ref.shape[2] // 3
    dh = D // num_heads
    qkv = qkv_ref[0]
    neg = _causal_neg(S) if causal else None
    for h in range(num_heads):
        q = qkv[:, h * dh:(h + 1) * dh]
        k = qkv[:, D + h * dh:D + (h + 1) * dh]
        v = qkv[:, 2 * D + h * dh:2 * D + (h + 1) * dh]
        o = _attn_head(q, k, v, dh, neg)
        o_ref[0, :, h * dh:(h + 1) * dh] = o.astype(o_ref.dtype)


def attention(qkv, num_heads, causal):
    """qkv: (B, S, 3*D) bf16 -> (B, S, D) bf16."""
    B, S, threeD = qkv.shape
    D = threeD // 3
    dh = D // num_heads
    gw = math.lcm(dh, 128)                      # lane-aligned head-group width
    if D % gw == 0:
        n_groups = D // gw
        hg = gw // dh
        kernel = functools.partial(_attn_group_kernel, hg=hg, dh=dh, causal=causal)
        return pl.pallas_call(
            kernel,
            out_shape=jax.ShapeDtypeStruct((B, S, D), jnp.bfloat16),
            grid=(B, n_groups),
            in_specs=[
                pl.BlockSpec((1, S, gw), lambda b, g: (b, 0, g)),
                pl.BlockSpec((1, S, gw), lambda b, g, ng=n_groups: (b, 0, ng + g)),
                pl.BlockSpec((1, S, gw), lambda b, g, ng=n_groups: (b, 0, 2 * ng + g)),
            ],
            out_specs=pl.BlockSpec((1, S, gw), lambda b, g: (b, 0, g)),
            compiler_params=pltpu.CompilerParams(
                dimension_semantics=("parallel", "parallel"),
                vmem_limit_bytes=_VMEM_LIMIT),
        )(qkv, qkv, qkv)
    # TODO(synk): KV-chunked online softmax to avoid lane padding of the (S,S) scores
    # for S=257; full-score softmax kept here for simplicity.
    return pl.pallas_call(
        functools.partial(_attn_full_kernel, num_heads=num_heads, causal=causal),
        out_shape=jax.ShapeDtypeStruct((B, S, D), jnp.bfloat16),
        grid=(B,),
        in_specs=[pl.BlockSpec((1, S, threeD), lambda b: (b, 0, 0))],
        out_specs=pl.BlockSpec((1, S, D), lambda b: (b, 0, 0)),
        compiler_params=pltpu.CompilerParams(
            dimension_semantics=("parallel",), vmem_limit_bytes=_VMEM_LIMIT),
    )(qkv)


# ----------------------------------------------------------------------------
# Final logits: normalise image + text features in-kernel, scaled cosine sim
# ----------------------------------------------------------------------------
def _cosine_logits_kernel(img_ref, txt_ref, ls_ref, o_ref):
    img = img_ref[...].astype(jnp.float32)
    txt = txt_ref[...].astype(jnp.float32)
    img_n = img * jax.lax.rsqrt(jnp.maximum(jnp.sum(img * img, -1, keepdims=True), 1e-24))
    txt_n = txt * jax.lax.rsqrt(jnp.maximum(jnp.sum(txt * txt, -1, keepdims=True), 1e-24))
    logits = jax.lax.dot_general(img_n, txt_n, (((1,), (1,)), ((), ())),
                                 preferred_element_type=jnp.float32)
    o_ref[...] = (jnp.exp(ls_ref[0, 0]) * logits).astype(o_ref.dtype)


def cosine_logits(image_features, text_features, logit_scale):
    B, E = image_features.shape
    P = text_features.shape[0]
    tp, Pp = _row_tiling(P, target=1024)
    txt = _pad_rows(text_features, Pp)
    out = pl.pallas_call(
        _cosine_logits_kernel,
        out_shape=jax.ShapeDtypeStruct((B, Pp), jnp.float32),
        grid=(Pp // tp,),
        in_specs=[pl.BlockSpec((B, E), lambda j: (0, 0)),
                  pl.BlockSpec((tp, E), lambda j: (j, 0)),
                  pl.BlockSpec(memory_space=pltpu.MemorySpace.SMEM)],   # scalar in SMEM
        out_specs=pl.BlockSpec((B, tp), lambda j: (0, j)),
        compiler_params=pltpu.CompilerParams(
            dimension_semantics=("parallel",), vmem_limit_bytes=_VMEM_LIMIT),
    )(image_features, txt, logit_scale)
    return out if Pp == P else out[:, :P]


# ----------------------------------------------------------------------------
# Model (CLIP-style ViT image encoder + text encoder + prompt learner)
# ----------------------------------------------------------------------------
def transformer_block(x2d, B, S, p, num_heads, causal):
    """Pre-LN residual attention block; x2d: (B*S, D) bf16."""
    D = x2d.shape[1]
    qkv = fused_linear(x2d, p["w_qkv"], p["b_qkv"], ln=(p["ln1_g"], p["ln1_b"]))
    attn = attention(qkv.reshape(B, S, 3 * D), num_heads, causal)
    x2d = fused_linear(attn.reshape(B * S, D), p["w_out"], p["b_out"], residual=x2d)
    h = fused_linear(x2d, p["w_fc1"], p["b_fc1"],
                     ln=(p["ln2_g"], p["ln2_b"]), act="quickgelu")
    x2d = fused_linear(h, p["w_fc2"], p["b_fc2"], residual=x2d)
    return x2d


def image_encoder(image, p, cfg):
    """CLIP VisionTransformer forward (image in NCHW)."""
    B, C, H, W = image.shape
    ps = cfg["patch"]
    gh, gw = H // ps, W // ps
    Dv = cfg["vision_width"]
    # conv1 with kernel=stride=patch == linear over unfolded patches (row-major C,kh,kw)
    patches = (image.reshape(B, C, gh, ps, gw, ps)
                    .transpose(0, 2, 4, 1, 3, 5)
                    .reshape(B * gh * gw, C * ps * ps)).astype(jnp.bfloat16)
    x = fused_linear(patches, p["patch_w"], p["patch_b"])          # pre-transposed weight
    x = x.reshape(B, gh * gw, Dv)
    cls = jnp.broadcast_to(p["class_emb"].reshape(1, 1, Dv), (B, 1, Dv)).astype(jnp.bfloat16)
    x = jnp.concatenate([cls, x], axis=1)                          # (B, P+1, Dv)
    x = (x.astype(jnp.float32) + p["vis_pos"][None]).astype(jnp.bfloat16)
    S = x.shape[1]
    x2d = layernorm(x.reshape(B * S, Dv), p["ln_pre_g"], p["ln_pre_b"])
    for lp in p["vis_layers"]:
        x2d = transformer_block(x2d, B, S, lp, cfg["vision_heads"], causal=False)
    cls_tok = x2d.reshape(B, S, Dv)[:, 0, :]                       # (B, Dv)
    # ln_post fused with the visual projection (no bias in CLIP)
    feat = fused_linear(cls_tok, p["vis_proj"], p["vis_proj_b"],
                        ln=(p["ln_post_g"], p["ln_post_b"]))
    return feat                                                    # (B, E) bf16


def prompt_learner_forward(p, cfg):
    """class_token_position='end', learned_cls=False, batch_size=None."""
    n_prompts = p["token_prefix"].shape[0]
    ctx = jnp.broadcast_to(p["ctx"][None],
                           (n_prompts, cfg["n_ctx"], cfg["text_width"]))
    return jnp.concatenate([p["token_prefix"], ctx, p["token_suffix"]], axis=1)


def text_encoder(prompts, tokenized_prompts, p, cfg):
    P, S, D = prompts.shape
    x = (prompts + p["txt_pos"][None]).astype(jnp.bfloat16)
    x2d = x.reshape(P * S, D)
    for lp in p["txt_layers"]:
        x2d = transformer_block(x2d, P, S, lp, cfg["text_heads"], causal=True)
    x3d = x2d.reshape(P, S, D)
    eot = jnp.argmax(tokenized_prompts, axis=-1)
    x_eot = x3d[jnp.arange(P), eot]                                # (P, D) EOT gather
    # ln_final is row-wise, so it commutes with the row gather: fuse LN + text_projection
    feat = fused_linear(x_eot, p["text_proj"], p["text_proj_b"],
                        ln=(p["ln_final_g"], p["ln_final_b"]))
    return feat                                                    # (P, E) bf16


def clip_inference(image, params, cfg):
    """ClipTestTimeTuning.forward(image) -> ClipTestTimeTuning.inference(image)."""
    image_features = image_encoder(image, params, cfg)
    prompts = prompt_learner_forward(params, cfg)
    t_features = text_encoder(prompts, params["tokenized_prompts"], params, cfg)
    # get_text_features(): normalize -> stack(1 view) -> mean  == normalize (identity mean);
    # both the text and image l2-normalisations are fused into the logits kernel below.
    # TODO(synk): l2_norm_cal_tca / l2_norm_cal_ctpt statistic branches (attributes set
    # outside __init__, host-side .item() side effects) are not modelled; the standard
    # logits path is implemented.
    logits = cosine_logits(image_features, t_features, params["logit_scale"])
    return logits


# ----------------------------------------------------------------------------
# Deterministic parameter initialisation (synthetic CLIP; kernel-ready layouts)
# ----------------------------------------------------------------------------
def _w(key, shape):
    return (0.02 * jax.random.normal(key, shape, jnp.float32)).astype(jnp.bfloat16)


def _make_layer_params(key, D):
    ks = jax.random.split(key, 4)
    return {
        "ln1_g": jnp.ones((1, D), jnp.float32), "ln1_b": jnp.zeros((1, D), jnp.float32),
        "w_qkv": _w(ks[0], (D, 3 * D)), "b_qkv": jnp.zeros((1, 3 * D), jnp.float32),
        "w_out": _w(ks[1], (D, D)), "b_out": jnp.zeros((1, D), jnp.float32),
        "ln2_g": jnp.ones((1, D), jnp.float32), "ln2_b": jnp.zeros((1, D), jnp.float32),
        "w_fc1": _w(ks[2], (D, 4 * D)), "b_fc1": jnp.zeros((1, 4 * D), jnp.float32),
        "w_fc2": _w(ks[3], (4 * D, D)), "b_fc2": jnp.zeros((1, D), jnp.float32),
    }


def init_params(key, cfg):
    Dv, Dt, E = cfg["vision_width"], cfg["text_width"], cfg["embed_dim"]
    ps, C = cfg["patch"], 3
    n_patches = (cfg["image_size"] // ps) ** 2
    n_prompts = cfg["n_cls"] * cfg["num_attributes"]
    n_suffix = cfg["context_length"] - 1 - cfg["n_ctx"]
    keys = jax.random.split(key, 16)
    params = {
        # vision tower (patch embedding pre-transposed to (C*ps*ps, Dv))
        "patch_w": _w(keys[0], (C * ps * ps, Dv)),
        "patch_b": jnp.zeros((1, Dv), jnp.float32),
        "class_emb": 0.02 * jax.random.normal(keys[1], (Dv,), jnp.float32),
        "vis_pos": 0.01 * jax.random.normal(keys[2], (n_patches + 1, Dv), jnp.float32),
        "ln_pre_g": jnp.ones((1, Dv), jnp.float32),
        "ln_pre_b": jnp.zeros((1, Dv), jnp.float32),
        "vis_layers": [_make_layer_params(k, Dv)
                       for k in jax.random.split(keys[3], cfg["vision_layers"])],
        "ln_post_g": jnp.ones((1, Dv), jnp.float32),
        "ln_post_b": jnp.zeros((1, Dv), jnp.float32),
        "vis_proj": _w(keys[4], (Dv, E)),
        "vis_proj_b": jnp.zeros((1, E), jnp.float32),
        # text tower
        "txt_pos": 0.01 * jax.random.normal(keys[5], (cfg["context_length"], Dt), jnp.float32),
        "txt_layers": [_make_layer_params(k, Dt)
                       for k in jax.random.split(keys[6], cfg["text_layers"])],
        "ln_final_g": jnp.ones((1, Dt), jnp.float32),
        "ln_final_b": jnp.zeros((1, Dt), jnp.float32),
        "text_proj": _w(keys[7], (Dt, E)),
        "text_proj_b": jnp.zeros((1, E), jnp.float32),
        # prompt learner (class_token_position='end', learned_cls=False)
        "ctx": 0.02 * jax.random.normal(keys[8], (cfg["n_ctx"], Dt), jnp.float32),
        "token_prefix": 0.02 * jax.random.normal(keys[9], (n_prompts, 1, Dt), jnp.float32),
        "token_suffix": 0.02 * jax.random.normal(keys[10], (n_prompts, n_suffix, Dt), jnp.float32),
        # logit scale, CLIP init = log(1/0.07), stored as (1,1) (SMEM scalar)
        "logit_scale": jnp.full((1, 1), math.log(1.0 / 0.07), jnp.float32),
    }
    # synthetic tokenized prompts: SOT at 0, EOT token (max id 49407) at eot_pos
    tok = jnp.zeros((n_prompts, cfg["context_length"]), jnp.int32)
    tok = tok.at[:, 0].set(49406)
    eot_pos = (jnp.arange(n_prompts, dtype=jnp.int32) % 2) + cfg["n_ctx"] + 5
    tok = tok.at[jnp.arange(n_prompts), eot_pos].set(49407)
    params["tokenized_prompts"] = tok
    return params


# ----------------------------------------------------------------------------
if __name__ == "__main__":
    cfg = dict(
        batch=2,
        image_size=16,
        patch=8,
        vision_width=128,   # 128-divisible -> exercises the lane-aligned head-group path
        vision_heads=2,
        vision_layers=2,
        text_width=32,      # tiny width -> exercises the fallback attention path
        text_heads=4,
        text_layers=2,
        context_length=16,
        n_ctx=4,
        n_cls=2,
        num_attributes=2,
        embed_dim=32,
    )
    key = jax.random.PRNGKey(0)
    pkey, ikey = jax.random.split(key)
    params = init_params(pkey, cfg)
    image = jax.random.normal(
        ikey, (cfg["batch"], 3, cfg["image_size"], cfg["image_size"]), jnp.float32)

    fwd = jax.jit(functools.partial(clip_inference, cfg=cfg))
    logits = fwd(image, params)
    jax.block_until_ready(logits)

    n_prompts = cfg["n_cls"] * cfg["num_attributes"]
    assert logits.shape == (cfg["batch"], n_prompts), logits.shape
    assert bool(jnp.all(jnp.isfinite(logits)))
    print("KERNEL_OK")
</pallas_src>

<mosaic_0001>
module attributes {stable_mosaic.version = 11 : i64} {
  func.func @_layernorm_kernel(%arg0: i32, %arg1: memref<10x128xbf16, #tpu.memory_space<vmem>>, %arg2: memref<1x128xf32, #tpu.memory_space<vmem>>, %arg3: memref<1x128xf32, #tpu.memory_space<vmem>>, %arg4: memref<10x128xbf16, #tpu.memory_space<vmem>>) attributes {dimension_semantics = [#tpu.dimension_semantics<parallel>], iteration_bounds = array<i64: 1>, scalar_prefetch = 0 : i64, scratch_operands = 0 : i64, tpu.core_type = #tpu.core_type<tc>, window_params = [{transform_indices = @transform_0, window_bounds = array<i64: 10, 128>}, {pipeline_mode = #tpu.pipeline_mode<synchronous>, transform_indices = @transform_1, window_bounds = array<i64: 1, 128>}, {pipeline_mode = #tpu.pipeline_mode<synchronous>, transform_indices = @transform_2, window_bounds = array<i64: 1, 128>}, {transform_indices = @transform_3, window_bounds = array<i64: 10, 128>}]} {
    %c0 = arith.constant 0 : index
    %c0_0 = arith.constant 0 : index
    %0 = vector.load %arg1[%c0, %c0_0] : memref<10x128xbf16, #tpu.memory_space<vmem>>, vector<10x128xbf16>
    %1 = arith.extf %0 : vector<10x128xbf16> to vector<10x128xf32>
    %cst = arith.constant dense<0.000000e+00> : vector<10xf32>
    %2 = vector.multi_reduction <add>, %1, %cst [1] : vector<10x128xf32> to vector<10xf32>
    %3 = vector.shape_cast %2 : vector<10xf32> to vector<10x1xf32>
    %cst_1 = arith.constant 1.280000e+02 : f32
    %4 = vector.broadcast %cst_1 : f32 to vector<10x1xf32>
    %5 = arith.divf %3, %4 : vector<10x1xf32>
    %6 = vector.broadcast %5 : vector<10x1xf32> to vector<10x128xf32>
    %7 = arith.subf %1, %6 : vector<10x128xf32>
    %8 = arith.mulf %7, %7 : vector<10x128xf32>
    %cst_2 = arith.constant dense<0.000000e+00> : vector<10xf32>
    %9 = vector.multi_reduction <add>, %8, %cst_2 [1] : vector<10x128xf32> to vector<10xf32>
    %10 = vector.shape_cast %9 : vector<10xf32> to vector<10x1xf32>
    %cst_3 = arith.constant 1.280000e+02 : f32
    %11 = vector.broadcast %cst_3 : f32 to vector<10x1xf32>
    %12 = arith.divf %10, %11 : vector<10x1xf32>
    %cst_4 = arith.constant 9.99999974E-6 : f32
    %13 = vector.broadcast %cst_4 : f32 to vector<10x1xf32>
    %14 = arith.addf %12, %13 : vector<10x1xf32>
    %15 = math.rsqrt %14 : vector<10x1xf32>
    %16 = vector.broadcast %15 : vector<10x1xf32> to vector<10x128xf32>
    %17 = arith.mulf %7, %16 : vector<10x128xf32>
    %c0_5 = arith.constant 0 : index
    %c0_6 = arith.constant 0 : index
    %18 = vector.load %arg2[%c0_5, %c0_6] : memref<1x128xf32, #tpu.memory_space<vmem>>, vector<1x128xf32>
    %19 = vector.broadcast %18 : vector<1x128xf32> to vector<10x128xf32>
    %20 = arith.mulf %17, %19 : vector<10x128xf32>
    %c0_7 = arith.constant 0 : index
    %c0_8 = arith.constant 0 : index
    %21 = vector.load %arg3[%c0_7, %c0_8] : memref<1x128xf32, #tpu.memory_space<vmem>>, vector<1x128xf32>
    %22 = vector.broadcast %21 : vector<1x128xf32> to vector<10x128xf32>
    %23 = arith.addf %20, %22 : vector<10x128xf32>
    %24 = arith.truncf %23 : vector<10x128xf32> to vector<10x128xbf16>
    %c0_9 = arith.constant 0 : index
    %c0_10 = arith.constant 0 : index
    %25 = vector.load %arg4[%c0_9, %c0_10] : memref<10x128xbf16, #tpu.memory_space<vmem>>, vector<10x128xbf16>
    tpu.vector_store %arg4[%c0_9, %c0_10], %24 {strides = array<i32>} : memref<10x128xbf16, #tpu.memory_space<vmem>>, vector<10x128xbf16>,
    return
  }
  func.func @transform_0(%arg0: i32) -> (i32, i32) {
    %c0_i32 = arith.constant 0 : i32
    %c0_i32_0 = arith.constant 0 : i32
    return %arg0, %c0_i32 : i32, i32
  }
  func.func @transform_1(%arg0: i32) -> (i32, i32) {
    %c0_i32 = arith.constant 0 : i32
    %c0_i32_0 = arith.constant 0 : i32
    %c0_i32_1 = arith.constant 0 : i32
    return %c0_i32, %c0_i32_0 : i32, i32
  }
  func.func @transform_2(%arg0: i32) -> (i32, i32) {
    %c0_i32 = arith.constant 0 : i32
    %c0_i32_0 = arith.constant 0 : i32
    %c0_i32_1 = arith.constant 0 : i32
    return %c0_i32, %c0_i32_0 : i32, i32
  }
  func.func @transform_3(%arg0: i32) -> (i32, i32) {
    %c0_i32 = arith.constant 0 : i32
    %c0_i32_0 = arith.constant 0 : i32
    return %arg0, %c0_i32 : i32, i32
  }
}

module attributes {stable_mosaic.version = 11 : i64} {
  func.func @_fused_linear_kernel(%arg0: i32, %arg1: memref<8x192xbf16, #tpu.memory_space<vmem>>, %arg2: memref<192x128xbf16, #tpu.memory_space<vmem>>, %arg3: memref<1x128xf32, #tpu.memory_space<vmem>>, %arg4: memref<8x128xbf16, #tpu.memory_space<vmem>>) attributes {dimension_semantics = [#tpu.dimension_semantics<parallel>], iteration_bounds = array<i64: 1>, scalar_prefetch = 0 : i64, scratch_operands = 0 : i64, tpu.core_type = #tpu.core_type<tc>, window_params = [{transform_indices = @transform_0, window_bounds = array<i64: 8, 192>}, {pipeline_mode = #tpu.pipeline_mode<synchronous>, transform_indices = @transform_1, window_bounds = array<i64: 192, 128>}, {pipeline_mode = #tpu.pipeline_mode<synchronous>, transform_indices = @transform_2, window_bounds = array<i64: 1, 128>}, {transform_indices = @transform_3, window_bounds = array<i64: 8, 128>}]} {
    %c0 = arith.constant 0 : index
    %c0_0 = arith.constant 0 : index
    %0 = vector.load %arg1[%c0, %c0_0] : memref<8x192xbf16, #tpu.memory_space<vmem>>, vector<8x192xbf16>
    %c0_1 = arith.constant 0 : index
    %c0_2 = arith.constant 0 : index
    %1 = vector.load %arg2[%c0_1, %c0_2] : memref<192x128xbf16, #tpu.memory_space<vmem>>, vector<192x128xbf16>
    %cst = arith.constant dense<0.000000e+00> : vector<8x128xf32>
    %2 = tpu.matmul %0, %1, %cst {dimension_numbers = #tpu.dot_dimension_numbers<[1], [0], [0], [1], [0, 0, 1, 1], [], []>} : vector<8x192xbf16>, vector<192x128xbf16>, vector<8x128xf32> -> vector<8x128xf32>
    %c0_3 = arith.constant 0 : index
    %c0_4 = arith.constant 0 : index
    %3 = vector.load %arg3[%c0_3, %c0_4] : memref<1x128xf32, #tpu.memory_space<vmem>>, vector<1x128xf32>
    %4 = vector.broadcast %3 : vector<1x128xf32> to vector<8x128xf32>
    %5 = arith.addf %2, %4 : vector<8x128xf32>
    %6 = arith.truncf %5 : vector<8x128xf32> to vector<8x128xbf16>
    %c0_5 = arith.constant 0 : index
    %c0_6 = arith.constant 0 : index
    %7 = vector.load %arg4[%c0_5, %c0_6] : memref<8x128xbf16, #tpu.memory_space<vmem>>, vector<8x128xbf16>
    tpu.vector_store %arg4[%c0_5, %c0_6], %6 {strides = array<i32>} : memref<8x128xbf16, #tpu.memory_space<vmem>>, vector<8x128xbf16>,
    return
  }
  func.func @transform_0(%arg0: i32) -> (i32, i32) {
    %c0_i32 = arith.constant 0 : i32
    %c0_i32_0 = arith.constant 0 : i32
    return %arg0, %c0_i32 : i32, i32
  }
  func.func @transform_1(%arg0: i32) -> (i32, i32) {
    %c0_i32 = arith.constant 0 : i32
    %c0_i32_0 = arith.constant 0 : i32
    %c0_i32_1 = arith.constant 0 : i32
    return %c0_i32, %c0_i32_0 : i32, i32
  }
  func.func @transform_2(%arg0: i32) -> (i32, i32) {
    %c0_i32 = arith.constant 0 : i32
    %c0_i32_0 = arith.constant 0 : i32
    %c0_i32_1 = arith.constant 0 : i32
    return %c0_i32, %c0_i32_0 : i32, i32
  }
  func.func @transform_3(%arg0: i32) -> (i32, i32) {
    %c0_i32 = arith.constant 0 : i32
    %c0_i32_0 = arith.constant 0 : i32
    return %arg0, %c0_i32 : i32, i32
  }
}

module attributes {stable_mosaic.version = 11 : i64} {
  func.func @_fused_linear_kernel(%arg0: i32, %arg1: memref<10x128xbf16, #tpu.memory_space<vmem>>, %arg2: memref<1x128xf32, #tpu.memory_space<vmem>>, %arg3: memref<1x128xf32, #tpu.memory_space<vmem>>, %arg4: memref<128x384xbf16, #tpu.memory_space<vmem>>, %arg5: memref<1x384xf32, #tpu.memory_space<vmem>>, %arg6: memref<10x384xbf16, #tpu.memory_space<vmem>>) attributes {dimension_semantics = [#tpu.dimension_semantics<parallel>], iteration_bounds = array<i64: 1>, scalar_prefetch = 0 : i64, scratch_operands = 0 : i64, tpu.core_type = #tpu.core_type<tc>, window_params = [{transform_indices = @transform_0, window_bounds = array<i64: 10, 128>}, {pipeline_mode = #tpu.pipeline_mode<synchronous>, transform_indices = @transform_1, window_bounds = array<i64: 1, 128>}, {pipeline_mode = #tpu.pipeline_mode<synchronous>, transform_indices = @transform_2, window_bounds = array<i64: 1, 128>}, {pipeline_mode = #tpu.pipeline_mode<synchronous>, transform_indices = @transform_3, window_bounds = array<i64: 128, 384>}, {pipeline_mode = #tpu.pipeline_mode<synchronous>, transform_indices = @transform_4, window_bounds = array<i64: 1, 384>}, {transform_indices = @transform_5, window_bounds = array<i64: 10, 384>}]} {
    %c0 = arith.constant 0 : index
    %c0_0 = arith.constant 0 : index
    %0 = vector.load %arg1[%c0, %c0_0] : memref<10x128xbf16, #tpu.memory_space<vmem>>, vector<10x128xbf16>
    %1 = arith.extf %0 : vector<10x128xbf16> to vector<10x128xf32>
    %cst = arith.constant dense<0.000000e+00> : vector<10xf32>
    %2 = vector.multi_reduction <add>, %1, %cst [1] : vector<10x128xf32> to vector<10xf32>
    %3 = vector.shape_cast %2 : vector<10xf32> to vector<10x1xf32>
    %cst_1 = arith.constant 1.280000e+02 : f32
    %4 = vector.broadcast %cst_1 : f32 to vector<10x1xf32>
    %5 = arith.divf %3, %4 : vector<10x1xf32>
    %6 = vector.broadcast %5 : vector<10x1xf32> to vector<10x128xf32>
    %7 = arith.subf %1, %6 : vector<10x128xf32>
    %8 = arith.mulf %7, %7 : vector<10x128xf32>
    %cst_2 = arith.constant dense<0.000000e+00> : vector<10xf32>
    %9 = vector.multi_reduction <add>, %8, %cst_2 [1] : vector<10x128xf32> to vector<10xf32>
    %10 = vector.shape_cast %9 : vector<10xf32> to vector<10x1xf32>
    %cst_3 = arith.constant 1.280000e+02 : f32
    %11 = vector.broadcast %cst_3 : f32 to vector<10x1xf32>
    %12 = arith.divf %10, %11 : vector<10x1xf32>
    %cst_4 = arith.constant 9.99999974E-6 : f32
    %13 = vector.broadcast %cst_4 : f32 to vector<10x1xf32>
    %14 = arith.addf %12, %13 : vector<10x1xf32>
    %15 = math.rsqrt %14 : vector<10x1xf32>
    %16 = vector.broadcast %15 : vector<10x1xf32> to vector<10x128xf32>
    %17 = arith.mulf %7, %16 : vector<10x128xf32>
    %c0_5 = arith.constant 0 : index
    %c0_6 = arith.constant 0 : index
    %18 = vector.load %arg2[%c0_5, %c0_6] : memref<1x128xf32, #tpu.memory_space<vmem>>, vector<1x128xf32>
    %19 = vector.broadcast %18 : vector<1x128xf32> to vector<10x128xf32>
    %20 = arith.mulf %17, %19 : vector<10x128xf32>
    %c0_7 = arith.constant 0 : index
    %c0_8 = arith.constant 0 : index
    %21 = vector.load %arg3[%c0_7, %c0_8] : memref<1x128xf32, #tpu.memory_space<vmem>>, vector<1x128xf32>
    %22 = vector.broadcast %21 : vector<1x128xf32> to vector<10x128xf32>
    %23 = arith.addf %20, %22 : vector<10x128xf32>
    %24 = arith.truncf %23 : vector<10x128xf32> to vector<10x128xbf16>
    %c0_9 = arith.constant 0 : index
    %c0_10 = arith.constant 0 : index
    %25 = vector.load %arg4[%c0_9, %c0_10] : memref<128x384xbf16, #tpu.memory_space<vmem>>, vector<128x384xbf16>
    %cst_11 = arith.constant dense<0.000000e+00> : vector<10x384xf32>
    %26 = tpu.matmul %24, %25, %cst_11 {dimension_numbers = #tpu.dot_dimension_numbers<[1], [0], [0], [1], [0, 0, 1, 1], [], []>} : vector<10x128xbf16>, vector<128x384xbf16>, vector<10x384xf32> -> vector<10x384xf32>
    %c0_12 = arith.constant 0 : index
    %c0_13 = arith.constant 0 : index
    %27 = vector.load %arg5[%c0_12, %c0_13] : memref<1x384xf32, #tpu.memory_space<vmem>>, vector<1x384xf32>
    %28 = vector.broadcast %27 : vector<1x384xf32> to vector<10x384xf32>
    %29 = arith.addf %26, %28 : vector<10x384xf32>
    %30 = arith.truncf %29 : vector<10x384xf32> to vector<10x384xbf16>
    %c0_14 = arith.constant 0 : index
    %c0_15 = arith.constant 0 : index
    %31 = vector.load %arg6[%c0_14, %c0_15] : memref<10x384xbf16, #tpu.memory_space<vmem>>, vector<10x384xbf16>
    tpu.vector_store %arg6[%c0_14, %c0_15], %30 {strides = array<i32>} : memref<10x384xbf16, #tpu.memory_space<vmem>>, vector<10x384xbf16>,
    return
  }
  func.func @transform_0(%arg0: i32) -> (i32, i32) {
    %c0_i32 = arith.constant 0 : i32
    %c0_i32_0 = arith.constant 0 : i32
    return %arg0, %c0_i32 : i32, i32
  }
  func.func @transform_1(%arg0: i32) -> (i32, i32) {
    %c0_i32 = arith.constant 0 : i32
    %c0_i32_0 = arith.constant 0 : i32
    %c0_i32_1 = arith.constant 0 : i32
    return %c0_i32, %c0_i32_0 : i32, i32
  }
  func.func @transform_2(%arg0: i32) -> (i32, i32) {
    %c0_i32 = arith.constant 0 : i32
    %c0_i32_0 = arith.constant 0 : i32
    %c0_i32_1 = arith.constant 0 : i32
    return %c0_i32, %c0_i32_0 : i32, i32
  }
  func.func @transform_3(%arg0: i32) -> (i32, i32) {
    %c0_i32 = arith.constant 0 : i32
    %c0_i32_0 = arith.constant 0 : i32
    %c0_i32_1 = arith.constant 0 : i32
    return %c0_i32, %c0_i32_0 : i32, i32
  }
  func.func @transform_4(%arg0: i32) -> (i32, i32) {
    %c0_i32 = arith.constant 0 : i32
    %c0_i32_0 = arith.constant 0 : i32
    %c0_i32_1 = arith.constant 0 : i32
    return %c0_i32, %c0_i32_0 : i32, i32
  }
  func.func @transform_5(%arg0: i32) -> (i32, i32) {
    %c0_i32 = arith.constant 0 : i32
    %c0_i32_0 = arith.constant 0 : i32
    return %arg0, %c0_i32 : i32, i32
  }
}

module attributes {stable_mosaic.version = 11 : i64} {
  func.func @_attn_group_kernel(%arg0: i32, %arg1: i32, %arg2: memref<1x5x128xbf16, #tpu.memory_space<vmem>>, %arg3: memref<1x5x128xbf16, #tpu.memory_space<vmem>>, %arg4: memref<1x5x128xbf16, #tpu.memory_space<vmem>>, %arg5: memref<1x5x128xbf16, #tpu.memory_space<vmem>>) attributes {dimension_semantics = [#tpu.dimension_semantics<parallel>, #tpu.dimension_semantics<parallel>], iteration_bounds = array<i64: 2, 1>, scalar_prefetch = 0 : i64, scratch_operands = 0 : i64, tpu.core_type = #tpu.core_type<tc>, window_params = [{transform_indices = @transform_0, window_bounds = array<i64: 1, 5, 128>}, {transform_indices = @transform_1, window_bounds = array<i64: 1, 5, 128>}, {transform_indices = @transform_2, window_bounds = array<i64: 1, 5, 128>}, {transform_indices = @transform_3, window_bounds = array<i64: 1, 5, 128>}]} {
    %c0 = arith.constant 0 : index
    %c0_0 = arith.constant 0 : index
    %c0_1 = arith.constant 0 : index
    %0 = vector.load %arg2[%c0, %c0_0, %c0_1] : memref<1x5x128xbf16, #tpu.memory_space<vmem>>, vector<1x5x128xbf16>
    %1 = vector.shape_cast %0 : vector<1x5x128xbf16> to vector<5x128xbf16>
    %c0_2 = arith.constant 0 : index
    %c0_3 = arith.constant 0 : index
    %c0_4 = arith.constant 0 : index
    %2 = vector.load %arg3[%c0_2, %c0_3, %c0_4] : memref<1x5x128xbf16, #tpu.memory_space<vmem>>, vector<1x5x128xbf16>
    %3 = vector.shape_cast %2 : vector<1x5x128xbf16> to vector<5x128xbf16>
    %c0_5 = arith.constant 0 : index
    %c0_6 = arith.constant 0 : index
    %c0_7 = arith.constant 0 : index
    %4 = vector.load %arg4[%c0_5, %c0_6, %c0_7] : memref<1x5x128xbf16, #tpu.memory_space<vmem>>, vector<1x5x128xbf16>
    %5 = vector.shape_cast %4 : vector<1x5x128xbf16> to vector<5x128xbf16>
    %6 = vector.extract_strided_slice %1 {offsets = [0, 0], sizes = [5, 64], strides = [1, 1]} : vector<5x128xbf16> to vector<5x64xbf16>
    %7 = vector.extract_strided_slice %3 {offsets = [0, 0], sizes = [5, 64], strides = [1, 1]} : vector<5x128xbf16> to vector<5x64xbf16>
    %8 = vector.extract_strided_slice %5 {offsets = [0, 0], sizes = [5, 64], strides = [1, 1]} : vector<5x128xbf16> to vector<5x64xbf16>
    %cst = arith.constant 1.250000e-01 : bf16
    %9 = vector.broadcast %cst : bf16 to vector<5x64xbf16>
    %10 = arith.mulf %6, %9 : vector<5x64xbf16>
    %cst_8 = arith.constant dense<0.000000e+00> : vector<5x5xf32>
    %11 = tpu.matmul %10, %7, %cst_8 {dimension_numbers = #tpu.dot_dimension_numbers<[1], [1], [0], [0], [0, 0, 1, 0], [], []>} : vector<5x64xbf16>, vector<5x64xbf16>, vector<5x5xf32> -> vector<5x5xf32>
    %cst_9 = arith.constant dense<0xFF800000> : vector<5xf32>
    %12 = vector.multi_reduction <maximumf>, %11, %cst_9 [1] : vector<5x5xf32> to vector<5xf32>
    %13 = vector.shape_cast %12 : vector<5xf32> to vector<5x1xf32>
    %14 = vector.broadcast %13 : vector<5x1xf32> to vector<5x5xf32>
    %15 = arith.subf %11, %14 : vector<5x5xf32>
    %16 = math.exp %15 : vector<5x5xf32>
    %cst_10 = arith.constant dense<0.000000e+00> : vector<5xf32>
    %17 = vector.multi_reduction <add>, %16, %cst_10 [1] : vector<5x5xf32> to vector<5xf32>
    %18 = vector.shape_cast %17 : vector<5xf32> to vector<5x1xf32>
    %19 = tpu.reciprocal %18 {approx = true} : vector<5x1xf32> -> vector<5x1xf32>
    %20 = arith.truncf %16 : vector<5x5xf32> to vector<5x5xbf16>
    %cst_11 = arith.constant dense<0.000000e+00> : vector<5x64xf32>
    %21 = tpu.matmul %20, %8, %cst_11 {dimension_numbers = #tpu.dot_dimension_numbers<[1], [0], [0], [1], [0, 0, 1, 1], [], []>} : vector<5x5xbf16>, vector<5x64xbf16>, vector<5x64xf32> -> vector<5x64xf32>
    %22 = vector.broadcast %19 : vector<5x1xf32> to vector<5x64xf32>
    %23 = arith.mulf %21, %22 : vector<5x64xf32>
    %24 = arith.truncf %23 : vector<5x64xf32> to vector<5x64xbf16>
    %c0_12 = arith.constant 0 : index
    %c0_13 = arith.constant 0 : index
    %c0_14 = arith.constant 0 : index
    %25 = vector.load %arg5[%c0_12, %c0_13, %c0_14] : memref<1x5x128xbf16, #tpu.memory_space<vmem>>, vector<1x5x64xbf16>
    %26 = vector.shape_cast %25 : vector<1x5x64xbf16> to vector<5x64xbf16>
    %27 = vector.shape_cast %24 : vector<5x64xbf16> to vector<1x5x64xbf16>
    tpu.vector_store %arg5[%c0_12, %c0_13, %c0_14], %27 {strides = array<i32>} : memref<1x5x128xbf16, #tpu.memory_space<vmem>>, vector<1x5x64xbf16>,
    %28 = vector.extract_strided_slice %1 {offsets = [0, 64], sizes = [5, 64], strides = [1, 1]} : vector<5x128xbf16> to vector<5x64xbf16>
    %29 = vector.extract_strided_slice %3 {offsets = [0, 64], sizes = [5, 64], strides = [1, 1]} : vector<5x128xbf16> to vector<5x64xbf16>
    %30 = vector.extract_strided_slice %5 {offsets = [0, 64], sizes = [5, 64], strides = [1, 1]} : vector<5x128xbf16> to vector<5x64xbf16>
    %cst_15 = arith.constant 1.250000e-01 : bf16
    %31 = vector.broadcast %cst_15 : bf16 to vector<5x64xbf16>
    %32 = arith.mulf %28, %31 : vector<5x64xbf16>
    %cst_16 = arith.constant dense<0.000000e+00> : vector<5x5xf32>
    %33 = tpu.matmul %32, %29, %cst_16 {dimension_numbers = #tpu.dot_dimension_numbers<[1], [1], [0], [0], [0, 0, 1, 0], [], []>} : vector<5x64xbf16>, vector<5x64xbf16>, vector<5x5xf32> -> vector<5x5xf32>
    %cst_17 = arith.constant dense<0xFF800000> : vector<5xf32>
    %34 = vector.multi_reduction <maximumf>, %33, %cst_17 [1] : vector<5x5xf32> to vector<5xf32>
    %35 = vector.shape_cast %34 : vector<5xf32> to vector<5x1xf32>
    %36 = vector.broadcast %35 : vector<5x1xf32> to vector<5x5xf32>
    %37 = arith.subf %33, %36 : vector<5x5xf32>
    %38 = math.exp %37 : vector<5x5xf32>
    %cst_18 = arith.constant dense<0.000000e+00> : vector<5xf32>
    %39 = vector.multi_reduction <add>, %38, %cst_18 [1] : vector<5x5xf32> to vector<5xf32>
    %40 = vector.shape_cast %39 : vector<5xf32> to vector<5x1xf32>
    %41 = tpu.reciprocal %40 {approx = true} : vector<5x1xf32> -> vector<5x1xf32>
    %42 = arith.truncf %38 : vector<5x5xf32> to vector<5x5xbf16>
    %cst_19 = arith.constant dense<0.000000e+00> : vector<5x64xf32>
    %43 = tpu.matmul %42, %30, %cst_19 {dimension_numbers = #tpu.dot_dimension_numbers<[1], [0], [0], [1], [0, 0, 1, 1], [], []>} : vector<5x5xbf16>, vector<5x64xbf16>, vector<5x64xf32> -> vector<5x64xf32>
    %44 = vector.broadcast %41 : vector<5x1xf32> to vector<5x64xf32>
    %45 = arith.mulf %43, %44 : vector<5x64xf32>
    %46 = arith.truncf %45 : vector<5x64xf32> to vector<5x64xbf16>
    %c0_20 = arith.constant 0 : index
    %c0_21 = arith.constant 0 : index
    %c64 = arith.constant 64 : index
    %47 = vector.load %arg5[%c0_20, %c0_21, %c64] : memref<1x5x128xbf16, #tpu.memory_space<vmem>>, vector<1x5x64xbf16>
    %48 = vector.shape_cast %47 : vector<1x5x64xbf16> to vector<5x64xbf16>
    %49 = vector.shape_cast %46 : vector<5x64xbf16> to vector<1x5x64xbf16>
    tpu.vector_store %arg5[%c0_20, %c0_21, %c64], %49 {strides = array<i32>} : memref<1x5x128xbf16, #tpu.memory_space<vmem>>, vector<1x5x64xbf16>,
    return
  }
  func.func @transform_0(%arg0: i32, %arg1: i32) -> (i32, i32, i32) {
    %c0_i32 = arith.constant 0 : i32
    %c0_i32_0 = arith.constant 0 : i32
    return %arg0, %c0_i32, %arg1 : i32, i32, i32
  }
  func.func @transform_1(%arg0: i32, %arg1: i32) -> (i32, i32, i32) {
    %c1_i32 = arith.constant 1 : i32
    %0 = arith.addi %c1_i32, %arg1 : i32
    %c0_i32 = arith.constant 0 : i32
    %c0_i32_0 = arith.constant 0 : i32
    return %arg0, %c0_i32, %0 : i32, i32, i32
  }
  func.func @transform_2(%arg0: i32, %arg1: i32) -> (i32, i32, i32) {
    %c2_i32 = arith.constant 2 : i32
    %0 = arith.addi %c2_i32, %arg1 : i32
    %c0_i32 = arith.constant 0 : i32
    %c0_i32_0 = arith.constant 0 : i32
    return %arg0, %c0_i32, %0 : i32, i32, i32
  }
  func.func @transform_3(%arg0: i32, %arg1: i32) -> (i32, i32, i32) {
    %c0_i32 = arith.constant 0 : i32
    %c0_i32_0 = arith.constant 0 : i32
    return %arg0, %c0_i32, %arg1 : i32, i32, i32
  }
}

module attributes {stable_mosaic.version = 11 : i64} {
  func.func @_fused_linear_kernel(%arg0: i32, %arg1: memref<10x128xbf16, #tpu.memory_space<vmem>>, %arg2: memref<128x128xbf16, #tpu.memory_space<vmem>>, %arg3: memref<1x128xf32, #tpu.memory_space<vmem>>, %arg4: memref<10x128xbf16, #tpu.memory_space<vmem>>, %arg5: memref<10x128xbf16, #tpu.memory_space<vmem>>) attributes {dimension_semantics = [#tpu.dimension_semantics<parallel>], iteration_bounds = array<i64: 1>, scalar_prefetch = 0 : i64, scratch_operands = 0 : i64, tpu.core_type = #tpu.core_type<tc>, window_params = [{transform_indices = @transform_0, window_bounds = array<i64: 10, 128>}, {pipeline_mode = #tpu.pipeline_mode<synchronous>, transform_indices = @transform_1, window_bounds = array<i64: 128, 128>}, {pipeline_mode = #tpu.pipeline_mode<synchronous>, transform_indices = @transform_2, window_bounds = array<i64: 1, 128>}, {transform_indices = @transform_3, window_bounds = array<i64: 10, 128>}, {transform_indices = @transform_4, window_bounds = array<i64: 10, 128>}]} {
    %c0 = arith.constant 0 : index
    %c0_0 = arith.constant 0 : index
    %0 = vector.load %arg1[%c0, %c0_0] : memref<10x128xbf16, #tpu.memory_space<vmem>>, vector<10x128xbf16>
    %c0_1 = arith.constant 0 : index
    %c0_2 = arith.constant 0 : index
    %1 = vector.load %arg2[%c0_1, %c0_2] : memref<128x128xbf16, #tpu.memory_space<vmem>>, vector<128x128xbf16>
    %cst = arith.constant dense<0.000000e+00> : vector<10x128xf32>
    %2 = tpu.matmul %0, %1, %cst {dimension_numbers = #tpu.dot_dimension_numbers<[1], [0], [0], [1], [0, 0, 1, 1], [], []>} : vector<10x128xbf16>, vector<128x128xbf16>, vector<10x128xf32> -> vector<10x128xf32>
    %c0_3 = arith.constant 0 : index
    %c0_4 = arith.constant 0 : index
    %3 = vector.load %arg3[%c0_3, %c0_4] : memref<1x128xf32, #tpu.memory_space<vmem>>, vector<1x128xf32>
    %4 = vector.broadcast %3 : vector<1x128xf32> to vector<10x128xf32>
    %5 = arith.addf %2, %4 : vector<10x128xf32>
    %c0_5 = arith.constant 0 : index
    %c0_6 = arith.constant 0 : index
    %6 = vector.load %arg4[%c0_5, %c0_6] : memref<10x128xbf16, #tpu.memory_space<vmem>>, vector<10x128xbf16>
    %7 = arith.extf %6 : vector<10x128xbf16> to vector<10x128xf32>
    %8 = arith.addf %5, %7 : vector<10x128xf32>
    %9 = arith.truncf %8 : vector<10x128xf32> to vector<10x128xbf16>
    %c0_7 = arith.constant 0 : index
    %c0_8 = arith.constant 0 : index
    %10 = vector.load %arg5[%c0_7, %c0_8] : memref<10x128xbf16, #tpu.memory_space<vmem>>, vector<10x128xbf16>
    tpu.vector_store %arg5[%c0_7, %c0_8], %9 {strides = array<i32>} : memref<10x128xbf16, #tpu.memory_space<vmem>>, vector<10x128xbf16>,
    return
  }
  func.func @transform_0(%arg0: i32) -> (i32, i32) {
    %c0_i32 = arith.constant 0 : i32
    %c0_i32_0 = arith.constant 0 : i32
    return %arg0, %c0_i32 : i32, i32
  }
  func.func @transform_1(%arg0: i32) -> (i32, i32) {
    %c0_i32 = arith.constant 0 : i32
    %c0_i32_0 = arith.constant 0 : i32
    %c0_i32_1 = arith.constant 0 : i32
    return %c0_i32, %c0_i32_0 : i32, i32
  }
  func.func @transform_2(%arg0: i32) -> (i32, i32) {
    %c0_i32 = arith.constant 0 : i32
    %c0_i32_0 = arith.constant 0 : i32
    %c0_i32_1 = arith.constant 0 : i32
    return %c0_i32, %c0_i32_0 : i32, i32
  }
  func.func @transform_3(%arg0: i32) -> (i32, i32) {
    %c0_i32 = arith.constant 0 : i32
    %c0_i32_0 = arith.constant 0 : i32
    return %arg0, %c0_i32 : i32, i32
  }
  func.func @transform_4(%arg0: i32) -> (i32, i32) {
    %c0_i32 = arith.constant 0 : i32
    %c0_i32_0 = arith.constant 0 : i32
    return %arg0, %c0_i32 : i32, i32
  }
}

module attributes {stable_mosaic.version = 11 : i64} {
  func.func @_fused_linear_kernel(%arg0: i32, %arg1: memref<10x512xbf16, #tpu.memory_space<vmem>>, %arg2: memref<512x128xbf16, #tpu.memory_space<vmem>>, %arg3: memref<1x128xf32, #tpu.memory_space<vmem>>, %arg4: memref<10x128xbf16, #tpu.memory_space<vmem>>, %arg5: memref<10x128xbf16, #tpu.memory_space<vmem>>) attributes {dimension_semantics = [#tpu.dimension_semantics<parallel>], iteration_bounds = array<i64: 1>, scalar_prefetch = 0 : i64, scratch_operands = 0 : i64, tpu.core_type = #tpu.core_type<tc>, window_params = [{transform_indices = @transform_0, window_bounds = array<i64: 10, 512>}, {pipeline_mode = #tpu.pipeline_mode<synchronous>, transform_indices = @transform_1, window_bounds = array<i64: 512, 128>}, {pipeline_mode = #tpu.pipeline_mode<synchronous>, transform_indices = @transform_2, window_bounds = array<i64: 1, 128>}, {transform_indices = @transform_3, window_bounds = array<i64: 10, 128>}, {transform_indices = @transform_4, window_bounds = array<i64: 10, 128>}]} {
    %c0 = arith.constant 0 : index
    %c0_0 = arith.constant 0 : index
    %0 = vector.load %arg1[%c0, %c0_0] : memref<10x512xbf16, #tpu.memory_space<vmem>>, vector<10x512xbf16>
    %c0_1 = arith.constant 0 : index
    %c0_2 = arith.constant 0 : index
    %1 = vector.load %arg2[%c0_1, %c0_2] : memref<512x128xbf16, #tpu.memory_space<vmem>>, vector<512x128xbf16>
    %cst = arith.constant dense<0.000000e+00> : vector<10x128xf32>
    %2 = tpu.matmul %0, %1, %cst {dimension_numbers = #tpu.dot_dimension_numbers<[1], [0], [0], [1], [0, 0, 1, 1], [], []>} : vector<10x512xbf16>, vector<512x128xbf16>, vector<10x128xf32> -> vector<10x128xf32>
    %c0_3 = arith.constant 0 : index
    %c0_4 = arith.constant 0 : index
    %3 = vector.load %arg3[%c0_3, %c0_4] : memref<1x128xf32, #tpu.memory_space<vmem>>, vector<1x128xf32>
    %4 = vector.broadcast %3 : vector<1x128xf32> to vector<10x128xf32>
    %5 = arith.addf %2, %4 : vector<10x128xf32>
    %c0_5 = arith.constant 0 : index
    %c0_6 = arith.constant 0 : index
    %6 = vector.load %arg4[%c0_5, %c0_6] : memref<10x128xbf16, #tpu.memory_space<vmem>>, vector<10x128xbf16>
    %7 = arith.extf %6 : vector<10x128xbf16> to vector<10x128xf32>
    %8 = arith.addf %5, %7 : vector<10x128xf32>
    %9 = arith.truncf %8 : vector<10x128xf32> to vector<10x128xbf16>
    %c0_7 = arith.constant 0 : index
    %c0_8 = arith.constant 0 : index
    %10 = vector.load %arg5[%c0_7, %c0_8] : memref<10x128xbf16, #tpu.memory_space<vmem>>, vector<10x128xbf16>
    tpu.vector_store %arg5[%c0_7, %c0_8], %9 {strides = array<i32>} : memref<10x128xbf16, #tpu.memory_space<vmem>>, vector<10x128xbf16>,
    return
  }
  func.func @transform_0(%arg0: i32) -> (i32, i32) {
    %c0_i32 = arith.constant 0 : i32
    %c0_i32_0 = arith.constant 0 : i32
    return %arg0, %c0_i32 : i32, i32
  }
  func.func @transform_1(%arg0: i32) -> (i32, i32) {
    %c0_i32 = arith.constant 0 : i32
    %c0_i32_0 = arith.constant 0 : i32
    %c0_i32_1 = arith.constant 0 : i32
    return %c0_i32, %c0_i32_0 : i32, i32
  }
  func.func @transform_2(%arg0: i32) -> (i32, i32) {
    %c0_i32 = arith.constant 0 : i32
    %c0_i32_0 = arith.constant 0 : i32
    %c0_i32_1 = arith.constant 0 : i32
    return %c0_i32, %c0_i32_0 : i32, i32
  }
  func.func @transform_3(%arg0: i32) -> (i32, i32) {
    %c0_i32 = arith.constant 0 : i32
    %c0_i32_0 = arith.constant 0 : i32
    return %arg0, %c0_i32 : i32, i32
  }
  func.func @transform_4(%arg0: i32) -> (i32, i32) {
    %c0_i32 = arith.constant 0 : i32
    %c0_i32_0 = arith.constant 0 : i32
    return %arg0, %c0_i32 : i32, i32
  }
}

module attributes {stable_mosaic.version = 11 : i64} {
  func.func @_fused_linear_kernel(%arg0: i32, %arg1: memref<10x128xbf16, #tpu.memory_space<vmem>>, %arg2: memref<1x128xf32, #tpu.memory_space<vmem>>, %arg3: memref<1x128xf32, #tpu.memory_space<vmem>>, %arg4: memref<128x512xbf16, #tpu.memory_space<vmem>>, %arg5: memref<1x512xf32, #tpu.memory_space<vmem>>, %arg6: memref<10x512xbf16, #tpu.memory_space<vmem>>) attributes {dimension_semantics = [#tpu.dimension_semantics<parallel>], iteration_bounds = array<i64: 1>, scalar_prefetch = 0 : i64, scratch_operands = 0 : i64, tpu.core_type = #tpu.core_type<tc>, window_params = [{transform_indices = @transform_0, window_bounds = array<i64: 10, 128>}, {pipeline_mode = #tpu.pipeline_mode<synchronous>, transform_indices = @transform_1, window_bounds = array<i64: 1, 128>}, {pipeline_mode = #tpu.pipeline_mode<synchronous>, transform_indices = @transform_2, window_bounds = array<i64: 1, 128>}, {pipeline_mode = #tpu.pipeline_mode<synchronous>, transform_indices = @transform_3, window_bounds = array<i64: 128, 512>}, {pipeline_mode = #tpu.pipeline_mode<synchronous>, transform_indices = @transform_4, window_bounds = array<i64: 1, 512>}, {transform_indices = @transform_5, window_bounds = array<i64: 10, 512>}]} {
    %c0 = arith.constant 0 : index
    %c0_0 = arith.constant 0 : index
    %0 = vector.load %arg1[%c0, %c0_0] : memref<10x128xbf16, #tpu.memory_space<vmem>>, vector<10x128xbf16>
    %1 = arith.extf %0 : vector<10x128xbf16> to vector<10x128xf32>
    %cst = arith.constant dense<0.000000e+00> : vector<10xf32>
    %2 = vector.multi_reduction <add>, %1, %cst [1] : vector<10x128xf32> to vector<10xf32>
    %3 = vector.shape_cast %2 : vector<10xf32> to vector<10x1xf32>
    %cst_1 = arith.constant 1.280000e+02 : f32
    %4 = vector.broadcast %cst_1 : f32 to vector<10x1xf32>
    %5 = arith.divf %3, %4 : vector<10x1xf32>
    %6 = vector.broadcast %5 : vector<10x1xf32> to vector<10x128xf32>
    %7 = arith.subf %1, %6 : vector<10x128xf32>
    %8 = arith.mulf %7, %7 : vector<10x128xf32>
    %cst_2 = arith.constant dense<0.000000e+00> : vector<10xf32>
    %9 = vector.multi_reduction <add>, %8, %cst_2 [1] : vector<10x128xf32> to vector<10xf32>
    %10 = vector.shape_cast %9 : vector<10xf32> to vector<10x1xf32>
    %cst_3 = arith.constant 1.280000e+02 : f32
    %11 = vector.broadcast %cst_3 : f32 to vector<10x1xf32>
    %12 = arith.divf %10, %11 : vector<10x1xf32>
    %cst_4 = arith.constant 9.99999974E-6 : f32
    %13 = vector.broadcast %cst_4 : f32 to vector<10x1xf32>
    %14 = arith.addf %12, %13 : vector<10x1xf32>
    %15 = math.rsqrt %14 : vector<10x1xf32>
    %16 = vector.broadcast %15 : vector<10x1xf32> to vector<10x128xf32>
    %17 = arith.mulf %7, %16 : vector<10x128xf32>
    %c0_5 = arith.constant 0 : index
    %c0_6 = arith.constant 0 : index
    %18 = vector.load %arg2[%c0_5, %c0_6] : memref<1x128xf32, #tpu.memory_space<vmem>>, vector<1x128xf32>
    %19 = vector.broadcast %18 : vector<1x128xf32> to vector<10x128xf32>
    %20 = arith.mulf %17, %19 : vector<10x128xf32>
    %c0_7 = arith.constant 0 : index
    %c0_8 = arith.constant 0 : index
    %21 = vector.load %arg3[%c0_7, %c0_8] : memref<1x128xf32, #tpu.memory_space<vmem>>, vector<1x128xf32>
    %22 = vector.broadcast %21 : vector<1x128xf32> to vector<10x128xf32>
    %23 = arith.addf %20, %22 : vector<10x128xf32>
    %24 = arith.truncf %23 : vector<10x128xf32> to vector<10x128xbf16>
    %c0_9 = arith.constant 0 : index
    %c0_10 = arith.constant 0 : index
    %25 = vector.load %arg4[%c0_9, %c0_10] : memref<128x512xbf16, #tpu.memory_space<vmem>>, vector<128x512xbf16>
    %cst_11 = arith.constant dense<0.000000e+00> : vector<10x512xf32>
    %26 = tpu.matmul %24, %25, %cst_11 {dimension_numbers = #tpu.dot_dimension_numbers<[1], [0], [0], [1], [0, 0, 1, 1], [], []>} : vector<10x128xbf16>, vector<128x512xbf16>, vector<10x512xf32> -> vector<10x512xf32>
    %c0_12 = arith.constant 0 : index
    %c0_13 = arith.constant 0 : index
    %27 = vector.load %arg5[%c0_12, %c0_13] : memref<1x512xf32, #tpu.memory_space<vmem>>, vector<1x512xf32>
    %28 = vector.broadcast %27 : vector<1x512xf32> to vector<10x512xf32>
    %29 = arith.addf %26, %28 : vector<10x512xf32>
    %cst_14 = arith.constant 1.702000e+00 : f32
    %30 = vector.broadcast %cst_14 : f32 to vector<10x512xf32>
    %31 = arith.mulf %30, %29 : vector<10x512xf32>
    %32 = arith.negf %31 : vector<10x512xf32>
    %33 = math.exp %32 : vector<10x512xf32>
    %cst_15 = arith.constant 1.000000e+00 : f32
    %34 = vector.broadcast %cst_15 : f32 to vector<10x512xf32>
    %35 = arith.addf %34, %33 : vector<10x512xf32>
    %36 = arith.divf %34, %35 : vector<10x512xf32>
    %37 = arith.mulf %29, %36 : vector<10x512xf32>
    %38 = arith.truncf %37 : vector<10x512xf32> to vector<10x512xbf16>
    %c0_16 = arith.constant 0 : index
    %c0_17 = arith.constant 0 : index
    %39 = vector.load %arg6[%c0_16, %c0_17] : memref<10x512xbf16, #tpu.memory_space<vmem>>, vector<10x512xbf16>
    tpu.vector_store %arg6[%c0_16, %c0_17], %38 {strides = array<i32>} : memref<10x512xbf16, #tpu.memory_space<vmem>>, vector<10x512xbf16>,
    return
  }
  func.func @transform_0(%arg0: i32) -> (i32, i32) {
    %c0_i32 = arith.constant 0 : i32
    %c0_i32_0 = arith.constant 0 : i32
    return %arg0, %c0_i32 : i32, i32
  }
  func.func @transform_1(%arg0: i32) -> (i32, i32) {
    %c0_i32 = arith.constant 0 : i32
    %c0_i32_0 = arith.constant 0 : i32
    %c0_i32_1 = arith.constant 0 : i32
    return %c0_i32, %c0_i32_0 : i32, i32
  }
  func.func @transform_2(%arg0: i32) -> (i32, i32) {
    %c0_i32 = arith.constant 0 : i32
    %c0_i32_0 = arith.constant 0 : i32
    %c0_i32_1 = arith.constant 0 : i32
    return %c0_i32, %c0_i32_0 : i32, i32
  }
  func.func @transform_3(%arg0: i32) -> (i32, i32) {
    %c0_i32 = arith.constant 0 : i32
    %c0_i32_0 = arith.constant 0 : i32
    %c0_i32_1 = arith.constant 0 : i32
    return %c0_i32, %c0_i32_0 : i32, i32
  }
  func.func @transform_4(%arg0: i32) -> (i32, i32) {
    %c0_i32 = arith.constant 0 : i32
    %c0_i32_0 = arith.constant 0 : i32
    %c0_i32_1 = arith.constant 0 : i32
    return %c0_i32, %c0_i32_0 : i32, i32
  }
  func.func @transform_5(%arg0: i32) -> (i32, i32) {
    %c0_i32 = arith.constant 0 : i32
    %c0_i32_0 = arith.constant 0 : i32
    return %arg0, %c0_i32 : i32, i32
  }
}

module attributes {stable_mosaic.version = 11 : i64} {
  func.func @_fused_linear_kernel(%arg0: i32, %arg1: memref<10x128xbf16, #tpu.memory_space<vmem>>, %arg2: memref<1x128xf32, #tpu.memory_space<vmem>>, %arg3: memref<1x128xf32, #tpu.memory_space<vmem>>, %arg4: memref<128x512xbf16, #tpu.memory_space<vmem>>, %arg5: memref<1x512xf32, #tpu.memory_space<vmem>>, %arg6: memref<10x512xbf16, #tpu.memory_space<vmem>>) attributes {dimension_semantics = [#tpu.dimension_semantics<parallel>], iteration_bounds = array<i64: 1>, scalar_prefetch = 0 : i64, scratch_operands = 0 : i64, tpu.core_type = #tpu.core_type<tc>, window_params = [{transform_indices = @transform_0, window_bounds = array<i64: 10, 128>}, {pipeline_mode = #tpu.pipeline_mode<synchronous>, transform_indices = @transform_1, window_bounds = array<i64: 1, 128>}, {pipeline_mode = #tpu.pipeline_mode<synchronous>, transform_indices = @transform_2, window_bounds = array<i64: 1, 128>}, {pipeline_mode = #tpu.pipeline_mode<synchronous>, transform_indices = @transform_3, window_bounds = array<i64: 128, 512>}, {pipeline_mode = #tpu.pipeline_mode<synchronous>, transform_indices = @transform_4, window_bounds = array<i64: 1, 512>}, {transform_indices = @transform_5, window_bounds = array<i64: 10, 512>}]} {
    %c0 = arith.constant 0 : index
    %c0_0 = arith.constant 0 : index
    %0 = vector.load %arg1[%c0, %c0_0] : memref<10x128xbf16, #tpu.memory_space<vmem>>, vector<10x128xbf16>
    %1 = arith.extf %0 : vector<10x128xbf16> to vector<10x128xf32>
    %cst = arith.constant dense<0.000000e+00> : vector<10xf32>
    %2 = vector.multi_reduction <add>, %1, %cst [1] : vector<10x128xf32> to vector<10xf32>
    %3 = vector.shape_cast %2 : vector<10xf32> to vector<10x1xf32>
    %cst_1 = arith.constant 1.280000e+02 : f32
    %4 = vector.broadcast %cst_1 : f32 to vector<10x1xf32>
    %5 = arith.divf %3, %4 : vector<10x1xf32>
    %6 = vector.broadcast %5 : vector<10x1xf32> to vector<10x128xf32>
    %7 = arith.subf %1, %6 : vector<10x128xf32>
    %8 = arith.mulf %7, %7 : vector<10x128xf32>
    %cst_2 = arith.constant dense<0.000000e+00> : vector<10xf32>
    %9 = vector.multi_reduction <add>, %8, %cst_2 [1] : vector<10x128xf32> to vector<10xf32>
    %10 = vector.shape_cast %9 : vector<10xf32> to vector<10x1xf32>
    %cst_3 = arith.constant 1.280000e+02 : f32
    %11 = vector.broadcast %cst_3 : f32 to vector<10x1xf32>
    %12 = arith.divf %10, %11 : vector<10x1xf32>
    %cst_4 = arith.constant 9.99999974E-6 : f32
    %13 = vector.broadcast %cst_4 : f32 to vector<10x1xf32>
    %14 = arith.addf %12, %13 : vector<10x1xf32>
    %15 = math.rsqrt %14 : vector<10x1xf32>
    %16 = vector.broadcast %15 : vector<10x1xf32> to vector<10x128xf32>
    %17 = arith.mulf %7, %16 : vector<10x128xf32>
    %c0_5 = arith.constant 0 : index
    %c0_6 = arith.constant 0 : index
    %18 = vector.load %arg2[%c0_5, %c0_6] : memref<1x128xf32, #tpu.memory_space<vmem>>, vector<1x128xf32>
    %19 = vector.broadcast %18 : vector<1x128xf32> to vector<10x128xf32>
    %20 = arith.mulf %17, %19 : vector<10x128xf32>
    %c0_7 = arith.constant 0 : index
    %c0_8 = arith.constant 0 : index
    %21 = vector.load %arg3[%c0_7, %c0_8] : memref<1x128xf32, #tpu.memory_space<vmem>>, vector<1x128xf32>
    %22 = vector.broadcast %21 : vector<1x128xf32> to vector<10x128xf32>
    %23 = arith.addf %20, %22 : vector<10x128xf32>
    %24 = arith.truncf %23 : vector<10x128xf32> to vector<10x128xbf16>
    %c0_9 = arith.constant 0 : index
    %c0_10 = arith.constant 0 : index
    %25 = vector.load %arg4[%c0_9, %c0_10] : memref<128x512xbf16, #tpu.memory_space<vmem>>, vector<128x512xbf16>
    %cst_11 = arith.constant dense<0.000000e+00> : vector<10x512xf32>
    %26 = tpu.matmul %24, %25, %cst_11 {dimension_numbers = #tpu.dot_dimension_numbers<[1], [0], [0], [1], [0, 0, 1, 1], [], []>} : vector<10x128xbf16>, vector<128x512xbf16>, vector<10x512xf32> -> vector<10x512xf32>
    %c0_12 = arith.constant 0 : index
    %c0_13 = arith.constant 0 : index
    %27 = vector.load %arg5[%c0_12, %c0_13] : memref<1x512xf32, #tpu.memory_space<vmem>>, vector<1x512xf32>
    %28 = vector.broadcast %27 : vector<1x512xf32> to vector<10x512xf32>
    %29 = arith.addf %26, %28 : vector<10x512xf32>
    %cst_14 = arith.constant 1.702000e+00 : f32
    %30 = vector.broadcast %cst_14 : f32 to vector<10x512xf32>
    %31 = arith.mulf %30, %29 : vector<10x512xf32>
    %32 = arith.negf %31 : vector<10x512xf32>
    %33 = math.exp %32 : vector<10x512xf32>
    %cst_15 = arith.constant 1.000000e+00 : f32
    %34 = vector.broadcast %cst_15 : f32 to vector<10x512xf32>
    %35 = arith.addf %34, %33 : vector<10x512xf32>
    %36 = arith.divf %34, %35 : vector<10x512xf32>
    %37 = arith.mulf %29, %36 : vector<10x512xf32>
    %38 = arith.truncf %37 : vector<10x512xf32> to vector<10x512xbf16>
    %c0_16 = arith.constant 0 : index
    %c0_17 = arith.constant 0 : index
    %39 = vector.load %arg6[%c0_16, %c0_17] : memref<10x512xbf16, #tpu.memory_space<vmem>>, vector<10x512xbf16>
    tpu.vector_store %arg6[%c0_16, %c0_17], %38 {strides = array<i32>} : memref<10x512xbf16, #tpu.memory_space<vmem>>, vector<10x512xbf16>,
    return
  }
  func.func @transform_0(%arg0: i32) -> (i32, i32) {
    %c0_i32 = arith.constant 0 : i32
    %c0_i32_0 = arith.constant 0 : i32
    return %arg0, %c0_i32 : i32, i32
  }
  func.func @transform_1(%arg0: i32) -> (i32, i32) {
    %c0_i32 = arith.constant 0 : i32
    %c0_i32_0 = arith.constant 0 : i32
    %c0_i32_1 = arith.constant 0 : i32
    return %c0_i32, %c0_i32_0 : i32, i32
  }
  func.func @transform_2(%arg0: i32) -> (i32, i32) {
    %c0_i32 = arith.constant 0 : i32
    %c0_i32_0 = arith.constant 0 : i32
    %c0_i32_1 = arith.constant 0 : i32
    return %c0_i32, %c0_i32_0 : i32, i32
  }
  func.func @transform_3(%arg0: i32) -> (i32, i32) {
    %c0_i32 = arith.constant 0 : i32
    %c0_i32_0 = arith.constant 0 : i32
    %c0_i32_1 = arith.constant 0 : i32
    return %c0_i32, %c0_i32_0 : i32, i32
  }
  func.func @transform_4(%arg0: i32) -> (i32, i32) {
    %c0_i32 = arith.constant 0 : i32
    %c0_i32_0 = arith.constant 0 : i32
    %c0_i32_1 = arith.constant 0 : i32
    return %c0_i32, %c0_i32_0 : i32, i32
  }
  func.func @transform_5(%arg0: i32) -> (i32, i32) {
    %c0_i32 = arith.constant 0 : i32
    %c0_i32_0 = arith.constant 0 : i32
    return %arg0, %c0_i32 : i32, i32
  }
}

module attributes {stable_mosaic.version = 11 : i64} {
  func.func @_fused_linear_kernel(%arg0: i32, %arg1: memref<10x512xbf16, #tpu.memory_space<vmem>>, %arg2: memref<512x128xbf16, #tpu.memory_space<vmem>>, %arg3: memref<1x128xf32, #tpu.memory_space<vmem>>, %arg4: memref<10x128xbf16, #tpu.memory_space<vmem>>, %arg5: memref<10x128xbf16, #tpu.memory_space<vmem>>) attributes {dimension_semantics = [#tpu.dimension_semantics<parallel>], iteration_bounds = array<i64: 1>, scalar_prefetch = 0 : i64, scratch_operands = 0 : i64, tpu.core_type = #tpu.core_type<tc>, window_params = [{transform_indices = @transform_0, window_bounds = array<i64: 10, 512>}, {pipeline_mode = #tpu.pipeline_mode<synchronous>, transform_indices = @transform_1, window_bounds = array<i64: 512, 128>}, {pipeline_mode = #tpu.pipeline_mode<synchronous>, transform_indices = @transform_2, window_bounds = array<i64: 1, 128>}, {transform_indices = @transform_3, window_bounds = array<i64: 10, 128>}, {transform_indices = @transform_4, window_bounds = array<i64: 10, 128>}]} {
    %c0 = arith.constant 0 : index
    %c0_0 = arith.constant 0 : index
    %0 = vector.load %arg1[%c0, %c0_0] : memref<10x512xbf16, #tpu.memory_space<vmem>>, vector<10x512xbf16>
    %c0_1 = arith.constant 0 : index
    %c0_2 = arith.constant 0 : index
    %1 = vector.load %arg2[%c0_1, %c0_2] : memref<512x128xbf16, #tpu.memory_space<vmem>>, vector<512x128xbf16>
    %cst = arith.constant dense<0.000000e+00> : vector<10x128xf32>
    %2 = tpu.matmul %0, %1, %cst {dimension_numbers = #tpu.dot_dimension_numbers<[1], [0], [0], [1], [0, 0, 1, 1], [], []>} : vector<10x512xbf16>, vector<512x128xbf16>, vector<10x128xf32> -> vector<10x128xf32>
    %c0_3 = arith.constant 0 : index
    %c0_4 = arith.constant 0 : index
    %3 = vector.load %arg3[%c0_3, %c0_4] : memref<1x128xf32, #tpu.memory_space<vmem>>, vector<1x128xf32>
    %4 = vector.broadcast %3 : vector<1x128xf32> to vector<10x128xf32>
    %5 = arith.addf %2, %4 : vector<10x128xf32>
    %c0_5 = arith.constant 0 : index
    %c0_6 = arith.constant 0 : index
    %6 = vector.load %arg4[%c0_5, %c0_6] : memref<10x128xbf16, #tpu.memory_space<vmem>>, vector<10x128xbf16>
    %7 = arith.extf %6 : vector<10x128xbf16> to vector<10x128xf32>
    %8 = arith.addf %5, %7 : vector<10x128xf32>
    %9 = arith.truncf %8 : vector<10x128xf32> to vector<10x128xbf16>
    %c0_7 = arith.constant 0 : index
    %c0_8 = arith.constant 0 : index
    %10 = vector.load %arg5[%c0_7, %c0_8] : memref<10x128xbf16, #tpu.memory_space<vmem>>, vector<10x128xbf16>
    tpu.vector_store %arg5[%c0_7, %c0_8], %9 {strides = array<i32>} : memref<10x128xbf16, #tpu.memory_space<vmem>>, vector<10x128xbf16>,
    return
  }
  func.func @transform_0(%arg0: i32) -> (i32, i32) {
    %c0_i32 = arith.constant 0 : i32
    %c0_i32_0 = arith.constant 0 : i32
    return %arg0, %c0_i32 : i32, i32
  }
  func.func @transform_1(%arg0: i32) -> (i32, i32) {
    %c0_i32 = arith.constant 0 : i32
    %c0_i32_0 = arith.constant 0 : i32
    %c0_i32_1 = arith.constant 0 : i32
    return %c0_i32, %c0_i32_0 : i32, i32
  }
  func.func @transform_2(%arg0: i32) -> (i32, i32) {
    %c0_i32 = arith.constant 0 : i32
    %c0_i32_0 = arith.constant 0 : i32
    %c0_i32_1 = arith.constant 0 : i32
    return %c0_i32, %c0_i32_0 : i32, i32
  }
  func.func @transform_3(%arg0: i32) -> (i32, i32) {
    %c0_i32 = arith.constant 0 : i32
    %c0_i32_0 = arith.constant 0 : i32
    return %arg0, %c0_i32 : i32, i32
  }
  func.func @transform_4(%arg0: i32) -> (i32, i32) {
    %c0_i32 = arith.constant 0 : i32
    %c0_i32_0 = arith.constant 0 : i32
    return %arg0, %c0_i32 : i32, i32
  }
}

module attributes {stable_mosaic.version = 11 : i64} {
  func.func @_fused_linear_kernel(%arg0: i32, %arg1: memref<2x128xbf16, #tpu.memory_space<vmem>>, %arg2: memref<1x128xf32, #tpu.memory_space<vmem>>, %arg3: memref<1x128xf32, #tpu.memory_space<vmem>>, %arg4: memref<128x32xbf16, #tpu.memory_space<vmem>>, %arg5: memref<1x32xf32, #tpu.memory_space<vmem>>, %arg6: memref<2x32xbf16, #tpu.memory_space<vmem>>) attributes {dimension_semantics = [#tpu.dimension_semantics<parallel>], iteration_bounds = array<i64: 1>, scalar_prefetch = 0 : i64, scratch_operands = 0 : i64, tpu.core_type = #tpu.core_type<tc>, window_params = [{transform_indices = @transform_0, window_bounds = array<i64: 2, 128>}, {pipeline_mode = #tpu.pipeline_mode<synchronous>, transform_indices = @transform_1, window_bounds = array<i64: 1, 128>}, {pipeline_mode = #tpu.pipeline_mode<synchronous>, transform_indices = @transform_2, window_bounds = array<i64: 1, 128>}, {pipeline_mode = #tpu.pipeline_mode<synchronous>, transform_indices = @transform_3, window_bounds = array<i64: 128, 32>}, {pipeline_mode = #tpu.pipeline_mode<synchronous>, transform_indices = @transform_4, window_bounds = array<i64: 1, 32>}, {transform_indices = @transform_5, window_bounds = array<i64: 2, 32>}]} {
    %c0 = arith.constant 0 : index
    %c0_0 = arith.constant 0 : index
    %0 = vector.load %arg1[%c0, %c0_0] : memref<2x128xbf16, #tpu.memory_space<vmem>>, vector<2x128xbf16>
    %1 = arith.extf %0 : vector<2x128xbf16> to vector<2x128xf32>
    %cst = arith.constant dense<0.000000e+00> : vector<2xf32>
    %2 = vector.multi_reduction <add>, %1, %cst [1] : vector<2x128xf32> to vector<2xf32>
    %3 = vector.shape_cast %2 : vector<2xf32> to vector<2x1xf32>
    %cst_1 = arith.constant 1.280000e+02 : f32
    %4 = vector.broadcast %cst_1 : f32 to vector<2x1xf32>
    %5 = arith.divf %3, %4 : vector<2x1xf32>
    %6 = vector.broadcast %5 : vector<2x1xf32> to vector<2x128xf32>
    %7 = arith.subf %1, %6 : vector<2x128xf32>
    %8 = arith.mulf %7, %7 : vector<2x128xf32>
    %cst_2 = arith.constant dense<0.000000e+00> : vector<2xf32>
    %9 = vector.multi_reduction <add>, %8, %cst_2 [1] : vector<2x128xf32> to vector<2xf32>
    %10 = vector.shape_cast %9 : vector<2xf32> to vector<2x1xf32>
    %cst_3 = arith.constant 1.280000e+02 : f32
    %11 = vector.broadcast %cst_3 : f32 to vector<2x1xf32>
    %12 = arith.divf %10, %11 : vector<2x1xf32>
    %cst_4 = arith.constant 9.99999974E-6 : f32
    %13 = vector.broadcast %cst_4 : f32 to vector<2x1xf32>
    %14 = arith.addf %12, %13 : vector<2x1xf32>
    %15 = math.rsqrt %14 : vector<2x1xf32>
    %16 = vector.broadcast %15 : vector<2x1xf32> to vector<2x128xf32>
    %17 = arith.mulf %7, %16 : vector<2x128xf32>
    %c0_5 = arith.constant 0 : index
    %c0_6 = arith.constant 0 : index
    %18 = vector.load %arg2[%c0_5, %c0_6] : memref<1x128xf32, #tpu.memory_space<vmem>>, vector<1x128xf32>
    %19 = vector.broadcast %18 : vector<1x128xf32> to vector<2x128xf32>
    %20 = arith.mulf %17, %19 : vector<2x128xf32>
    %c0_7 = arith.constant 0 : index
    %c0_8 = arith.constant 0 : index
    %21 = vector.load %arg3[%c0_7, %c0_8] : memref<1x128xf32, #tpu.memory_space<vmem>>, vector<1x128xf32>
    %22 = vector.broadcast %21 : vector<1x128xf32> to vector<2x128xf32>
    %23 = arith.addf %20, %22 : vector<2x128xf32>
    %24 = arith.truncf %23 : vector<2x128xf32> to vector<2x128xbf16>
    %c0_9 = arith.constant 0 : index
    %c0_10 = arith.constant 0 : index
    %25 = vector.load %arg4[%c0_9, %c0_10] : memref<128x32xbf16, #tpu.memory_space<vmem>>, vector<128x32xbf16>
    %cst_11 = arith.constant dense<0.000000e+00> : vector<2x32xf32>
    %26 = tpu.matmul %24, %25, %cst_11 {dimension_numbers = #tpu.dot_dimension_numbers<[1], [0], [0], [1], [0, 0, 1, 1], [], []>} : vector<2x128xbf16>, vector<128x32xbf16>, vector<2x32xf32> -> vector<2x32xf32>
    %c0_12 = arith.constant 0 : index
    %c0_13 = arith.constant 0 : index
    %27 = vector.load %arg5[%c0_12, %c0_13] : memref<1x32xf32, #tpu.memory_space<vmem>>, vector<1x32xf32>
    %28 = vector.broadcast %27 : vector<1x32xf32> to vector<2x32xf32>
    %29 = arith.addf %26, %28 : vector<2x32xf32>
    %30 = arith.truncf %29 : vector<2x32xf32> to vector<2x32xbf16>
    %c0_14 = arith.constant 0 : index
    %c0_15 = arith.constant 0 : index
    %31 = vector.load %arg6[%c0_14, %c0_15] : memref<2x32xbf16, #tpu.memory_space<vmem>>, vector<2x32xbf16>
    tpu.vector_store %arg6[%c0_14, %c0_15], %30 {strides = array<i32>} : memref<2x32xbf16, #tpu.memory_space<vmem>>, vector<2x32xbf16>,
    return
  }
  func.func @transform_0(%arg0: i32) -> (i32, i32) {
    %c0_i32 = arith.constant 0 : i32
    %c0_i32_0 = arith.constant 0 : i32
    return %arg0, %c0_i32 : i32, i32
  }
  func.func @transform_1(%arg0: i32) -> (i32, i32) {
    %c0_i32 = arith.constant 0 : i32
    %c0_i32_0 = arith.constant 0 : i32
    %c0_i32_1 = arith.constant 0 : i32
    return %c0_i32, %c0_i32_0 : i32, i32
  }
  func.func @transform_2(%arg0: i32) -> (i32, i32) {
    %c0_i32 = arith.constant 0 : i32
    %c0_i32_0 = arith.constant 0 : i32
    %c0_i32_1 = arith.constant 0 : i32
    return %c0_i32, %c0_i32_0 : i32, i32
  }
  func.func @transform_3(%arg0: i32) -> (i32, i32) {
    %c0_i32 = arith.constant 0 : i32
    %c0_i32_0 = arith.constant 0 : i32
    %c0_i32_1 = arith.constant 0 : i32
    return %c0_i32, %c0_i32_0 : i32, i32
  }
  func.func @transform_4(%arg0: i32) -> (i32, i32) {
    %c0_i32 = arith.constant 0 : i32
    %c0_i32_0 = arith.constant 0 : i32
    %c0_i32_1 = arith.constant 0 : i32
    return %c0_i32, %c0_i32_0 : i32, i32
  }
  func.func @transform_5(%arg0: i32) -> (i32, i32) {
    %c0_i32 = arith.constant 0 : i32
    %c0_i32_0 = arith.constant 0 : i32
    return %arg0, %c0_i32 : i32, i32
  }
}

module attributes {stable_mosaic.version = 11 : i64} {
  func.func @_attn_full_kernel(%arg0: i32, %arg1: memref<1x16x96xbf16, #tpu.memory_space<vmem>>, %arg2: memref<1x16x32xbf16, #tpu.memory_space<vmem>>) attributes {dimension_semantics = [#tpu.dimension_semantics<parallel>], iteration_bounds = array<i64: 4>, scalar_prefetch = 0 : i64, scratch_operands = 0 : i64, tpu.core_type = #tpu.core_type<tc>, window_params = [{transform_indices = @transform_0, window_bounds = array<i64: 1, 16, 96>}, {transform_indices = @transform_1, window_bounds = array<i64: 1, 16, 32>}]} {
    %c0 = arith.constant 0 : index
    %c0_0 = arith.constant 0 : index
    %c0_1 = arith.constant 0 : index
    %0 = vector.load %arg1[%c0, %c0_0, %c0_1] : memref<1x16x96xbf16, #tpu.memory_space<vmem>>, vector<1x16x96xbf16>
    %1 = vector.shape_cast %0 : vector<1x16x96xbf16> to vector<16x96xbf16>
    %2 = tpu.iota {dimensions = array<i32: 0>} : vector<16x16xi32>
    %3 = tpu.iota {dimensions = array<i32: 1>} : vector<16x16xi32>
    %4 = arith.cmpi sgt, %3, %2 : vector<16x16xi32>
    %cst = arith.constant -1.000000e+30 : f32
    %cst_2 = arith.constant 0.000000e+00 : f32
    %5 = vector.broadcast %cst : f32 to vector<16x16xf32>
    %6 = vector.broadcast %cst_2 : f32 to vector<16x16xf32>
    %7 = arith.select %4, %5, %6 : vector<16x16xi1>, vector<16x16xf32>
    %8 = vector.extract_strided_slice %1 {offsets = [0, 0], sizes = [16, 8], strides = [1, 1]} : vector<16x96xbf16> to vector<16x8xbf16>
    %9 = vector.extract_strided_slice %1 {offsets = [0, 32], sizes = [16, 8], strides = [1, 1]} : vector<16x96xbf16> to vector<16x8xbf16>
    %10 = vector.extract_strided_slice %1 {offsets = [0, 64], sizes = [16, 8], strides = [1, 1]} : vector<16x96xbf16> to vector<16x8xbf16>
    %cst_3 = arith.constant 3.535160e-01 : bf16
    %11 = vector.broadcast %cst_3 : bf16 to vector<16x8xbf16>
    %12 = arith.mulf %8, %11 : vector<16x8xbf16>
    %cst_4 = arith.constant dense<0.000000e+00> : vector<16x16xf32>
    %13 = tpu.matmul %12, %9, %cst_4 {dimension_numbers = #tpu.dot_dimension_numbers<[1], [1], [0], [0], [0, 0, 1, 0], [], []>} : vector<16x8xbf16>, vector<16x8xbf16>, vector<16x16xf32> -> vector<16x16xf32>
    %14 = arith.addf %13, %7 : vector<16x16xf32>
    %cst_5 = arith.constant dense<0xFF800000> : vector<16xf32>
    %15 = vector.multi_reduction <maximumf>, %14, %cst_5 [1] : vector<16x16xf32> to vector<16xf32>
    %16 = vector.shape_cast %15 : vector<16xf32> to vector<16x1xf32>
    %17 = vector.broadcast %16 : vector<16x1xf32> to vector<16x16xf32>
    %18 = arith.subf %14, %17 : vector<16x16xf32>
    %19 = math.exp %18 : vector<16x16xf32>
    %cst_6 = arith.constant dense<0.000000e+00> : vector<16xf32>
    %20 = vector.multi_reduction <add>, %19, %cst_6 [1] : vector<16x16xf32> to vector<16xf32>
    %21 = vector.shape_cast %20 : vector<16xf32> to vector<16x1xf32>
    %22 = tpu.reciprocal %21 {approx = true} : vector<16x1xf32> -> vector<16x1xf32>
    %23 = arith.truncf %19 : vector<16x16xf32> to vector<16x16xbf16>
    %cst_7 = arith.constant dense<0.000000e+00> : vector<16x8xf32>
    %24 = tpu.matmul %23, %10, %cst_7 {dimension_numbers = #tpu.dot_dimension_numbers<[1], [0], [0], [1], [0, 0, 1, 1], [], []>} : vector<16x16xbf16>, vector<16x8xbf16>, vector<16x8xf32> -> vector<16x8xf32>
    %25 = vector.broadcast %22 : vector<16x1xf32> to vector<16x8xf32>
    %26 = arith.mulf %24, %25 : vector<16x8xf32>
    %27 = arith.truncf %26 : vector<16x8xf32> to vector<16x8xbf16>
    %c0_8 = arith.constant 0 : index
    %c0_9 = arith.constant 0 : index
    %c0_10 = arith.constant 0 : index
    %28 = vector.load %arg2[%c0_8, %c0_9, %c0_10] : memref<1x16x32xbf16, #tpu.memory_space<vmem>>, vector<1x16x8xbf16>
    %29 = vector.shape_cast %28 : vector<1x16x8xbf16> to vector<16x8xbf16>
    %30 = vector.shape_cast %27 : vector<16x8xbf16> to vector<1x16x8xbf16>
    tpu.vector_store %arg2[%c0_8, %c0_9, %c0_10], %30 {strides = array<i32>} : memref<1x16x32xbf16, #tpu.memory_space<vmem>>, vector<1x16x8xbf16>,
    %31 = vector.extract_strided_slice %1 {offsets = [0, 8], sizes = [16, 8], strides = [1, 1]} : vector<16x96xbf16> to vector<16x8xbf16>
    %32 = vector.extract_strided_slice %1 {offsets = [0, 40], sizes = [16, 8], strides = [1, 1]} : vector<16x96xbf16> to vector<16x8xbf16>
    %33 = vector.extract_strided_slice %1 {offsets = [0, 72], sizes = [16, 8], strides = [1, 1]} : vector<16x96xbf16> to vector<16x8xbf16>
    %cst_11 = arith.constant 3.535160e-01 : bf16
    %34 = vector.broadcast %cst_11 : bf16 to vector<16x8xbf16>
    %35 = arith.mulf %31, %34 : vector<16x8xbf16>
    %cst_12 = arith.constant dense<0.000000e+00> : vector<16x16xf32>
    %36 = tpu.matmul %35, %32, %cst_12 {dimension_numbers = #tpu.dot_dimension_numbers<[1], [1], [0], [0], [0, 0, 1, 0], [], []>} : vector<16x8xbf16>, vector<16x8xbf16>, vector<16x16xf32> -> vector<16x16xf32>
    %37 = arith.addf %36, %7 : vector<16x16xf32>
    %cst_13 = arith.constant dense<0xFF800000> : vector<16xf32>
    %38 = vector.multi_reduction <maximumf>, %37, %cst_13 [1] : vector<16x16xf32> to vector<16xf32>
    %39 = vector.shape_cast %38 : vector<16xf32> to vector<16x1xf32>
    %40 = vector.broadcast %39 : vector<16x1xf32> to vector<16x16xf32>
    %41 = arith.subf %37, %40 : vector<16x16xf32>
    %42 = math.exp %41 : vector<16x16xf32>
    %cst_14 = arith.constant dense<0.000000e+00> : vector<16xf32>
    %43 = vector.multi_reduction <add>, %42, %cst_14 [1] : vector<16x16xf32> to vector<16xf32>
    %44 = vector.shape_cast %43 : vector<16xf32> to vector<16x1xf32>
    %45 = tpu.reciprocal %44 {approx = true} : vector<16x1xf32> -> vector<16x1xf32>
    %46 = arith.truncf %42 : vector<16x16xf32> to vector<16x16xbf16>
    %cst_15 = arith.constant dense<0.000000e+00> : vector<16x8xf32>
    %47 = tpu.matmul %46, %33, %cst_15 {dimension_numbers = #tpu.dot_dimension_numbers<[1], [0], [0], [1], [0, 0, 1, 1], [], []>} : vector<16x16xbf16>, vector<16x8xbf16>, vector<16x8xf32> -> vector<16x8xf32>
    %48 = vector.broadcast %45 : vector<16x1xf32> to vector<16x8xf32>
    %49 = arith.mulf %47, %48 : vector<16x8xf32>
    %50 = arith.truncf %49 : vector<16x8xf32> to vector<16x8xbf16>
    %c0_16 = arith.constant 0 : index
    %c0_17 = arith.constant 0 : index
    %c8 = arith.constant 8 : index
    %51 = vector.load %arg2[%c0_16, %c0_17, %c8] : memref<1x16x32xbf16, #tpu.memory_space<vmem>>, vector<1x16x8xbf16>
    %52 = vector.shape_cast %51 : vector<1x16x8xbf16> to vector<16x8xbf16>
    %53 = vector.shape_cast %50 : vector<16x8xbf16> to vector<1x16x8xbf16>
    tpu.vector_store %arg2[%c0_16, %c0_17, %c8], %53 {strides = array<i32>} : memref<1x16x32xbf16, #tpu.memory_space<vmem>>, vector<1x16x8xbf16>,
    %54 = vector.extract_strided_slice %1 {offsets = [0, 16], sizes = [16, 8], strides = [1, 1]} : vector<16x96xbf16> to vector<16x8xbf16>
    %55 = vector.extract_strided_slice %1 {offsets = [0, 48], sizes = [16, 8], strides = [1, 1]} : vector<16x96xbf16> to vector<16x8xbf16>
    %56 = vector.extract_strided_slice %1 {offsets = [0, 80], sizes = [16, 8], strides = [1, 1]} : vector<16x96xbf16> to vector<16x8xbf16>
    %cst_18 = arith.constant 3.535160e-01 : bf16
    %57 = vector.broadcast %cst_18 : bf16 to vector<16x8xbf16>
    %58 = arith.mulf %54, %57 : vector<16x8xbf16>
    %cst_19 = arith.constant dense<0.000000e+00> : vector<16x16xf32>
    %59 = tpu.matmul %58, %55, %cst_19 {dimension_numbers = #tpu.dot_dimension_numbers<[1], [1], [0], [0], [0, 0, 1, 0], [], []>} : vector<16x8xbf16>, vector<16x8xbf16>, vector<16x16xf32> -> vector<16x16xf32>
    %60 = arith.addf %59, %7 : vector<16x16xf32>
    %cst_20 = arith.constant dense<0xFF800000> : vector<16xf32>
    %61 = vector.multi_reduction <maximumf>, %60, %cst_20 [1] : vector<16x16xf32> to vector<16xf32>
    %62 = vector.shape_cast %61 : vector<16xf32> to vector<16x1xf32>
    %63 = vector.broadcast %62 : vector<16x1xf32> to vector<16x16xf32>
    %64 = arith.subf %60, %63 : vector<16x16xf32>
    %65 = math.exp %64 : vector<16x16xf32>
    %cst_21 = arith.constant dense<0.000000e+00> : vector<16xf32>
    %66 = vector.multi_reduction <add>, %65, %cst_21 [1] : vector<16x16xf32> to vector<16xf32>
    %67 = vector.shape_cast %66 : vector<16xf32> to vector<16x1xf32>
    %68 = tpu.reciprocal %67 {approx = true} : vector<16x1xf32> -> vector<16x1xf32>
    %69 = arith.truncf %65 : vector<16x16xf32> to vector<16x16xbf16>
    %cst_22 = arith.constant dense<0.000000e+00> : vector<16x8xf32>
    %70 = tpu.matmul %69, %56, %cst_22 {dimension_numbers = #tpu.dot_dimension_numbers<[1], [0], [0], [1], [0, 0, 1, 1], [], []>} : vector<16x16xbf16>, vector<16x8xbf16>, vector<16x8xf32> -> vector<16x8xf32>
    %71 = vector.broadcast %68 : vector<16x1xf32> to vector<16x8xf32>
    %72 = arith.mulf %70, %71 : vector<16x8xf32>
    %73 = arith.truncf %72 : vector<16x8xf32> to vector<16x8xbf16>
    %c0_23 = arith.constant 0 : index
    %c0_24 = arith.constant 0 : index
    %c16 = arith.constant 16 : index
    %74 = vector.load %arg2[%c0_23, %c0_24, %c16] : memref<1x16x32xbf16, #tpu.memory_space<vmem>>, vector<1x16x8xbf16>
    %75 = vector.shape_cast %74 : vector<1x16x8xbf16> to vector<16x8xbf16>
    %76 = vector.shape_cast %73 : vector<16x8xbf16> to vector<1x16x8xbf16>
    tpu.vector_store %arg2[%c0_23, %c0_24, %c16], %76 {strides = array<i32>} : memref<1x16x32xbf16, #tpu.memory_space<vmem>>, vector<1x16x8xbf16>,
    %77 = vector.extract_strided_slice %1 {offsets = [0, 24], sizes = [16, 8], strides = [1, 1]} : vector<16x96xbf16> to vector<16x8xbf16>
    %78 = vector.extract_strided_slice %1 {offsets = [0, 56], sizes = [16, 8], strides = [1, 1]} : vector<16x96xbf16> to vector<16x8xbf16>
    %79 = vector.extract_strided_slice %1 {offsets = [0, 88], sizes = [16, 8], strides = [1, 1]} : vector<16x96xbf16> to vector<16x8xbf16>
    %cst_25 = arith.constant 3.535160e-01 : bf16
    %80 = vector.broadcast %cst_25 : bf16 to vector<16x8xbf16>
    %81 = arith.mulf %77, %80 : vector<16x8xbf16>
    %cst_26 = arith.constant dense<0.000000e+00> : vector<16x16xf32>
    %82 = tpu.matmul %81, %78, %cst_26 {dimension_numbers = #tpu.dot_dimension_numbers<[1], [1], [0], [0], [0, 0, 1, 0], [], []>} : vector<16x8xbf16>, vector<16x8xbf16>, vector<16x16xf32> -> vector<16x16xf32>
    %83 = arith.addf %82, %7 : vector<16x16xf32>
    %cst_27 = arith.constant dense<0xFF800000> : vector<16xf32>
    %84 = vector.multi_reduction <maximumf>, %83, %cst_27 [1] : vector<16x16xf32> to vector<16xf32>
    %85 = vector.shape_cast %84 : vector<16xf32> to vector<16x1xf32>
    %86 = vector.broadcast %85 : vector<16x1xf32> to vector<16x16xf32>
    %87 = arith.subf %83, %86 : vector<16x16xf32>
    %88 = math.exp %87 : vector<16x16xf32>
    %cst_28 = arith.constant dense<0.000000e+00> : vector<16xf32>
    %89 = vector.multi_reduction <add>, %88, %cst_28 [1] : vector<16x16xf32> to vector<16xf32>
    %90 = vector.shape_cast %89 : vector<16xf32> to vector<16x1xf32>
    %91 = tpu.reciprocal %90 {approx = true} : vector<16x1xf32> -> vector<16x1xf32>
    %92 = arith.truncf %88 : vector<16x16xf32> to vector<16x16xbf16>
    %cst_29 = arith.constant dense<0.000000e+00> : vector<16x8xf32>
    %93 = tpu.matmul %92, %79, %cst_29 {dimension_numbers = #tpu.dot_dimension_numbers<[1], [0], [0], [1], [0, 0, 1, 1], [], []>} : vector<16x16xbf16>, vector<16x8xbf16>, vector<16x8xf32> -> vector<16x8xf32>
    %94 = vector.broadcast %91 : vector<16x1xf32> to vector<16x8xf32>
    %95 = arith.mulf %93, %94 : vector<16x8xf32>
    %96 = arith.truncf %95 : vector<16x8xf32> to vector<16x8xbf16>
    %c0_30 = arith.constant 0 : index
    %c0_31 = arith.constant 0 : index
    %c24 = arith.constant 24 : index
    %97 = vector.load %arg2[%c0_30, %c0_31, %c24] : memref<1x16x32xbf16, #tpu.memory_space<vmem>>, vector<1x16x8xbf16>
    %98 = vector.shape_cast %97 : vector<1x16x8xbf16> to vector<16x8xbf16>
    %99 = vector.shape_cast %96 : vector<16x8xbf16> to vector<1x16x8xbf16>
    tpu.vector_store %arg2[%c0_30, %c0_31, %c24], %99 {strides = array<i32>} : memref<1x16x32xbf16, #tpu.memory_space<vmem>>, vector<1x16x8xbf16>,
    return
  }
  func.func @transform_0(%arg0: i32) -> (i32, i32, i32) {
    %c0_i32 = arith.constant 0 : i32
    %c0_i32_0 = arith.constant 0 : i32
    %c0_i32_1 = arith.constant 0 : i32
    return %arg0, %c0_i32, %c0_i32_0 : i32, i32, i32
  }
  func.func @transform_1(%arg0: i32) -> (i32, i32, i32) {
    %c0_i32 = arith.constant 0 : i32
    %c0_i32_0 = arith.constant 0 : i32
    %c0_i32_1 = arith.constant 0 : i32
    return %arg0, %c0_i32, %c0_i32_0 : i32, i32, i32
  }
}

module attributes {stable_mosaic.version = 11 : i64} {
  func.func @_fused_linear_kernel(%arg0: i32, %arg1: memref<64x32xbf16, #tpu.memory_space<vmem>>, %arg2: memref<1x32xf32, #tpu.memory_space<vmem>>, %arg3: memref<1x32xf32, #tpu.memory_space<vmem>>, %arg4: memref<32x96xbf16, #tpu.memory_space<vmem>>, %arg5: memref<1x96xf32, #tpu.memory_space<vmem>>, %arg6: memref<64x96xbf16, #tpu.memory_space<vmem>>) attributes {dimension_semantics = [#tpu.dimension_semantics<parallel>], iteration_bounds = array<i64: 1>, scalar_prefetch = 0 : i64, scratch_operands = 0 : i64, tpu.core_type = #tpu.core_type<tc>, window_params = [{transform_indices = @transform_0, window_bounds = array<i64: 64, 32>}, {pipeline_mode = #tpu.pipeline_mode<synchronous>, transform_indices = @transform_1, window_bounds = array<i64: 1, 32>}, {pipeline_mode = #tpu.pipeline_mode<synchronous>, transform_indices = @transform_2, window_bounds = array<i64: 1, 32>}, {pipeline_mode = #tpu.pipeline_mode<synchronous>, transform_indices = @transform_3, window_bounds = array<i64: 32, 96>}, {pipeline_mode = #tpu.pipeline_mode<synchronous>, transform_indices = @transform_4, window_bounds = array<i64: 1, 96>}, {transform_indices = @transform_5, window_bounds = array<i64: 64, 96>}]} {
    %c0 = arith.constant 0 : index
    %c0_0 = arith.constant 0 : index
    %0 = vector.load %arg1[%c0, %c0_0] : memref<64x32xbf16, #tpu.memory_space<vmem>>, vector<64x32xbf16>
    %1 = arith.extf %0 : vector<64x32xbf16> to vector<64x32xf32>
    %cst = arith.constant dense<0.000000e+00> : vector<64xf32>
    %2 = vector.multi_reduction <add>, %1, %cst [1] : vector<64x32xf32> to vector<64xf32>
    %3 = vector.shape_cast %2 : vector<64xf32> to vector<64x1xf32>
    %cst_1 = arith.constant 3.200000e+01 : f32
    %4 = vector.broadcast %cst_1 : f32 to vector<64x1xf32>
    %5 = arith.divf %3, %4 : vector<64x1xf32>
    %6 = vector.broadcast %5 : vector<64x1xf32> to vector<64x32xf32>
    %7 = arith.subf %1, %6 : vector<64x32xf32>
    %8 = arith.mulf %7, %7 : vector<64x32xf32>
    %cst_2 = arith.constant dense<0.000000e+00> : vector<64xf32>
    %9 = vector.multi_reduction <add>, %8, %cst_2 [1] : vector<64x32xf32> to vector<64xf32>
    %10 = vector.shape_cast %9 : vector<64xf32> to vector<64x1xf32>
    %cst_3 = arith.constant 3.200000e+01 : f32
    %11 = vector.broadcast %cst_3 : f32 to vector<64x1xf32>
    %12 = arith.divf %10, %11 : vector<64x1xf32>
    %cst_4 = arith.constant 9.99999974E-6 : f32
    %13 = vector.broadcast %cst_4 : f32 to vector<64x1xf32>
    %14 = arith.addf %12, %13 : vector<64x1xf32>
    %15 = math.rsqrt %14 : vector<64x1xf32>
    %16 = vector.broadcast %15 : vector<64x1xf32> to vector<64x32xf32>
    %17 = arith.mulf %7, %16 : vector<64x32xf32>
    %c0_5 = arith.constant 0 : index
    %c0_6 = arith.constant 0 : index
    %18 = vector.load %arg2[%c0_5, %c0_6] : memref<1x32xf32, #tpu.memory_space<vmem>>, vector<1x32xf32>
    %19 = vector.broadcast %18 : vector<1x32xf32> to vector<64x32xf32>
    %20 = arith.mulf %17, %19 : vector<64x32xf32>
    %c0_7 = arith.constant 0 : index
    %c0_8 = arith.constant 0 : index
    %21 = vector.load %arg3[%c0_7, %c0_8] : memref<1x32xf32, #tpu.memory_space<vmem>>, vector<1x32xf32>
    %22 = vector.broadcast %21 : vector<1x32xf32> to vector<64x32xf32>
    %23 = arith.addf %20, %22 : vector<64x32xf32>
    %24 = arith.truncf %23 : vector<64x32xf32> to vector<64x32xbf16>
    %c0_9 = arith.constant 0 : index
    %c0_10 = arith.constant 0 : index
    %25 = vector.load %arg4[%c0_9, %c0_10] : memref<32x96xbf16, #tpu.memory_space<vmem>>, vector<32x96xbf16>
    %cst_11 = arith.constant dense<0.000000e+00> : vector<64x96xf32>
    %26 = tpu.matmul %24, %25, %cst_11 {dimension_numbers = #tpu.dot_dimension_numbers<[1], [0], [0], [1], [0, 0, 1, 1], [], []>} : vector<64x32xbf16>, vector<32x96xbf16>, vector<64x96xf32> -> vector<64x96xf32>
    %c0_12 = arith.constant 0 : index
    %c0_13 = arith.constant 0 : index
    %27 = vector.load %arg5[%c0_12, %c0_13] : memref<1x96xf32, #tpu.memory_space<vmem>>, vector<1x96xf32>
    %28 = vector.broadcast %27 : vector<1x96xf32> to vector<64x96xf32>
    %29 = arith.addf %26, %28 : vector<64x96xf32>
    %30 = arith.truncf %29 : vector<64x96xf32> to vector<64x96xbf16>
    %c0_14 = arith.constant 0 : index
    %c0_15 = arith.constant 0 : index
    %31 = vector.load %arg6[%c0_14, %c0_15] : memref<64x96xbf16, #tpu.memory_space<vmem>>, vector<64x96xbf16>
    tpu.vector_store %arg6[%c0_14, %c0_15], %30 {strides = array<i32>} : memref<64x96xbf16, #tpu.memory_space<vmem>>, vector<64x96xbf16>,
    return
  }
  func.func @transform_0(%arg0: i32) -> (i32, i32) {
    %c0_i32 = arith.constant 0 : i32
    %c0_i32_0 = arith.constant 0 : i32
    return %arg0, %c0_i32 : i32, i32
  }
  func.func @transform_1(%arg0: i32) -> (i32, i32) {
    %c0_i32 = arith.constant 0 : i32
    %c0_i32_0 = arith.constant 0 : i32
    %c0_i32_1 = arith.constant 0 : i32
    return %c0_i32, %c0_i32_0 : i32, i32
  }
  func.func @transform_2(%arg0: i32) -> (i32, i32) {
    %c0_i32 = arith.constant 0 : i32
    %c0_i32_0 = arith.constant 0 : i32
    %c0_i32_1 = arith.constant 0 : i32
    return %c0_i32, %c0_i32_0 : i32, i32
  }
  func.func @transform_3(%arg0: i32) -> (i32, i32) {
    %c0_i32 = arith.constant 0 : i32
    %c0_i32_0 = arith.constant 0 : i32
    %c0_i32_1 = arith.constant 0 : i32
    return %c0_i32, %c0_i32_0 : i32, i32
  }
  func.func @transform_4(%arg0: i32) -> (i32, i32) {
    %c0_i32 = arith.constant 0 : i32
    %c0_i32_0 = arith.constant 0 : i32
    %c0_i32_1 = arith.constant 0 : i32
    return %c0_i32, %c0_i32_0 : i32, i32
  }
  func.func @transform_5(%arg0: i32) -> (i32, i32) {
    %c0_i32 = arith.constant 0 : i32
    %c0_i32_0 = arith.constant 0 : i32
    return %arg0, %c0_i32 : i32, i32
  }
}

module attributes {stable_mosaic.version = 11 : i64} {
  func.func @_fused_linear_kernel(%arg0: i32, %arg1: memref<64x32xbf16, #tpu.memory_space<vmem>>, %arg2: memref<32x32xbf16, #tpu.memory_space<vmem>>, %arg3: memref<1x32xf32, #tpu.memory_space<vmem>>, %arg4: memref<64x32xbf16, #tpu.memory_space<vmem>>, %arg5: memref<64x32xbf16, #tpu.memory_space<vmem>>) attributes {dimension_semantics = [#tpu.dimension_semantics<parallel>], iteration_bounds = array<i64: 1>, scalar_prefetch = 0 : i64, scratch_operands = 0 : i64, tpu.core_type = #tpu.core_type<tc>, window_params = [{transform_indices = @transform_0, window_bounds = array<i64: 64, 32>}, {pipeline_mode = #tpu.pipeline_mode<synchronous>, transform_indices = @transform_1, window_bounds = array<i64: 32, 32>}, {pipeline_mode = #tpu.pipeline_mode<synchronous>, transform_indices = @transform_2, window_bounds = array<i64: 1, 32>}, {transform_indices = @transform_3, window_bounds = array<i64: 64, 32>}, {transform_indices = @transform_4, window_bounds = array<i64: 64, 32>}]} {
    %c0 = arith.constant 0 : index
    %c0_0 = arith.constant 0 : index
    %0 = vector.load %arg1[%c0, %c0_0] : memref<64x32xbf16, #tpu.memory_space<vmem>>, vector<64x32xbf16>
    %c0_1 = arith.constant 0 : index
    %c0_2 = arith.constant 0 : index
    %1 = vector.load %arg2[%c0_1, %c0_2] : memref<32x32xbf16, #tpu.memory_space<vmem>>, vector<32x32xbf16>
    %cst = arith.constant dense<0.000000e+00> : vector<64x32xf32>
    %2 = tpu.matmul %0, %1, %cst {dimension_numbers = #tpu.dot_dimension_numbers<[1], [0], [0], [1], [0, 0, 1, 1], [], []>} : vector<64x32xbf16>, vector<32x32xbf16>, vector<64x32xf32> -> vector<64x32xf32>
    %c0_3 = arith.constant 0 : index
    %c0_4 = arith.constant 0 : index
    %3 = vector.load %arg3[%c0_3, %c0_4] : memref<1x32xf32, #tpu.memory_space<vmem>>, vector<1x32xf32>
    %4 = vector.broadcast %3 : vector<1x32xf32> to vector<64x32xf32>
    %5 = arith.addf %2, %4 : vector<64x32xf32>
    %c0_5 = arith.constant 0 : index
    %c0_6 = arith.constant 0 : index
    %6 = vector.load %arg4[%c0_5, %c0_6] : memref<64x32xbf16, #tpu.memory_space<vmem>>, vector<64x32xbf16>
    %7 = arith.extf %6 : vector<64x32xbf16> to vector<64x32xf32>
    %8 = arith.addf %5, %7 : vector<64x32xf32>
    %9 = arith.truncf %8 : vector<64x32xf32> to vector<64x32xbf16>
    %c0_7 = arith.constant 0 : index
    %c0_8 = arith.constant 0 : index
    %10 = vector.load %arg5[%c0_7, %c0_8] : memref<64x32xbf16, #tpu.memory_space<vmem>>, vector<64x32xbf16>
    tpu.vector_store %arg5[%c0_7, %c0_8], %9 {strides = array<i32>} : memref<64x32xbf16, #tpu.memory_space<vmem>>, vector<64x32xbf16>,
    return
  }
  func.func @transform_0(%arg0: i32) -> (i32, i32) {
    %c0_i32 = arith.constant 0 : i32
    %c0_i32_0 = arith.constant 0 : i32
    return %arg0, %c0_i32 : i32, i32
  }
  func.func @transform_1(%arg0: i32) -> (i32, i32) {
    %c0_i32 = arith.constant 0 : i32
    %c0_i32_0 = arith.constant 0 : i32
    %c0_i32_1 = arith.constant 0 : i32
    return %c0_i32, %c0_i32_0 : i32, i32
  }
  func.func @transform_2(%arg0: i32) -> (i32, i32) {
    %c0_i32 = arith.constant 0 : i32
    %c0_i32_0 = arith.constant 0 : i32
    %c0_i32_1 = arith.constant 0 : i32
    return %c0_i32, %c0_i32_0 : i32, i32
  }
  func.func @transform_3(%arg0: i32) -> (i32, i32) {
    %c0_i32 = arith.constant 0 : i32
    %c0_i32_0 = arith.constant 0 : i32
    return %arg0, %c0_i32 : i32, i32
  }
  func.func @transform_4(%arg0: i32) -> (i32, i32) {
    %c0_i32 = arith.constant 0 : i32
    %c0_i32_0 = arith.constant 0 : i32
    return %arg0, %c0_i32 : i32, i32
  }
}

module attributes {stable_mosaic.version = 11 : i64} {
  func.func @_fused_linear_kernel(%arg0: i32, %arg1: memref<64x32xbf16, #tpu.memory_space<vmem>>, %arg2: memref<1x32xf32, #tpu.memory_space<vmem>>, %arg3: memref<1x32xf32, #tpu.memory_space<vmem>>, %arg4: memref<32x128xbf16, #tpu.memory_space<vmem>>, %arg5: memref<1x128xf32, #tpu.memory_space<vmem>>, %arg6: memref<64x128xbf16, #tpu.memory_space<vmem>>) attributes {dimension_semantics = [#tpu.dimension_semantics<parallel>], iteration_bounds = array<i64: 1>, scalar_prefetch = 0 : i64, scratch_operands = 0 : i64, tpu.core_type = #tpu.core_type<tc>, window_params = [{transform_indices = @transform_0, window_bounds = array<i64: 64, 32>}, {pipeline_mode = #tpu.pipeline_mode<synchronous>, transform_indices = @transform_1, window_bounds = array<i64: 1, 32>}, {pipeline_mode = #tpu.pipeline_mode<synchronous>, transform_indices = @transform_2, window_bounds = array<i64: 1, 32>}, {pipeline_mode = #tpu.pipeline_mode<synchronous>, transform_indices = @transform_3, window_bounds = array<i64: 32, 128>}, {pipeline_mode = #tpu.pipeline_mode<synchronous>, transform_indices = @transform_4, window_bounds = array<i64: 1, 128>}, {transform_indices = @transform_5, window_bounds = array<i64: 64, 128>}]} {
    %c0 = arith.constant 0 : index
    %c0_0 = arith.constant 0 : index
    %0 = vector.load %arg1[%c0, %c0_0] : memref<64x32xbf16, #tpu.memory_space<vmem>>, vector<64x32xbf16>
    %1 = arith.extf %0 : vector<64x32xbf16> to vector<64x32xf32>
    %cst = arith.constant dense<0.000000e+00> : vector<64xf32>
    %2 = vector.multi_reduction <add>, %1, %cst [1] : vector<64x32xf32> to vector<64xf32>
    %3 = vector.shape_cast %2 : vector<64xf32> to vector<64x1xf32>
    %cst_1 = arith.constant 3.200000e+01 : f32
    %4 = vector.broadcast %cst_1 : f32 to vector<64x1xf32>
    %5 = arith.divf %3, %4 : vector<64x1xf32>
    %6 = vector.broadcast %5 : vector<64x1xf32> to vector<64x32xf32>
    %7 = arith.subf %1, %6 : vector<64x32xf32>
    %8 = arith.mulf %7, %7 : vector<64x32xf32>
    %cst_2 = arith.constant dense<0.000000e+00> : vector<64xf32>
    %9 = vector.multi_reduction <add>, %8, %cst_2 [1] : vector<64x32xf32> to vector<64xf32>
    %10 = vector.shape_cast %9 : vector<64xf32> to vector<64x1xf32>
    %cst_3 = arith.constant 3.200000e+01 : f32
    %11 = vector.broadcast %cst_3 : f32 to vector<64x1xf32>
    %12 = arith.divf %10, %11 : vector<64x1xf32>
    %cst_4 = arith.constant 9.99999974E-6 : f32
    %13 = vector.broadcast %cst_4 : f32 to vector<64x1xf32>
    %14 = arith.addf %12, %13 : vector<64x1xf32>
    %15 = math.rsqrt %14 : vector<64x1xf32>
    %16 = vector.broadcast %15 : vector<64x1xf32> to vector<64x32xf32>
    %17 = arith.mulf %7, %16 : vector<64x32xf32>
    %c0_5 = arith.constant 0 : index
    %c0_6 = arith.constant 0 : index
    %18 = vector.load %arg2[%c0_5, %c0_6] : memref<1x32xf32, #tpu.memory_space<vmem>>, vector<1x32xf32>
    %19 = vector.broadcast %18 : vector<1x32xf32> to vector<64x32xf32>
    %20 = arith.mulf %17, %19 : vector<64x32xf32>
    %c0_7 = arith.constant 0 : index
    %c0_8 = arith.constant 0 : index
    %21 = vector.load %arg3[%c0_7, %c0_8] : memref<1x32xf32, #tpu.memory_space<vmem>>, vector<1x32xf32>
    %22 = vector.broadcast %21 : vector<1x32xf32> to vector<64x32xf32>
    %23 = arith.addf %20, %22 : vector<64x32xf32>
    %24 = arith.truncf %23 : vector<64x32xf32> to vector<64x32xbf16>
    %c0_9 = arith.constant 0 : index
    %c0_10 = arith.constant 0 : index
    %25 = vector.load %arg4[%c0_9, %c0_10] : memref<32x128xbf16, #tpu.memory_space<vmem>>, vector<32x128xbf16>
    %cst_11 = arith.constant dense<0.000000e+00> : vector<64x128xf32>
    %26 = tpu.matmul %24, %25, %cst_11 {dimension_numbers = #tpu.dot_dimension_numbers<[1], [0], [0], [1], [0, 0, 1, 1], [], []>} : vector<64x32xbf16>, vector<32x128xbf16>, vector<64x128xf32> -> vector<64x128xf32>
    %c0_12 = arith.constant 0 : index
    %c0_13 = arith.constant 0 : index
    %27 = vector.load %arg5[%c0_12, %c0_13] : memref<1x128xf32, #tpu.memory_space<vmem>>, vector<1x128xf32>
    %28 = vector.broadcast %27 : vector<1x128xf32> to vector<64x128xf32>
    %29 = arith.addf %26, %28 : vector<64x128xf32>
    %cst_14 = arith.constant 1.702000e+00 : f32
    %30 = vector.broadcast %cst_14 : f32 to vector<64x128xf32>
    %31 = arith.mulf %30, %29 : vector<64x128xf32>
    %32 = arith.negf %31 : vector<64x128xf32>
    %33 = math.exp %32 : vector<64x128xf32>
    %cst_15 = arith.constant 1.000000e+00 : f32
    %34 = vector.broadcast %cst_15 : f32 to vector<64x128xf32>
    %35 = arith.addf %34, %33 : vector<64x128xf32>
    %36 = arith.divf %34, %35 : vector<64x128xf32>
    %37 = arith.mulf %29, %36 : vector<64x128xf32>
    %38 = arith.truncf %37 : vector<64x128xf32> to vector<64x128xbf16>
    %c0_16 = arith.constant 0 : index
    %c0_17 = arith.constant 0 : index
    %39 = vector.load %arg6[%c0_16, %c0_17] : memref<64x128xbf16, #tpu.memory_space<vmem>>, vector<64x128xbf16>
    tpu.vector_store %arg6[%c0_16, %c0_17], %38 {strides = array<i32>} : memref<64x128xbf16, #tpu.memory_space<vmem>>, vector<64x128xbf16>,
    return
  }
  func.func @transform_0(%arg0: i32) -> (i32, i32) {
    %c0_i32 = arith.constant 0 : i32
    %c0_i32_0 = arith.constant 0 : i32
    return %arg0, %c0_i32 : i32, i32
  }
  func.func @transform_1(%arg0: i32) -> (i32, i32) {
    %c0_i32 = arith.constant 0 : i32
    %c0_i32_0 = arith.constant 0 : i32
    %c0_i32_1 = arith.constant 0 : i32
    return %c0_i32, %c0_i32_0 : i32, i32
  }
  func.func @transform_2(%arg0: i32) -> (i32, i32) {
    %c0_i32 = arith.constant 0 : i32
    %c0_i32_0 = arith.constant 0 : i32
    %c0_i32_1 = arith.constant 0 : i32
    return %c0_i32, %c0_i32_0 : i32, i32
  }
  func.func @transform_3(%arg0: i32) -> (i32, i32) {
    %c0_i32 = arith.constant 0 : i32
    %c0_i32_0 = arith.constant 0 : i32
    %c0_i32_1 = arith.constant 0 : i32
    return %c0_i32, %c0_i32_0 : i32, i32
  }
  func.func @transform_4(%arg0: i32) -> (i32, i32) {
    %c0_i32 = arith.constant 0 : i32
    %c0_i32_0 = arith.constant 0 : i32
    %c0_i32_1 = arith.constant 0 : i32
    return %c0_i32, %c0_i32_0 : i32, i32
  }
  func.func @transform_5(%arg0: i32) -> (i32, i32) {
    %c0_i32 = arith.constant 0 : i32
    %c0_i32_0 = arith.constant 0 : i32
    return %arg0, %c0_i32 : i32, i32
  }
}

module attributes {stable_mosaic.version = 11 : i64} {
  func.func @_fused_linear_kernel(%arg0: i32, %arg1: memref<64x128xbf16, #tpu.memory_space<vmem>>, %arg2: memref<128x32xbf16, #tpu.memory_space<vmem>>, %arg3: memref<1x32xf32, #tpu.memory_space<vmem>>, %arg4: memref<64x32xbf16, #tpu.memory_space<vmem>>, %arg5: memref<64x32xbf16, #tpu.memory_space<vmem>>) attributes {dimension_semantics = [#tpu.dimension_semantics<parallel>], iteration_bounds = array<i64: 1>, scalar_prefetch = 0 : i64, scratch_operands = 0 : i64, tpu.core_type = #tpu.core_type<tc>, window_params = [{transform_indices = @transform_0, window_bounds = array<i64: 64, 128>}, {pipeline_mode = #tpu.pipeline_mode<synchronous>, transform_indices = @transform_1, window_bounds = array<i64: 128, 32>}, {pipeline_mode = #tpu.pipeline_mode<synchronous>, transform_indices = @transform_2, window_bounds = array<i64: 1, 32>}, {transform_indices = @transform_3, window_bounds = array<i64: 64, 32>}, {transform_indices = @transform_4, window_bounds = array<i64: 64, 32>}]} {
    %c0 = arith.constant 0 : index
    %c0_0 = arith.constant 0 : index
    %0 = vector.load %arg1[%c0, %c0_0] : memref<64x128xbf16, #tpu.memory_space<vmem>>, vector<64x128xbf16>
    %c0_1 = arith.constant 0 : index
    %c0_2 = arith.constant 0 : index
    %1 = vector.load %arg2[%c0_1, %c0_2] : memref<128x32xbf16, #tpu.memory_space<vmem>>, vector<128x32xbf16>
    %cst = arith.constant dense<0.000000e+00> : vector<64x32xf32>
    %2 = tpu.matmul %0, %1, %cst {dimension_numbers = #tpu.dot_dimension_numbers<[1], [0], [0], [1], [0, 0, 1, 1], [], []>} : vector<64x128xbf16>, vector<128x32xbf16>, vector<64x32xf32> -> vector<64x32xf32>
    %c0_3 = arith.constant 0 : index
    %c0_4 = arith.constant 0 : index
    %3 = vector.load %arg3[%c0_3, %c0_4] : memref<1x32xf32, #tpu.memory_space<vmem>>, vector<1x32xf32>
    %4 = vector.broadcast %3 : vector<1x32xf32> to vector<64x32xf32>
    %5 = arith.addf %2, %4 : vector<64x32xf32>
    %c0_5 = arith.constant 0 : index
    %c0_6 = arith.constant 0 : index
    %6 = vector.load %arg4[%c0_5, %c0_6] : memref<64x32xbf16, #tpu.memory_space<vmem>>, vector<64x32xbf16>
    %7 = arith.extf %6 : vector<64x32xbf16> to vector<64x32xf32>
    %8 = arith.addf %5, %7 : vector<64x32xf32>
    %9 = arith.truncf %8 : vector<64x32xf32> to vector<64x32xbf16>
    %c0_7 = arith.constant 0 : index
    %c0_8 = arith.constant 0 : index
    %10 = vector.load %arg5[%c0_7, %c0_8] : memref<64x32xbf16, #tpu.memory_space<vmem>>, vector<64x32xbf16>
    tpu.vector_store %arg5[%c0_7, %c0_8], %9 {strides = array<i32>} : memref<64x32xbf16, #tpu.memory_space<vmem>>, vector<64x32xbf16>,
    return
  }
  func.func @transform_0(%arg0: i32) -> (i32, i32) {
    %c0_i32 = arith.constant 0 : i32
    %c0_i32_0 = arith.constant 0 : i32
    return %arg0, %c0_i32 : i32, i32
  }
  func.func @transform_1(%arg0: i32) -> (i32, i32) {
    %c0_i32 = arith.constant 0 : i32
    %c0_i32_0 = arith.constant 0 : i32
    %c0_i32_1 = arith.constant 0 : i32
    return %c0_i32, %c0_i32_0 : i32, i32
  }
  func.func @transform_2(%arg0: i32) -> (i32, i32) {
    %c0_i32 = arith.constant 0 : i32
    %c0_i32_0 = arith.constant 0 : i32
    %c0_i32_1 = arith.constant 0 : i32
    return %c0_i32, %c0_i32_0 : i32, i32
  }
  func.func @transform_3(%arg0: i32) -> (i32, i32) {
    %c0_i32 = arith.constant 0 : i32
    %c0_i32_0 = arith.constant 0 : i32
    return %arg0, %c0_i32 : i32, i32
  }
  func.func @transform_4(%arg0: i32) -> (i32, i32) {
    %c0_i32 = arith.constant 0 : i32
    %c0_i32_0 = arith.constant 0 : i32
    return %arg0, %c0_i32 : i32, i32
  }
}

module attributes {stable_mosaic.version = 11 : i64} {
  func.func @_fused_linear_kernel(%arg0: i32, %arg1: memref<4x32xbf16, #tpu.memory_space<vmem>>, %arg2: memref<1x32xf32, #tpu.memory_space<vmem>>, %arg3: memref<1x32xf32, #tpu.memory_space<vmem>>, %arg4: memref<32x32xbf16, #tpu.memory_space<vmem>>, %arg5: memref<1x32xf32, #tpu.memory_space<vmem>>, %arg6: memref<4x32xbf16, #tpu.memory_space<vmem>>) attributes {dimension_semantics = [#tpu.dimension_semantics<parallel>], iteration_bounds = array<i64: 1>, scalar_prefetch = 0 : i64, scratch_operands = 0 : i64, tpu.core_type = #tpu.core_type<tc>, window_params = [{transform_indices = @transform_0, window_bounds = array<i64: 4, 32>}, {pipeline_mode = #tpu.pipeline_mode<synchronous>, transform_indices = @transform_1, window_bounds = array<i64: 1, 32>}, {pipeline_mode = #tpu.pipeline_mode<synchronous>, transform_indices = @transform_2, window_bounds = array<i64: 1, 32>}, {pipeline_mode = #tpu.pipeline_mode<synchronous>, transform_indices = @transform_3, window_bounds = array<i64: 32, 32>}, {pipeline_mode = #tpu.pipeline_mode<synchronous>, transform_indices = @transform_4, window_bounds = array<i64: 1, 32>}, {transform_indices = @transform_5, window_bounds = array<i64: 4, 32>}]} {
    %c0 = arith.constant 0 : index
    %c0_0 = arith.constant 0 : index
    %0 = vector.load %arg1[%c0, %c0_0] : memref<4x32xbf16, #tpu.memory_space<vmem>>, vector<4x32xbf16>
    %1 = arith.extf %0 : vector<4x32xbf16> to vector<4x32xf32>
    %cst = arith.constant dense<0.000000e+00> : vector<4xf32>
    %2 = vector.multi_reduction <add>, %1, %cst [1] : vector<4x32xf32> to vector<4xf32>
    %3 = vector.shape_cast %2 : vector<4xf32> to vector<4x1xf32>
    %cst_1 = arith.constant 3.200000e+01 : f32
    %4 = vector.broadcast %cst_1 : f32 to vector<4x1xf32>
    %5 = arith.divf %3, %4 : vector<4x1xf32>
    %6 = vector.broadcast %5 : vector<4x1xf32> to vector<4x32xf32>
    %7 = arith.subf %1, %6 : vector<4x32xf32>
    %8 = arith.mulf %7, %7 : vector<4x32xf32>
    %cst_2 = arith.constant dense<0.000000e+00> : vector<4xf32>
    %9 = vector.multi_reduction <add>, %8, %cst_2 [1] : vector<4x32xf32> to vector<4xf32>
    %10 = vector.shape_cast %9 : vector<4xf32> to vector<4x1xf32>
    %cst_3 = arith.constant 3.200000e+01 : f32
    %11 = vector.broadcast %cst_3 : f32 to vector<4x1xf32>
    %12 = arith.divf %10, %11 : vector<4x1xf32>
    %cst_4 = arith.constant 9.99999974E-6 : f32
    %13 = vector.broadcast %cst_4 : f32 to vector<4x1xf32>
    %14 = arith.addf %12, %13 : vector<4x1xf32>
    %15 = math.rsqrt %14 : vector<4x1xf32>
    %16 = vector.broadcast %15 : vector<4x1xf32> to vector<4x32xf32>
    %17 = arith.mulf %7, %16 : vector<4x32xf32>
    %c0_5 = arith.constant 0 : index
    %c0_6 = arith.constant 0 : index
    %18 = vector.load %arg2[%c0_5, %c0_6] : memref<1x32xf32, #tpu.memory_space<vmem>>, vector<1x32xf32>
    %19 = vector.broadcast %18 : vector<1x32xf32> to vector<4x32xf32>
    %20 = arith.mulf %17, %19 : vector<4x32xf32>
    %c0_7 = arith.constant 0 : index
    %c0_8 = arith.constant 0 : index
    %21 = vector.load %arg3[%c0_7, %c0_8] : memref<1x32xf32, #tpu.memory_space<vmem>>, vector<1x32xf32>
    %22 = vector.broadcast %21 : vector<1x32xf32> to vector<4x32xf32>
    %23 = arith.addf %20, %22 : vector<4x32xf32>
    %24 = arith.truncf %23 : vector<4x32xf32> to vector<4x32xbf16>
    %c0_9 = arith.constant 0 : index
    %c0_10 = arith.constant 0 : index
    %25 = vector.load %arg4[%c0_9, %c0_10] : memref<32x32xbf16, #tpu.memory_space<vmem>>, vector<32x32xbf16>
    %cst_11 = arith.constant dense<0.000000e+00> : vector<4x32xf32>
    %26 = tpu.matmul %24, %25, %cst_11 {dimension_numbers = #tpu.dot_dimension_numbers<[1], [0], [0], [1], [0, 0, 1, 1], [], []>} : vector<4x32xbf16>, vector<32x32xbf16>, vector<4x32xf32> -> vector<4x32xf32>
    %c0_12 = arith.constant 0 : index
    %c0_13 = arith.constant 0 : index
    %27 = vector.load %arg5[%c0_12, %c0_13] : memref<1x32xf32, #tpu.memory_space<vmem>>, vector<1x32xf32>
    %28 = vector.broadcast %27 : vector<1x32xf32> to vector<4x32xf32>
    %29 = arith.addf %26, %28 : vector<4x32xf32>
    %30 = arith.truncf %29 : vector<4x32xf32> to vector<4x32xbf16>
    %c0_14 = arith.constant 0 : index
    %c0_15 = arith.constant 0 : index
    %31 = vector.load %arg6[%c0_14, %c0_15] : memref<4x32xbf16, #tpu.memory_space<vmem>>, vector<4x32xbf16>
    tpu.vector_store %arg6[%c0_14, %c0_15], %30 {strides = array<i32>} : memref<4x32xbf16, #tpu.memory_space<vmem>>, vector<4x32xbf16>,
    return
  }
  func.func @transform_0(%arg0: i32) -> (i32, i32) {
    %c0_i32 = arith.constant 0 : i32
    %c0_i32_0 = arith.constant 0 : i32
    return %arg0, %c0_i32 : i32, i32
  }
  func.func @transform_1(%arg0: i32) -> (i32, i32) {
    %c0_i32 = arith.constant 0 : i32
    %c0_i32_0 = arith.constant 0 : i32
    %c0_i32_1 = arith.constant 0 : i32
    return %c0_i32, %c0_i32_0 : i32, i32
  }
  func.func @transform_2(%arg0: i32) -> (i32, i32) {
    %c0_i32 = arith.constant 0 : i32
    %c0_i32_0 = arith.constant 0 : i32
    %c0_i32_1 = arith.constant 0 : i32
    return %c0_i32, %c0_i32_0 : i32, i32
  }
  func.func @transform_3(%arg0: i32) -> (i32, i32) {
    %c0_i32 = arith.constant 0 : i32
    %c0_i32_0 = arith.constant 0 : i32
    %c0_i32_1 = arith.constant 0 : i32
    return %c0_i32, %c0_i32_0 : i32, i32
  }
  func.func @transform_4(%arg0: i32) -> (i32, i32) {
    %c0_i32 = arith.constant 0 : i32
    %c0_i32_0 = arith.constant 0 : i32
    %c0_i32_1 = arith.constant 0 : i32
    return %c0_i32, %c0_i32_0 : i32, i32
  }
  func.func @transform_5(%arg0: i32) -> (i32, i32) {
    %c0_i32 = arith.constant 0 : i32
    %c0_i32_0 = arith.constant 0 : i32
    return %arg0, %c0_i32 : i32, i32
  }
}

module attributes {stable_mosaic.version = 11 : i64} {
  func.func @_cosine_logits_kernel(%arg0: i32, %arg1: memref<2x32xbf16, #tpu.memory_space<vmem>>, %arg2: memref<4x32xbf16, #tpu.memory_space<vmem>>, %arg3: memref<1x1xf32, #tpu.memory_space<smem>>, %arg4: memref<2x4xf32, #tpu.memory_space<vmem>>) attributes {dimension_semantics = [#tpu.dimension_semantics<parallel>], iteration_bounds = array<i64: 1>, scalar_prefetch = 0 : i64, scratch_operands = 0 : i64, tpu.core_type = #tpu.core_type<tc>, window_params = [{pipeline_mode = #tpu.pipeline_mode<synchronous>, transform_indices = @transform_0, window_bounds = array<i64: 2, 32>}, {transform_indices = @transform_1, window_bounds = array<i64: 4, 32>}, {transform_indices = @transform_2, window_bounds = array<i64: 1, 1>}, {transform_indices = @transform_3, window_bounds = array<i64: 2, 4>}]} {
    %c0 = arith.constant 0 : index
    %c0_0 = arith.constant 0 : index
    %0 = vector.load %arg1[%c0, %c0_0] : memref<2x32xbf16, #tpu.memory_space<vmem>>, vector<2x32xbf16>
    %1 = arith.extf %0 : vector<2x32xbf16> to vector<2x32xf32>
    %c0_1 = arith.constant 0 : index
    %c0_2 = arith.constant 0 : index
    %2 = vector.load %arg2[%c0_1, %c0_2] : memref<4x32xbf16, #tpu.memory_space<vmem>>, vector<4x32xbf16>
    %3 = arith.extf %2 : vector<4x32xbf16> to vector<4x32xf32>
    %4 = arith.mulf %1, %1 : vector<2x32xf32>
    %cst = arith.constant dense<0.000000e+00> : vector<2xf32>
    %5 = vector.multi_reduction <add>, %4, %cst [1] : vector<2x32xf32> to vector<2xf32>
    %6 = vector.shape_cast %5 : vector<2xf32> to vector<2x1xf32>
    %cst_3 = arith.constant 1.000000e-24 : f32
    %7 = vector.broadcast %cst_3 : f32 to vector<2x1xf32>
    %8 = arith.maximumf %6, %7 : vector<2x1xf32>
    %9 = math.rsqrt %8 : vector<2x1xf32>
    %10 = vector.broadcast %9 : vector<2x1xf32> to vector<2x32xf32>
    %11 = arith.mulf %1, %10 : vector<2x32xf32>
    %12 = arith.mulf %3, %3 : vector<4x32xf32>
    %cst_4 = arith.constant dense<0.000000e+00> : vector<4xf32>
    %13 = vector.multi_reduction <add>, %12, %cst_4 [1] : vector<4x32xf32> to vector<4xf32>
    %14 = vector.shape_cast %13 : vector<4xf32> to vector<4x1xf32>
    %cst_5 = arith.constant 1.000000e-24 : f32
    %15 = vector.broadcast %cst_5 : f32 to vector<4x1xf32>
    %16 = arith.maximumf %14, %15 : vector<4x1xf32>
    %17 = math.rsqrt %16 : vector<4x1xf32>
    %18 = vector.broadcast %17 : vector<4x1xf32> to vector<4x32xf32>
    %19 = arith.mulf %3, %18 : vector<4x32xf32>
    %cst_6 = arith.constant dense<0.000000e+00> : vector<2x4xf32>
    %20 = tpu.matmul %11, %19, %cst_6 {dimension_numbers = #tpu.dot_dimension_numbers<[1], [1], [0], [0], [0, 0, 1, 0], [], []>} : vector<2x32xf32>, vector<4x32xf32>, vector<2x4xf32> -> vector<2x4xf32>
    %c0_7 = arith.constant 0 : index
    %c0_8 = arith.constant 0 : index
    %21 = memref.load %arg3[%c0_7, %c0_8] : memref<1x1xf32, #tpu.memory_space<smem>>
    %22 = math.exp %21 : f32
    %23 = vector.broadcast %22 : f32 to vector<2x4xf32>
    %24 = arith.mulf %23, %20 : vector<2x4xf32>
    %c0_9 = arith.constant 0 : index
    %c0_10 = arith.constant 0 : index
    %25 = vector.load %arg4[%c0_9, %c0_10] : memref<2x4xf32, #tpu.memory_space<vmem>>, vector<2x4xf32>
    tpu.vector_store %arg4[%c0_9, %c0_10], %24 {strides = array<i32>} : memref<2x4xf32, #tpu.memory_space<vmem>>, vector<2x4xf32>,
    return
  }
  func.func @transform_0(%arg0: i32) -> (i32, i32) {
    %c0_i32 = arith.constant 0 : i32
    %c0_i32_0 = arith.constant 0 : i32
    %c0_i32_1 = arith.constant 0 : i32
    return %c0_i32, %c0_i32_0 : i32, i32
  }
  func.func @transform_1(%arg0: i32) -> (i32, i32) {
    %c0_i32 = arith.constant 0 : i32
    %c0_i32_0 = arith.constant 0 : i32
    return %arg0, %c0_i32 : i32, i32
  }
  func.func @transform_2(%arg0: i32) -> (i32, i32) {
    %c0_i32 = arith.constant 0 : i32
    %c0_i32_0 = arith.constant 0 : i32
    %c0_i32_1 = arith.constant 0 : i32
    return %c0_i32, %c0_i32_0 : i32, i32
  }
  func.func @transform_3(%arg0: i32) -> (i32, i32) {
    %c0_i32 = arith.constant 0 : i32
    %c0_i32_0 = arith.constant 0 : i32
    return %c0_i32, %arg0 : i32, i32
  }
}

</mosaic_0001>

<bundles_post_ra>
// kernel: clip_inference.26
= control target key start
LH: loop header
LB: loop body
LE: loop exit
PB: predicated region body
PF: predicated region fallthrough
CT: control target
= control target key end

     0   :  { %vm20_vm0 = vcmask 1041408   ;;  %v97_v5 = vmov 128.0   ;;  %s138_s0 = inlined_call_operand.vmem [shape: bf16[10,128], index: 0, kind: input, shape index: {}]   ;;  %s139_s1 = inlined_call_operand.vmem [shape: f32[1,128], index: 1, kind: input, shape index: {}]   ;;  %s140_s2 = inlined_call_operand.vmem [shape: f32[1,128], index: 2, kind: input, shape index: {}]   ;;  %s141_s3 = inlined_call_operand.vmem [shape: bf16[10,128], index: 3, kind: output, shape index: {}]  }
   0x1   :  { %v15_v0 = vld [vmem:[%s138_s0 + $0x4] sm:$0x1]  ;;  %v14_v3 = vld [vmem:[%s138_s0] sm:$0xf]  ;;  %91 = vrcp.f32 %v97_v5 }
   0x2   :  { %v17_v1 = vunpack.c.l.bf16 %v15_v0  ;;  %v16_v4 = vunpack.c.l.bf16 %v14_v3  ;;  %v89_v35 = vld [vmem:[%s139_s1] ss:$0 sm:$0xff] }
   0x3   :  { %v90_v38 = vld [vmem:[%s140_s2] ss:$0 sm:$0xff] }
   0x4   :  { %v21_v2 = vsel %vm20_vm0, %v17_v1, 0.0 }
   0x5   :  { %22 = vadd.xlane.f32.xlu0 %v21_v2 }
   0x7   :  { %v92_v6 = vpop.eup %91 }
   0x8   :  { %v25_v7 = vmul.f32 128.0, %v92_v6  ;;  %vm29_vm1 = vweird.f32 %v92_v6 }
   0xa   :  { %v26_v8 = vsub.f32 1.0, %v25_v7 }
   0xc   :  { %v27_v9 = vmul.f32 %v92_v6, %v26_v8 }
   0xd   :  { %18 = vadd.xlane.f32.xlu0 %v16_v4 }
   0xe   :  { %v28_v11 = vadd.f32 %v92_v6, %v27_v9 }
  0x10   :  { %v30_v12 = vsel %vm29_vm1, %v92_v6, %v28_v11 }
  0x78   :  { %v23_v10 = vpop.xlane.xlu0 %22 }
  0x79   :  { %v32_v15 = vmul.f32 %v30_v12, %v23_v10 }
  0x7b   :  { %v34_v18 = vsub.f32 %v17_v1, %v32_v15 }
  0x7d   :  { %v36_v19 = vmul.f32 %v34_v18, %v34_v18 }
  0x7f   :  { %v39_v20 = vsel %vm20_vm0, %v36_v19, 0.0 }
  0x80   :  { %v19_v13 = vpop.xlane.xlu0 %18 }
  0x81   :  { %v31_v14 = vmul.f32 %v30_v12, %v19_v13 }
  0x83   :  { %v33_v16 = vsub.f32 %v16_v4, %v31_v14 }
  0x85   :  { %v35_v17 = vmul.f32 %v33_v16, %v33_v16 }
  0x87   :  { %37 = vadd.xlane.f32.xlu1 %v35_v17 }
  0x8f   :  { %40 = vadd.xlane.f32.xlu1 %v39_v20 }
  0xfa   :  { %v38_v21 = vpop.xlane.xlu1 %37 }
  0xfb   :  { %v42_v22 = vmul.f32 %v38_v21, %v30_v12 }
  0xfd   :  { %v44_v23 = vadd.f32 1e-05, %v42_v22 }
  0xff   :  { %93 = vrsqrt.f32 %v44_v23  ;;  %vm52_vm3 = vweird.f32 %v44_v23 }
 0x102   :  { %v41_v24 = vpop.xlane.xlu1 %40 }
 0x103   :  { %v43_v25 = vmul.f32 %v41_v24, %v30_v12 }
 0x105   :  { %v94_v26 = vpop.eup %93  ;;  %v45_v27 = vadd.f32 1e-05, %v43_v25 }
 0x106   :  { %v47_v28 = vmul.f32 %v94_v26, %v44_v23  ;;  %vm53_vm2 = vweird.f32 %v94_v26 }
 0x107   :  { %95 = vrsqrt.f32 %v45_v27  ;;  %vm54_vm4 = vmor %vm52_vm3, %vm53_vm2  ;;  %vm62_vm6 = vweird.f32 %v45_v27 }
 0x108   :  { %v48_v29 = vmul.f32 %v94_v26, %v47_v28 }
 0x10a   :  { %v49_v30 = vmul.f32 0.5, %v48_v29 }
 0x10c   :  { %v50_v31 = vsub.f32 1.5, %v49_v30 }
 0x10d   :  { %v96_v32 = vpop.eup %95 }
 0x10e   :  { %v51_v33 = vmul.f32 %v94_v26, %v50_v31  ;;  %v57_v34 = vmul.f32 %v96_v32, %v45_v27  ;;  %vm63_vm5 = vweird.f32 %v96_v32 }
 0x10f   :  { %vm64_vm7 = vmor %vm62_vm6, %vm63_vm5 }
 0x110   :  { %v55_v36 = vsel %vm54_vm4, %v94_v26, %v51_v33  ;;  %v58_v37 = vmul.f32 %v96_v32, %v57_v34 }
 0x111   :  { %v66_v39 = vmul.f32 %v55_v36, %v33_v16 }
 0x112   :  { %v59_v40 = vmul.f32 0.5, %v58_v37 }
 0x113   :  { %v72_v41 = vmul.f32 %v89_v35, %v66_v39 }
 0x114   :  { %v60_v42 = vsub.f32 1.5, %v59_v40 }
 0x115   :  { %v78_v43 = vadd.f32 %v90_v38, %v72_v41 }
 0x116   :  { %v61_v44 = vmul.f32 %v96_v32, %v60_v42 }
 0x117   :  { %v80_v45 = vpack.c.bf16 %v78_v43, %v78_v43 }
 0x118   :  { %v65_v46 = vsel %vm64_vm7, %v96_v32, %v61_v44 }
 0x119   :  { %82 = vst [vmem:[%s141_s3] sm:$0xf] %v80_v45  ;;  %v67_v47 = vmul.f32 %v65_v46, %v34_v18 }
 0x11b   :  { %v73_v48 = vmul.f32 %v89_v35, %v67_v47 }
 0x11d   :  { %v79_v49 = vadd.f32 %v90_v38, %v73_v48 }
 0x11f   :  { %v81_v50 = vpack.c.bf16 %v79_v49, %v79_v49 }
 0x121   :  { %83 = vst [vmem:[%s141_s3 + $0x4] sm:$0x1] %v81_v50 }

// kernel: clip_inference.27
= control target key start
LH: loop header
LB: loop body
LE: loop exit
PB: predicated region body
PF: predicated region fallthrough
CT: control target
= control target key end

     0   :  { %10 = vsyncpa [#allocation3], 0  ;;  %s484_s21 = smov [#allocation2]   ;;  %s485_s23 = smov 192   ;;  %s566_s0 = inlined_call_operand.vmem [shape: bf16[10,128], index: 0, kind: input, shape index: {}]   ;;  %s567_s1 = inlined_call_operand.vmem [shape: f32[1,128], index: 1, kind: input, shape index: {}]   ;;  %s568_s2 = inlined_call_operand.vmem [shape: f32[1,128], index: 2, kind: input, shape index: {}]   ;;  %s569_s3 = inlined_call_operand.hbm [shape: bf16[128,384], index: 3, kind: input, shape index: {}]   ;;  %s570_s4 = inlined_call_operand.vmem [shape: f32[1,384], index: 4, kind: input, shape index: {}]   ;;  %s571_s5 = inlined_call_operand.vmem [shape: bf16[10,384], index: 5, kind: output, shape index: {}]  }
   0x1   :  { %s21_s20 = sshll.u32 %s569_s3, 4  ;;  %s23_s22 = sshll.u32 %s484_s21, 4  ;;  %s22_s20 = int_to_ptr.hbm [resolvable:$true] %s21_s20  ;;  %s24_s22 = int_to_ptr.vmem [resolvable:$true] %s23_s22 }
   0x2   :  { %s486_s24 = smov 12  }
   0x3   :  { %29 = dma.hbm_to_vmem [thread:$0]  %s22_s20, 3072, %s24_s22, [#allocation3], %s485_s23, %s485_s23, %s486_s24  }
   0x4   :  { %482 = dma.done.wait [#allocation3], 3072  }
   0x5   :  { %483 = vsyncadd [#allocation3], 4294964224  ;;  %v37_v0 = vld [vmem:[%s566_s0 + $0x4] sm:$0x1]  ;;  %vm42_vm0 = vcmask 1041408   ;;  %v487_v5 = vmov 128.0  }
   0x6   :  { %v39_v1 = vunpack.c.l.bf16 %v37_v0  ;;  %v36_v3 = vld [vmem:[%s566_s0] sm:$0xf]  ;;  %452 = vrcp.f32 %v487_v5  ;;  %v412_v21 = vld [vmem:[#allocation2 + $0xa8] sm:$0xf]  ;;  %v444_v22 = vld [vmem:[#allocation2 + $0xb0] sm:$0xf0] }
   0x7   :  { %v38_v4 = vunpack.c.l.bf16 %v36_v3  ;;  %v443_v23 = vld [vmem:[#allocation2 + $0xac] sm:$0xf]  ;;  %v413_v24 = vor.u32 %v444_v22, %v412_v21  ;;  %v414_v25 = vld [vmem:[#allocation2 + $0xb4] sm:$0xf0]  ;;  %v420_v26 = vld [vmem:[#allocation2 + $0xb0] sm:$0xf] }
   0x8   :  { %v43_v2 = vsel %vm42_vm0, %v39_v1, 0.0  ;;  %v445_v27 = vld [vmem:[#allocation2 + $0xb8] sm:$0xf0]  ;;  %v417_v28 = vor.u32 %v443_v23, %v414_v25  ;;  %v400_v30 = vld [vmem:[#allocation2 + $0x90] sm:$0xf] }
   0x9   :  { %44 = vadd.xlane.f32.xlu0 %v43_v2  ;;  %v421_v29 = vor.u32 %v445_v27, %v420_v26  ;;  %271 = vmatpush.bf16.msra.mxu0 %v413_v24  ;;  %v441_v31 = vld [vmem:[#allocation2 + $0x98] sm:$0xf0]  ;;  %v440_v32 = vld [vmem:[#allocation2 + $0x94] sm:$0xf]  ;;  %v402_v34 = vld [vmem:[#allocation2 + $0x9c] sm:$0xf0] }
   0xa   :  { %285 = vmatpush.bf16.msra.mxu1 %v417_v28  ;;  %v401_v33 = vor.u32 %v441_v31, %v400_v30  ;;  %v408_v35 = vld [vmem:[#allocation2 + $0x98] sm:$0xf]  ;;  %v442_v36 = vld [vmem:[#allocation2 + $0xa0] sm:$0xf0]  ;;  %v405_v37 = vor.u32 %v440_v32, %v402_v34  ;;  %v437_v41 = vld [vmem:[#allocation2 + $0x7c] sm:$0xf] }
   0xb   :  { %299 = vmatpush.bf16.msra.mxu2 %v421_v29  ;;  %v409_v38 = vor.u32 %v442_v36, %v408_v35  ;;  %v388_v39 = vld [vmem:[#allocation2 + $0x78] sm:$0xf]  ;;  %v438_v40 = vld [vmem:[#allocation2 + $0x80] sm:$0xf0]  ;;  %v390_v43 = vld [vmem:[#allocation2 + $0x84] sm:$0xf0] }
   0xc   :  { %v453_v6 = vpop.eup %452  ;;  %v389_v42 = vor.u32 %v438_v40, %v388_v39  ;;  %v396_v44 = vld [vmem:[#allocation2 + $0x80] sm:$0xf]  ;;  %v439_v45 = vld [vmem:[#allocation2 + $0x88] sm:$0xf0]  ;;  %v393_v46 = vor.u32 %v437_v41, %v390_v43  ;;  %v434_v50 = vld [vmem:[#allocation2 + $0x64] sm:$0xf] }
   0xd   :  { %v47_v7 = vmul.f32 128.0, %v453_v6  ;;  %vm51_vm1 = vweird.f32 %v453_v6  ;;  %272 = vmatpush.bf16.msra.mxu0 %v401_v33  ;;  %v397_v47 = vor.u32 %v439_v45, %v396_v44  ;;  %v376_v48 = vld [vmem:[#allocation2 + $0x60] sm:$0xf]  ;;  %v435_v49 = vld [vmem:[#allocation2 + $0x68] sm:$0xf0] }
   0xe   :  { %286 = vmatpush.bf16.msra.mxu1 %v405_v37  ;;  %v377_v51 = vor.u32 %v435_v49, %v376_v48  ;;  %v378_v52 = vld [vmem:[#allocation2 + $0x6c] sm:$0xf0]  ;;  %v384_v53 = vld [vmem:[#allocation2 + $0x68] sm:$0xf]  ;;  %v436_v54 = vld [vmem:[#allocation2 + $0x70] sm:$0xf0] }
   0xf   :  { %v48_v8 = vsub.f32 1.0, %v47_v7  ;;  %300 = vmatpush.bf16.msra.mxu2 %v409_v38  ;;  %v381_v55 = vor.u32 %v434_v50, %v378_v52  ;;  %v385_v56 = vor.u32 %v436_v54, %v384_v53  ;;  %v364_v57 = vld [vmem:[#allocation2 + $0x48] sm:$0xf]  ;;  %v432_v58 = vld [vmem:[#allocation2 + $0x50] sm:$0xf0] }
  0x10   :  { %v431_v59 = vld [vmem:[#allocation2 + $0x4c] sm:$0xf]  ;;  %v365_v60 = vor.u32 %v432_v58, %v364_v57  ;;  %v366_v61 = vld [vmem:[#allocation2 + $0x54] sm:$0xf0]  ;;  %v372_v62 = vld [vmem:[#allocation2 + $0x50] sm:$0xf] }
  0x11   :  { %40 = vadd.xlane.f32.xlu0 %v38_v4  ;;  %v49_v9 = vmul.f32 %v453_v6, %v48_v8  ;;  %273 = vmatpush.bf16.msra.mxu0 %v389_v42  ;;  %v433_v63 = vld [vmem:[#allocation2 + $0x58] sm:$0xf0]  ;;  %v369_v0 = vor.u32 %v431_v59, %v366_v61  ;;  %v352_v2 = vld [vmem:[#allocation2 + $0x30] sm:$0xf]  ;;  %v360_v7 = vld [vmem:[#allocation2 + $0x38] sm:$0xf] }
  0x12   :  { %287 = vmatpush.bf16.msra.mxu1 %v393_v46  ;;  %v429_v3 = vld [vmem:[#allocation2 + $0x38] sm:$0xf0]  ;;  %v430_v8 = vld [vmem:[#allocation2 + $0x40] sm:$0xf0]  ;;  %v328_v23 = vld [vmem:[#allocation2] sm:$0xf] }
  0x13   :  { %v50_v11 = vadd.f32 %v453_v6, %v49_v9  ;;  %301 = vmatpush.bf16.msra.mxu2 %v397_v47  ;;  %v353_v5 = vor.u32 %v429_v3, %v352_v2  ;;  %v423_v24 = vld [vmem:[#allocation2 + $0x8] sm:$0xf0]  ;;  %v422_v25 = vld [vmem:[#allocation2 + $0x4] sm:$0xf]  ;;  %v330_v28 = vld [vmem:[#allocation2 + $0xc] sm:$0xf0] }
  0x14   :  { %v329_v27 = vor.u32 %v423_v24, %v328_v23  ;;  %v336_v29 = vld [vmem:[#allocation2 + $0x8] sm:$0xf]  ;;  %v424_v30 = vld [vmem:[#allocation2 + $0x10] sm:$0xf0]  ;;  %v333_v32 = vor.u32 %v422_v25, %v330_v28  ;;  %v450_v50 = vld [vmem:[%s567_s1] ss:$0 sm:$0xff] }
  0x15   :  { %v528_v12 = vsel %vm51_vm1, %v453_v6, %v50_v11  ;;  %274 = vmatpush.bf16.msra.mxu0 %v377_v51  ;;  %v354_v6 = vld [vmem:[#allocation2 + $0x3c] sm:$0xf0]  ;;  %v340_v11 = vld [vmem:[#allocation2 + $0x18] sm:$0xf]  ;;  %v337_v33 = vor.u32 %v424_v30, %v336_v29 }
  0x16   :  { %288 = vmatpush.bf16.msra.mxu1 %v381_v55  ;;  %v451_v55 = vld [vmem:[%s568_s2] ss:$0 sm:$0xff] }
  0x17   :  { %302 = vmatpush.bf16.msra.mxu2 %v385_v56 }
  0x19   :  { %275 = vmatpush.bf16.msra.mxu0 %v365_v60 }
  0x1a   :  { %289 = vmatpush.bf16.msra.mxu1 %v369_v0 }
  0x1d   :  { %276 = vmatpush.bf16.msra.mxu0 %v353_v5 }
  0x7c   :  { %v45_v10 = vpop.xlane.xlu0 %44 }
  0x7d   :  { %v54_v15 = vmul.f32 %v528_v12, %v45_v10  ;;  %v361_v10 = vor.u32 %v430_v8, %v360_v7 }
  0x7f   :  { %v536_v18 = vsub.f32 %v39_v1, %v54_v15  ;;  %v373_v1 = vor.u32 %v433_v63, %v372_v62 }
  0x81   :  { %v58_v19 = vmul.f32 %v536_v18, %v536_v18  ;;  %303 = vmatpush.bf16.msra.mxu2 %v373_v1 }
  0x83   :  { %v61_v20 = vsel %vm42_vm0, %v58_v19, 0.0  ;;  %v348_v19 = vld [vmem:[#allocation2 + $0x20] sm:$0xf] }
  0x84   :  { %v41_v13 = vpop.xlane.xlu0 %40 }
  0x85   :  { %v53_v14 = vmul.f32 %v528_v12, %v41_v13  ;;  %304 = vmatpush.bf16.msra.mxu2 %v361_v10  ;;  %v426_v13 = vld [vmem:[#allocation2 + $0x20] sm:$0xf0] }
  0x86   :  { %v341_v15 = vor.u32 %v426_v13, %v340_v11 }
  0x87   :  { %v532_v16 = vsub.f32 %v38_v4, %v53_v14  ;;  %v428_v4 = vld [vmem:[#allocation2 + $0x34] sm:$0xf]  ;;  %v425_v14 = vld [vmem:[#allocation2 + $0x1c] sm:$0xf] }
  0x88   :  { %v357_v9 = vor.u32 %v428_v4, %v354_v6  ;;  %277 = vmatpush.bf16.msra.mxu0 %v341_v15 }
  0x89   :  { %v57_v17 = vmul.f32 %v532_v16, %v532_v16 }
  0x8a   :  { %290 = vmatpush.bf16.msra.mxu1 %v357_v9 }
  0x8b   :  { %59 = vadd.xlane.f32.xlu1 %v57_v17  ;;  %v342_v17 = vld [vmem:[#allocation2 + $0x24] sm:$0xf0] }
  0x8c   :  { %v345_v21 = vor.u32 %v425_v14, %v342_v17  ;;  %278 = vmatpush.bf16.msra.mxu0 %v329_v27 }
  0x8e   :  { %291 = vmatpush.bf16.msra.mxu1 %v345_v21 }
  0x92   :  { %292 = vmatpush.bf16.msra.mxu1 %v333_v32 }
  0x93   :  { %62 = vadd.xlane.f32.xlu1 %v61_v20  ;;  %v427_v20 = vld [vmem:[#allocation2 + $0x28] sm:$0xf0] }
  0x94   :  { %v349_v22 = vor.u32 %v427_v20, %v348_v19 }
  0x96   :  { %305 = vmatpush.bf16.msra.mxu2 %v349_v22 }
  0x9a   :  { %306 = vmatpush.bf16.msra.mxu2 %v337_v33 }
  0xfe   :  { %v60_v26 = vpop.xlane.xlu1 %59 }
  0xff   :  { %v64_v31 = vmul.f32 %v60_v26, %v528_v12 }
 0x101   :  { %v66_v34 = vadd.f32 1e-05, %v64_v31 }
 0x103   :  { %454 = vrsqrt.f32 %v66_v34  ;;  %vm74_vm3 = vweird.f32 %v66_v34 }
 0x106   :  { %v63_v35 = vpop.xlane.xlu1 %62 }
 0x107   :  { %v65_v36 = vmul.f32 %v63_v35, %v528_v12 }
 0x109   :  { %v455_v37 = vpop.eup %454  ;;  %v67_v38 = vadd.f32 1e-05, %v65_v36 }
 0x10a   :  { %v69_v39 = vmul.f32 %v455_v37, %v66_v34  ;;  %vm75_vm2 = vweird.f32 %v455_v37 }
 0x10b   :  { %456 = vrsqrt.f32 %v67_v38  ;;  %vm76_vm4 = vmor %vm74_vm3, %vm75_vm2  ;;  %vm84_vm6 = vweird.f32 %v67_v38 }
 0x10c   :  { %v70_v40 = vmul.f32 %v455_v37, %v69_v39 }
 0x10e   :  { %v71_v41 = vmul.f32 0.5, %v70_v40 }
 0x110   :  { %v72_v42 = vsub.f32 1.5, %v71_v41 }
 0x111   :  { %v457_v43 = vpop.eup %456 }
 0x112   :  { %v73_v44 = vmul.f32 %v455_v37, %v72_v42  ;;  %v79_v45 = vmul.f32 %v457_v43, %v67_v38  ;;  %vm85_vm5 = vweird.f32 %v457_v43 }
 0x113   :  { %vm86_vm7 = vmor %vm84_vm6, %vm85_vm5 }
 0x114   :  { %v80_v46 = vmul.f32 %v457_v43, %v79_v45  ;;  %v77_v47 = vsel %vm76_vm4, %v455_v37, %v73_v44 }
 0x115   :  { %v88_v12 = vmul.f32 %v77_v47, %v532_v16  ;;  %v135_v16 = vld [vmem:[%s570_s4] sm:$0x7] }
 0x116   :  { %v81_v48 = vmul.f32 0.5, %v80_v46  ;;  %v137_v60 = vperm.slane %v135_v16, 0  ;;  %v138_v61 = vperm.slane %v135_v16, 1  ;;  %v139_v2 = vperm.slane %v135_v16, 2 }
 0x117   :  { %v94_v54 = vmul.f32 %v450_v50, %v88_v12 }
 0x118   :  { %v82_v49 = vsub.f32 1.5, %v81_v48 }
 0x119   :  { %v100_v57 = vadd.f32 %v451_v55, %v94_v54 }
 0x11a   :  { %v83_v51 = vmul.f32 %v457_v43, %v82_v49 }
 0x11c   :  { %v87_v52 = vsel %vm86_vm7, %v457_v43, %v83_v51 }
 0x11d   :  { %v89_v53 = vmul.f32 %v87_v52, %v536_v18 }
 0x11f   :  { %v95_v56 = vmul.f32 %v450_v50, %v89_v53 }
 0x121   :  { %v101_v58 = vadd.f32 %v451_v55, %v95_v56 }
 0x123   :  { %v102_v59 = vpack.c.bf16 %v101_v58, %v100_v57 }
 0x125   :  { %279 = vmatmul.bf16.vlgmr.msra.gmra.mxu0 %v102_v59  ;;  %293 = vmatmul.bf16.vlgmr.msra.gmra.mxu1 %v102_v59 }
 0x126   :  { %307 = vmatmul.bf16.vlgmr.msra.gmra.mxu2 %v102_v59 }
 0x1a2   :  { %v280_v62 = vpop.f32.mrf.mxu0  ;;  %v294_v18 = vpop.f32.mrf.mxu1 }
 0x1a3   :  { %v281_v63 = vadd.f32 %v280_v62, %v137_v60  ;;  %v295_v0 = vadd.f32 %v294_v18, %v138_v61 }
 0x1a5   :  { %v313_v1 = vpack.c.bf16 %v295_v0, %v281_v63 }
 0x1a7   :  { %317 = vst [vmem:[%s571_s5] sm:$0xff] %v313_v1 }
 0x1a9   :  { %v308_v3 = vpop.f32.mrf.mxu2 }
 0x1aa   :  { %v309_v4 = vadd.f32 %v308_v3, %v139_v2  ;;  %v282_v5 = vpop.f32.mrf.mxu0  ;;  %v296_v6 = vpop.f32.mrf.mxu1 }
 0x1ab   :  { %v283_v7 = vadd.f32 %v282_v5, %v137_v60  ;;  %v297_v8 = vadd.f32 %v296_v6, %v138_v61 }
 0x1ac   :  { %v314_v9 = vpack.c.bf16 %v309_v4, %v309_v4 }
 0x1ad   :  { %v315_v10 = vpack.c.bf16 %v297_v8, %v283_v7 }
 0x1ae   :  { %318 = vst [vmem:[%s571_s5 + $0x8] sm:$0xf] %v314_v9 }
 0x1af   :  { %319 = vst [vmem:[%s571_s5 + $0xc] sm:$0x11] %v315_v10 }
 0x1b1   :  { %v310_v11 = vpop.f32.mrf.mxu2 }
 0x1b2   :  { %v311_v13 = vadd.f32 %v310_v11, %v139_v2 }
 0x1b4   :  { %v316_v14 = vpack.c.bf16 %v311_v13, %v311_v13 }
 0x1b6   :  { %320 = vst [vmem:[%s571_s5 + $0x14] sm:$0x1] %v316_v14 }
 0x1b7   :  { %325 = vsyncpa [#allocation3], 1 }

// kernel: clip_inference.25
= control target key start
LH: loop header
LB: loop body
LE: loop exit
PB: predicated region body
PF: predicated region fallthrough
CT: control target
= control target key end

     0   :  { %vm122_vm0 = vcmask 523264   ;;  %s285_s1 = inlined_call_operand.vmem [shape: bf16[192,128], index: 1, kind: input, shape index: {}]   ;;  %s286_s0 = inlined_call_operand.vmem [shape: bf16[8,192], index: 0, kind: input, shape index: {}]   ;;  %s287_s2 = inlined_call_operand.vmem [shape: f32[1,128], index: 2, kind: input, shape index: {}]   ;;  %s288_s3 = inlined_call_operand.vmem [shape: bf16[8,128], index: 3, kind: output, shape index: {}]  }
   0x1   :  { %v214_v0 = vld [vmem:[%s285_s1 + $0x38] sm:$0xff]  ;;  %v213_v2 = vld [vmem:[%s285_s1 + $0x30] sm:$0xff]  ;;  %v212_v4 = vld [vmem:[%s285_s1 + $0x28] sm:$0xff] }
   0x2   :  { %v218_v1 = vld [vmem:[%s285_s1 + $0x58] sm:$0xff]  ;;  %126 = vmatpush.bf16.msra.mxu0 %v214_v0  ;;  %v217_v3 = vld [vmem:[%s285_s1 + $0x50] sm:$0xff]  ;;  %v216_v5 = vld [vmem:[%s285_s1 + $0x48] sm:$0xff] }
   0x3   :  { %143 = vmatpush.bf16.msra.mxu1 %v218_v1  ;;  %v15_v6 = vld [vmem:[%s286_s0] sm:$0xff]  ;;  %v210_v10 = vld [vmem:[%s285_s1 + $0x18] sm:$0xff]  ;;  %v209_v12 = vld [vmem:[%s285_s1 + $0x10] sm:$0xff] }
   0x4   :  { %v211_v7 = vld [vmem:[%s285_s1 + $0x20] sm:$0xff]  ;;  %v46_v8 = vunpack.c.h.b16 %v15_v6  ;;  %v208_v13 = vld [vmem:[%s285_s1 + $0x8] sm:$0xff]  ;;  %v45_v14 = vunpack.c.l.b16 %v15_v6 }
   0x5   :  { %v215_v9 = vld [vmem:[%s285_s1 + $0x40] sm:$0xff] }
   0x6   :  { %127 = vmatpush.bf16.msra.mxu0 %v213_v2  ;;  %v48_v11 = vpack.c.b16 %v46_v8, %v46_v8  ;;  %v207_v15 = vld [vmem:[%s285_s1] sm:$0xff]  ;;  %v47_v16 = vpack.c.b16 %v45_v14, %v45_v14 }
   0x7   :  { %144 = vmatpush.bf16.msra.mxu1 %v217_v3  ;;  %v219_v19 = vld [vmem:[%s287_s2] ss:$0 sm:$0xff] }
   0xa   :  { %128 = vmatpush.bf16.msra.mxu0 %v212_v4 }
   0xb   :  { %145 = vmatpush.bf16.msra.mxu1 %v216_v5 }
   0xe   :  { %129 = vmatpush.bf16.msra.mxu0 %v211_v7 }
   0xf   :  { %146 = vmatpush.bf16.msra.mxu1 %v215_v9 }
  0x12   :  { %130 = vmatpush.bf16.msra.mxu0 %v210_v10  ;;  %206 = vmatmul.msk.bf16.vlgmr.msra.gmra.mxu1 %vm122_vm0, %v48_v11 }
  0x16   :  { %131 = vmatpush.bf16.msra.mxu0 %v209_v12 }
  0x1a   :  { %132 = vmatpush.bf16.msra.mxu0 %v208_v13 }
  0x1e   :  { %133 = vmatpush.bf16.msra.mxu0 %v207_v15 }
  0x21   :  { %134 = vmatmul.bf16.vlgmr.msra.gmra.mxu0 %v47_v16 }
  0x8f   :  { %v148_v17 = vpop.f32.mrf.mxu1 }
  0x97   :  { %v150_v18 = vpop.f32.mrf.mxu1 }
  0x9e   :  { %v135_v20 = vpop.f32.mrf.mxu0 }
  0x9f   :  { %v136_v21 = vadd.f32 %v219_v19, %v135_v20 }
  0xa1   :  { %v149_v22 = vadd.f32 %v148_v17, %v136_v21 }
  0xa3   :  { %v152_v23 = vpack.c.bf16 %v149_v22, %v149_v22 }
  0xa5   :  { %153 = vst [vmem:[%s288_s3] sm:$0xf] %v152_v23 }
  0xa6   :  { %v137_v24 = vpop.f32.mrf.mxu0 }

// kernel: clip_inference.28
= control target key start
LH: loop header
LB: loop body
LE: loop exit
PB: predicated region body
PF: predicated region fallthrough
CT: control target
= control target key end

     0   :  { %s635_s12 = smov 0   ;;  %s637_s13 = smov 0   ;;  %s697_s0 = inlined_call_operand.vmem [shape: bf16[2,5,384], index: 0, kind: input, shape index: {}, may-alias: {0,1,2}]   ;;  %s698_s1 = inlined_call_operand.vmem [shape: bf16[2,5,384], index: 1, kind: input, shape index: {}, may-alias: {0,1,2}]   ;;  %s699_s2 = inlined_call_operand.vmem [shape: bf16[2,5,384], index: 2, kind: input, shape index: {}, may-alias: {0,1,2}]   ;;  %s700_s3 = inlined_call_operand.vmem [shape: bf16[2,5,128], index: 3, kind: output, shape index: {}]  }
   0x1   :  { %s639_s14 = smov 0  }
   0x2 LB: > { %s25_s15 = sadd.s32 1, %s607_s13  ;;  %p537_p0 = scmp.ge.s32.totalorder %s611_s14, 1  ;;  %s611_s14 = sphi %s639_s14, %s13_s14   ;;  %s607_s13 = sphi %s637_s13, %s702_s13   ;;  %s603_s12 = sphi %s635_s12, %s701_s12  }
   0x3   : > { %p27_p1 = scmp.ge.s32.totalorder %s25_s15, 2  ;;  %p194_p2 = scmp.lt.s32.totalorder %s611_s14, 3 }
   0x5   : > { %s704_s15 = smov (%p27_p1, %s25_s15), 0  ;;  %p195_p3 = pnand %p537_p0, %p194_p2 }
   0x6   : > { %p241_p4 = scmp.lt.s32.totalorder (!%p195_p3), %s603_s12, 1  ;;  %s613_s24 = smov (!%p195_p3), 64  }
   0x7   : > { %198 = sbr.rel (%p195_p3) target bundleno = 652 (0x28c), region = 32 }
   0xc   : > { %s706_s12 = smov (!%p241_p4, %s603_s12), 1  ;;  %vm283_vm0 = vcmask 523264   ;;  %vm303_vm1 = vcmask 36864   ;;  %vm319_vm2 = vcmask 1041408   ;;  %vm320_vm3 = vcmask 1042432  }
   0xd   : > { %s656_s16 = smul.u32 12, %s706_s12  ;;  %v614_v16 = vmov 65535   ;;  %vm315_vm4 = vcmask 39936   ;;  %s541_s29 = sshll.u32 %s706_s12, 2  ;;  %vm341_vm5 = vcmask 518144   ;;  %vm415_vm8 = vcmask 1042944  }
   0xe   : > { %v321_v17 = vsel %vm319_vm2, 4294967295, %v614_v16  ;;  %s275_s5 = scalar_lea.vmem %s700_s3, %s541_s29  ;;  %vm342_vm6 = vsmask.f32 2304 }
   0xf   : > { %s549_s17 = sadd.s32 4, %s656_s16  ;;  %s248_s20 = scalar_lea.vmem %s697_s0, %s656_s16  ;;  %v322_v19 = vsel %vm320_vm3, %v321_v17, 0  ;;  %vm343_vm7 = vmand %vm341_vm5, %vm342_vm6  ;;  %v344_v44 = vld [vmem:[%s275_s5] sm:$0x7] }
  0x10   : > { %s257_s23 = scalar_lea.vmem %s698_s1, %s549_s17  ;;  %v277_v0 = vld [vmem:[%s248_s20] sm:$0x7]  ;;  %s551_s25 = sadd.s32 8, %s656_s16  ;;  %vm416_vm9 = vmand %vm415_vm8, %vm342_vm6 }
  0x11   : > { %v278_v1 = vld [vmem:[%s257_s23] sm:$0x7]  ;;  %v280_v2 = vunpack.c.l.bf16 %v277_v0  ;;  %s267_s28 = scalar_lea.vmem %s699_s2, %s551_s25 }
  0x12   : > { %v351_v3 = vunpack.c.l.b16 %v278_v1  ;;  %v288_v4 = vsel %vm283_vm0, %v278_v1, 0  ;;  %v279_v18 = vld [vmem:[%s267_s28] sm:$0x7] }
  0x13   : > { %297 = vmatpush.bf16.xpose.msra.mxu0 %v288_v4  ;;  %v281_v6 = vmul.f32 0.125, %v280_v2  ;;  %v324_v21 = vand.u32 %v322_v19, %v279_v18  ;;  %v386_v27 = vunpack.c.l.b16 %v279_v18 }
  0x14   : > { %v352_v5 = vpack.c.b16 %v351_v3, %v351_v3 }
  0x15   : > { %v282_v7 = vpack.c.bf16 %v281_v6, %v281_v6  ;;  %333 = vmatpush.bf16.msra.mxu1 %v324_v21  ;;  %v387_v28 = vpack.c.b16 %v386_v27, %v386_v27 }
  0x16   : > { %353 = vrot.lane.b32.xlu0 %v352_v5, %s613_s24 }
  0x1a   : > { %542 = vmatmul.msk.bf16.vlgmr.msra.gmra.mxu0 %vm283_vm0, %v282_v7 }
  0x1e   : > { %348 = vrot.lane.b32.xlu0 %v282_v7, %s613_s24 }
  0x88   : > { %v354_v8 = vpop.permute.xlu0 %353 }
  0x89   : > { %v359_v9 = vsel %vm283_vm0, %v354_v8, 0 }
  0x8a   : > { %368 = vmatpush.bf16.xpose.msra.mxu2 %v359_v9 }
  0x90   : > { %v349_v10 = vpop.permute.xlu0 %348 }
  0x91   : > { %544 = vmatmul.msk.bf16.vlgmr.msra.gmra.mxu2 %vm283_vm0, %v349_v10 }
  0x97   : > { %v299_v11 = vpop.f32.mrf.mxu0 }
  0x98   : > { %v304_v12 = vsel %vm303_vm1, %v299_v11, -inf }
  0x99   : > { %305 = vmax.xlane.f32.xlu2 %v304_v12 }
  0x9f   : > { %v301_v13 = vpop.f32.mrf.mxu0 }
 0x10c   : > { %v306_v14 = vpop.xlane.xlu2 %305 }
 0x10d   : > { %v307_v15 = vsub.f32 %v299_v11, %v306_v14 }
 0x10f   : > { %v308_v20 = vmul.f32 1.442695, %v307_v15 }
 0x111   : > { %581 = vpow2.f32 %v308_v20 }
 0x114   : > { %v370_v22 = vpop.f32.mrf.mxu2 }
 0x115   : > { %v374_v23 = vsel %vm303_vm1, %v370_v22, -inf }
 0x116   : > { %375 = vmax.xlane.f32.xlu1 %v374_v23 }
 0x117   : > { %v582_v24 = vpop.eup %581 }
 0x118   : > { %v314_v25 = vpack.c.bf16 %v582_v24, %v582_v24  ;;  %v310_v29 = vsel %vm303_vm1, %v582_v24, 0.0 }
 0x119   : > { %311 = vadd.xlane.f32.xlu0 %v310_v29 }
 0x11a   : > { %543 = vmatmul.msk.bf16.vlgmr.msra.gmra.mxu1 %vm315_vm4, %v314_v25 }
 0x11c   : > { %v372_v26 = vpop.f32.mrf.mxu2 }
 0x12f   : > { %388 = vrot.lane.b32.xlu1 %v387_v28, %s613_s24 }
 0x189   : > { %v376_v30 = vpop.xlane.xlu1 %375 }
 0x18a   : > { %v377_v31 = vsub.f32 %v370_v22, %v376_v30 }
 0x18c   : > { %v378_v32 = vmul.f32 1.442695, %v377_v31  ;;  %v312_v40 = vpop.xlane.xlu0 %311 }
 0x18e   : > { %583 = vpow2.f32 %v378_v32 }
 0x18f   : > { %585 = vrcp.f32 %v312_v40 }
 0x194   : > { %v584_v33 = vpop.eup %583 }
 0x195   : > { %v380_v34 = vsel %vm303_vm1, %v584_v33, 0.0  ;;  %v384_v37 = vpack.c.bf16 %v584_v33, %v584_v33  ;;  %v586_v41 = vpop.eup %585 }
 0x196   : > { %381 = vadd.xlane.f32.xlu2 %v380_v34 }
 0x197   : > { %v335_v38 = vpop.f32.mrf.mxu1 }
 0x198   : > { %v339_v42 = vmul.f32 %v586_v41, %v335_v38 }
 0x19a   : > { %v340_v43 = vpack.c.bf16 %v339_v42, %v339_v42 }
 0x19c   : > { %v345_v45 = vsel %vm343_vm7, %v340_v43, %v344_v44 }
 0x19d   : > { %346 = vst [vmem:[%s275_s5] sm:$0x7] %v345_v45 }
 0x19f   : > { %v337_v39 = vpop.f32.mrf.mxu1 }
 0x1a1   : > { %v389_v35 = vpop.permute.xlu1 %388 }
 0x1a2   : > { %v394_v36 = vand.u32 %v389_v35, %v322_v19 }
 0x1a4   : > { %403 = vmatpush.bf16.msra.mxu3 %v394_v36  ;;  %v417_v52 = vld [vmem:[%s275_s5] sm:$0x7] }
 0x1a7   : > { %545 = vmatmul.msk.bf16.vlgmr.msra.gmra.mxu3 %vm315_vm4, %v384_v37 }
 0x209   : > { %v382_v46 = vpop.xlane.xlu2 %381 }
 0x20a   : > { %587 = vrcp.f32 %v382_v46 }
 0x210   : > { %v588_v47 = vpop.eup %587 }
 0x22a   : > { %v405_v48 = vpop.f32.mrf.mxu3 }
 0x22b   : > { %v409_v49 = vmul.f32 %v588_v47, %v405_v48 }
 0x22d   : > { %v410_v50 = vpack.c.bf16 %v409_v49, %v409_v49 }
 0x22f   : > { %412 = vrot.lane.b32.xlu2 %v410_v50, %s613_s24 }
 0x232   : > { %v407_v51 = vpop.f32.mrf.mxu3 }
 0x289   : > { %v413_v53 = vpop.permute.xlu2 %412 }
 0x28a   : > { %v418_v54 = vsel %vm416_vm9, %v413_v53, %v417_v52 }
 0x28b   : > { %419 = vst [vmem:[%s275_s5] sm:$0x7] %v418_v54 }
 0x28c PF: > { %s13_s14 = sadd.s32 1, %s611_s14   ;;  %s701_s12 = smov %s607_s13 }
 0x28d   : > { %p10_p5 = scmp.ge.s32.totalorder %s13_s14, 4   ;;  %s702_s13 = smov %s704_s15 }
 0x28f   :  { %12 = sbr.rel (!%p10_p5) target bundleno = 2 (0x2), region = 68 }

// kernel: clip_inference.29
= control target key start
LH: loop header
LB: loop body
LE: loop exit
PB: predicated region body
PF: predicated region fallthrough
CT: control target
= control target key end

     0   :  { %s237_s1 = inlined_call_operand.vmem [shape: bf16[128,128], index: 1, kind: input, shape index: {}]   ;;  %s238_s2 = inlined_call_operand.vmem [shape: f32[1,128], index: 2, kind: input, shape index: {}]   ;;  %s239_s0 = inlined_call_operand.vmem [shape: bf16[10,128], index: 0, kind: input, shape index: {}]   ;;  %s240_s3 = inlined_call_operand.vmem [shape: bf16[10,128], index: 3, kind: input, shape index: {}]   ;;  %s241_s4 = inlined_call_operand.vmem [shape: bf16[10,128], index: 4, kind: output, shape index: {}]  }
   0x1   :  { %v165_v0 = vld [vmem:[%s237_s1 + $0x38] sm:$0xff]  ;;  %v164_v1 = vld [vmem:[%s237_s1 + $0x30] sm:$0xff]  ;;  %v163_v2 = vld [vmem:[%s237_s1 + $0x28] sm:$0xff] }
   0x2   :  { %93 = vmatpush.bf16.msra.mxu0 %v165_v0  ;;  %v162_v3 = vld [vmem:[%s237_s1 + $0x20] sm:$0xff]  ;;  %v161_v4 = vld [vmem:[%s237_s1 + $0x18] sm:$0xff]  ;;  %v160_v5 = vld [vmem:[%s237_s1 + $0x10] sm:$0xff] }
   0x3   :  { %v159_v6 = vld [vmem:[%s237_s1 + $0x8] sm:$0xff]  ;;  %v158_v7 = vld [vmem:[%s237_s1] sm:$0xff] }
   0x4   :  { %v123_v8 = vld [vmem:[%s239_s0] sm:$0xf]  ;;  %v157_v9 = vld [vmem:[%s239_s0] sm:$0x10] }
   0x5   :  { %v124_v10 = vor.u32 %v157_v9, %v123_v8  ;;  %v107_v11 = vld [vmem:[%s240_s3] sm:$0xf]  ;;  %v108_v17 = vld [vmem:[%s240_s3 + $0x4] sm:$0x1] }
   0x6   :  { %94 = vmatpush.bf16.msra.mxu0 %v164_v1  ;;  %v166_v12 = vld [vmem:[%s238_s2] ss:$0 sm:$0xff]  ;;  %v109_v13 = vunpack.c.l.bf16 %v107_v11  ;;  %v110_v19 = vunpack.c.l.bf16 %v108_v17 }
   0xa   :  { %95 = vmatpush.bf16.msra.mxu0 %v163_v2 }
   0xe   :  { %96 = vmatpush.bf16.msra.mxu0 %v162_v3 }
  0x12   :  { %97 = vmatpush.bf16.msra.mxu0 %v161_v4 }
  0x16   :  { %98 = vmatpush.bf16.msra.mxu0 %v160_v5 }
  0x1a   :  { %99 = vmatpush.bf16.msra.mxu0 %v159_v6 }
  0x1e   :  { %100 = vmatpush.bf16.msra.mxu0 %v158_v7 }
  0x21   :  { %101 = vmatmul.bf16.vlgmr.msra.gmra.mxu0 %v124_v10 }
  0x9e   :  { %v102_v14 = vpop.f32.mrf.mxu0 }
  0x9f   :  { %v103_v15 = vadd.f32 %v166_v12, %v102_v14 }
  0xa1   :  { %v111_v16 = vadd.f32 %v109_v13, %v103_v15 }
  0xa3   :  { %v113_v18 = vpack.c.bf16 %v111_v16, %v111_v16 }
  0xa5   :  { %115 = vst [vmem:[%s241_s4] sm:$0xf] %v113_v18 }
  0xa6   :  { %v104_v20 = vpop.f32.mrf.mxu0 }
  0xa7   :  { %v105_v21 = vadd.f32 %v166_v12, %v104_v20 }
  0xa9   :  { %v112_v22 = vadd.f32 %v110_v19, %v105_v21 }
  0xab   :  { %v114_v23 = vpack.c.bf16 %v112_v22, %v112_v22 }
  0xad   :  { %116 = vst [vmem:[%s241_s4 + $0x4] sm:$0x1] %v114_v23 }

// kernel: clip_inference.31
= control target key start
LH: loop header
LB: loop body
LE: loop exit
PB: predicated region body
PF: predicated region fallthrough
CT: control target
= control target key end

     0   :  { %s712_s1 = inlined_call_operand.vmem [shape: bf16[512,128], index: 1, kind: input, shape index: {}]   ;;  %s713_s2 = inlined_call_operand.vmem [shape: f32[1,128], index: 2, kind: input, shape index: {}]   ;;  %s714_s0 = inlined_call_operand.vmem [shape: bf16[10,512], index: 0, kind: input, shape index: {}]   ;;  %s715_s3 = inlined_call_operand.vmem [shape: bf16[10,128], index: 3, kind: input, shape index: {}]   ;;  %s716_s4 = inlined_call_operand.vmem [shape: bf16[10,128], index: 4, kind: output, shape index: {}]  }
   0x1   :  { %v526_v0 = vld [vmem:[%s712_s1 + $0x38] sm:$0xff]  ;;  %v525_v4 = vld [vmem:[%s712_s1 + $0x30] sm:$0xff]  ;;  %v524_v8 = vld [vmem:[%s712_s1 + $0x28] sm:$0xff] }
   0x2   :  { %v534_v1 = vld [vmem:[%s712_s1 + $0x78] sm:$0xff]  ;;  %301 = vmatpush.bf16.msra.mxu0 %v526_v0  ;;  %v533_v5 = vld [vmem:[%s712_s1 + $0x70] sm:$0xff]  ;;  %v532_v9 = vld [vmem:[%s712_s1 + $0x68] sm:$0xff] }
   0x3   :  { %v542_v2 = vld [vmem:[%s712_s1 + $0xb8] sm:$0xff]  ;;  %315 = vmatpush.bf16.msra.mxu1 %v534_v1  ;;  %v541_v6 = vld [vmem:[%s712_s1 + $0xb0] sm:$0xff]  ;;  %v540_v10 = vld [vmem:[%s712_s1 + $0xa8] sm:$0xff] }
   0x4   :  { %v550_v3 = vld [vmem:[%s712_s1 + $0xf8] sm:$0xff]  ;;  %329 = vmatpush.bf16.msra.mxu2 %v542_v2  ;;  %v549_v7 = vld [vmem:[%s712_s1 + $0xf0] sm:$0xff]  ;;  %v548_v11 = vld [vmem:[%s712_s1 + $0xe8] sm:$0xff] }
   0x5   :  { %343 = vmatpush.bf16.msra.mxu3 %v550_v3  ;;  %v523_v12 = vld [vmem:[%s712_s1 + $0x20] sm:$0xff]  ;;  %v522_v16 = vld [vmem:[%s712_s1 + $0x18] sm:$0xff]  ;;  %v521_v20 = vld [vmem:[%s712_s1 + $0x10] sm:$0xff] }
   0x6   :  { %302 = vmatpush.bf16.msra.mxu0 %v525_v4  ;;  %v531_v13 = vld [vmem:[%s712_s1 + $0x60] sm:$0xff]  ;;  %v530_v17 = vld [vmem:[%s712_s1 + $0x58] sm:$0xff]  ;;  %v529_v21 = vld [vmem:[%s712_s1 + $0x50] sm:$0xff] }
   0x7   :  { %316 = vmatpush.bf16.msra.mxu1 %v533_v5  ;;  %v539_v14 = vld [vmem:[%s712_s1 + $0xa0] sm:$0xff]  ;;  %v538_v18 = vld [vmem:[%s712_s1 + $0x98] sm:$0xff]  ;;  %v537_v22 = vld [vmem:[%s712_s1 + $0x90] sm:$0xff] }
   0x8   :  { %330 = vmatpush.bf16.msra.mxu2 %v541_v6  ;;  %v547_v15 = vld [vmem:[%s712_s1 + $0xe0] sm:$0xff]  ;;  %v546_v19 = vld [vmem:[%s712_s1 + $0xd8] sm:$0xff]  ;;  %v545_v23 = vld [vmem:[%s712_s1 + $0xd0] sm:$0xff] }
   0x9   :  { %344 = vmatpush.bf16.msra.mxu3 %v549_v7  ;;  %v520_v24 = vld [vmem:[%s712_s1 + $0x8] sm:$0xff]  ;;  %v519_v28 = vld [vmem:[%s712_s1] sm:$0xff]  ;;  %v517_v33 = vld [vmem:[%s714_s0 + $0xc] sm:$0x10] }
   0xa   :  { %303 = vmatpush.bf16.msra.mxu0 %v524_v8  ;;  %v528_v25 = vld [vmem:[%s712_s1 + $0x48] sm:$0xff]  ;;  %v527_v29 = vld [vmem:[%s712_s1 + $0x40] sm:$0xff]  ;;  %v375_v35 = vld [vmem:[%s714_s0 + $0x10] sm:$0x10] }
   0xb   :  { %317 = vmatpush.bf16.msra.mxu1 %v532_v9  ;;  %v536_v26 = vld [vmem:[%s712_s1 + $0x88] sm:$0xff]  ;;  %v535_v30 = vld [vmem:[%s712_s1 + $0x80] sm:$0xff]  ;;  %v518_v37 = vld [vmem:[%s714_s0 + $0x14] sm:$0x10] }
   0xc   :  { %331 = vmatpush.bf16.msra.mxu2 %v540_v10  ;;  %v544_v27 = vld [vmem:[%s712_s1 + $0xc8] sm:$0xff]  ;;  %v543_v31 = vld [vmem:[%s712_s1 + $0xc0] sm:$0xff]  ;;  %v383_v39 = vld [vmem:[%s714_s0 + $0x18] sm:$0x10] }
   0xd   :  { %345 = vmatpush.bf16.msra.mxu3 %v548_v11  ;;  %v373_v32 = vld [vmem:[%s714_s0] sm:$0xf]  ;;  %v515_v34 = vld [vmem:[%s714_s0 + $0x4] sm:$0xf]  ;;  %v381_v36 = vld [vmem:[%s714_s0 + $0x8] sm:$0xf] }
   0xe   :  { %304 = vmatpush.bf16.msra.mxu0 %v523_v12  ;;  %v516_v38 = vld [vmem:[%s714_s0 + $0xc] sm:$0xf]  ;;  %v374_v40 = vor.u32 %v517_v33, %v373_v32  ;;  %v378_v41 = vor.u32 %v515_v34, %v375_v35  ;;  %v382_v42 = vor.u32 %v518_v37, %v381_v36  ;;  %v551_v44 = vld [vmem:[%s713_s2] ss:$0 sm:$0xff]  ;;  %v358_v59 = vld [vmem:[%s715_s3 + $0x4] sm:$0x1] }
   0xf   :  { %318 = vmatpush.bf16.msra.mxu1 %v531_v13  ;;  %v386_v43 = vor.u32 %v516_v38, %v383_v39  ;;  %v357_v49 = vld [vmem:[%s715_s3] sm:$0xf]  ;;  %v360_v0 = vunpack.c.l.bf16 %v358_v59 }
  0x10   :  { %332 = vmatpush.bf16.msra.mxu2 %v539_v14  ;;  %v359_v53 = vunpack.c.l.bf16 %v357_v49 }
  0x11   :  { %346 = vmatpush.bf16.msra.mxu3 %v547_v15 }
  0x12   :  { %305 = vmatpush.bf16.msra.mxu0 %v522_v16 }
  0x13   :  { %319 = vmatpush.bf16.msra.mxu1 %v530_v17 }
  0x14   :  { %333 = vmatpush.bf16.msra.mxu2 %v538_v18 }
  0x15   :  { %347 = vmatpush.bf16.msra.mxu3 %v546_v19 }
  0x16   :  { %306 = vmatpush.bf16.msra.mxu0 %v521_v20 }
  0x17   :  { %320 = vmatpush.bf16.msra.mxu1 %v529_v21 }
  0x18   :  { %334 = vmatpush.bf16.msra.mxu2 %v537_v22 }
  0x19   :  { %348 = vmatpush.bf16.msra.mxu3 %v545_v23 }
  0x1a   :  { %307 = vmatpush.bf16.msra.mxu0 %v520_v24 }
  0x1b   :  { %321 = vmatpush.bf16.msra.mxu1 %v528_v25 }
  0x1c   :  { %335 = vmatpush.bf16.msra.mxu2 %v536_v26 }
  0x1d   :  { %349 = vmatpush.bf16.msra.mxu3 %v544_v27 }
  0x1e   :  { %308 = vmatpush.bf16.msra.mxu0 %v519_v28 }
  0x1f   :  { %322 = vmatpush.bf16.msra.mxu1 %v527_v29 }
  0x20   :  { %336 = vmatpush.bf16.msra.mxu2 %v535_v30 }
  0x21   :  { %350 = vmatpush.bf16.msra.mxu3 %v543_v31  ;;  %309 = vmatmul.bf16.vlgmr.msra.gmra.mxu0 %v374_v40 }
  0x22   :  { %323 = vmatmul.bf16.vlgmr.msra.gmra.mxu1 %v378_v41 }
  0x23   :  { %337 = vmatmul.bf16.vlgmr.msra.gmra.mxu2 %v382_v42 }
  0x24   :  { %351 = vmatmul.bf16.vlgmr.msra.gmra.mxu3 %v386_v43 }
  0x9e   :  { %v310_v45 = vpop.f32.mrf.mxu0 }
  0x9f   :  { %v311_v46 = vadd.f32 %v551_v44, %v310_v45  ;;  %v324_v47 = vpop.f32.mrf.mxu1 }
  0xa1   :  { %v325_v48 = vadd.f32 %v324_v47, %v311_v46 }
  0xa6   :  { %v338_v50 = vpop.f32.mrf.mxu2  ;;  %v312_v54 = vpop.f32.mrf.mxu0 }
  0xa7   :  { %v352_v51 = vpop.f32.mrf.mxu3  ;;  %v339_v52 = vadd.f32 %v338_v50, %v325_v48  ;;  %v313_v56 = vadd.f32 %v551_v44, %v312_v54  ;;  %v326_v58 = vpop.f32.mrf.mxu1 }
  0xa9   :  { %v353_v55 = vadd.f32 %v352_v51, %v339_v52  ;;  %v327_v61 = vadd.f32 %v326_v58, %v313_v56 }
  0xab   :  { %v361_v57 = vadd.f32 %v359_v53, %v353_v55 }
  0xad   :  { %v363_v60 = vpack.c.bf16 %v361_v57, %v361_v57 }
  0xae   :  { %v340_v62 = vpop.f32.mrf.mxu2 }
  0xaf   :  { %365 = vst [vmem:[%s716_s4] sm:$0xf] %v363_v60  ;;  %v341_v63 = vadd.f32 %v340_v62, %v327_v61  ;;  %v354_v1 = vpop.f32.mrf.mxu3 }
  0xb1   :  { %v355_v2 = vadd.f32 %v354_v1, %v341_v63 }
  0xb3   :  { %v362_v3 = vadd.f32 %v360_v0, %v355_v2 }
  0xb5   :  { %v364_v4 = vpack.c.bf16 %v362_v3, %v362_v3 }
  0xb7   :  { %366 = vst [vmem:[%s716_s4 + $0x4] sm:$0x1] %v364_v4 }

// kernel: clip_inference.30
= control target key start
LH: loop header
LB: loop body
LE: loop exit
PB: predicated region body
PF: predicated region fallthrough
CT: control target
= control target key end

     0   :  { %vm26_vm0 = vcmask 1041408   ;;  %v734_v5 = vmov 128.0   ;;  %s1105_s0 = inlined_call_operand.vmem [shape: bf16[10,128], index: 0, kind: input, shape index: {}]   ;;  %s1106_s1 = inlined_call_operand.vmem [shape: f32[1,128], index: 1, kind: input, shape index: {}]   ;;  %s1107_s2 = inlined_call_operand.vmem [shape: f32[1,128], index: 2, kind: input, shape index: {}]   ;;  %s1108_s3 = inlined_call_operand.vmem [shape: bf16[128,512], index: 3, kind: input, shape index: {}]   ;;  %s1109_s4 = inlined_call_operand.vmem [shape: f32[1,512], index: 4, kind: input, shape index: {}]   ;;  %s1110_s5 = inlined_call_operand.vmem [shape: bf16[10,512], index: 5, kind: output, shape index: {}]  }
   0x1   :  { %v21_v0 = vld [vmem:[%s1105_s0 + $0x4] sm:$0x1]  ;;  %v20_v3 = vld [vmem:[%s1105_s0] sm:$0xf]  ;;  %696 = vrcp.f32 %v734_v5  ;;  %v691_v22 = vld [vmem:[%s1108_s3 + $0xec] sm:$0xf0] }
   0x2   :  { %v23_v1 = vunpack.c.l.bf16 %v21_v0  ;;  %v22_v4 = vunpack.c.l.bf16 %v20_v3  ;;  %v639_v21 = vld [vmem:[%s1108_s3 + $0xe0] sm:$0xf]  ;;  %v689_v23 = vld [vmem:[%s1108_s3 + $0xe4] sm:$0xf]  ;;  %v641_v25 = vld [vmem:[%s1108_s3 + $0xf0] sm:$0xf0] }
   0x3   :  { %v640_v24 = vor.u32 %v691_v22, %v639_v21  ;;  %v647_v26 = vld [vmem:[%s1108_s3 + $0xe8] sm:$0xf]  ;;  %v692_v27 = vld [vmem:[%s1108_s3 + $0xf4] sm:$0xf0]  ;;  %v644_v28 = vor.u32 %v689_v23, %v641_v25  ;;  %v690_v30 = vld [vmem:[%s1108_s3 + $0xec] sm:$0xf] }
   0x4   :  { %v27_v2 = vsel %vm26_vm0, %v23_v1, 0.0  ;;  %v648_v29 = vor.u32 %v692_v27, %v647_v26  ;;  %v649_v31 = vld [vmem:[%s1108_s3 + $0xf8] sm:$0xf0]  ;;  %v623_v33 = vld [vmem:[%s1108_s3 + $0xc0] sm:$0xf] }
   0x5   :  { %28 = vadd.xlane.f32.xlu0 %v27_v2  ;;  %289 = vmatpush.bf16.msra.mxu0 %v640_v24  ;;  %v652_v32 = vor.u32 %v690_v30, %v649_v31  ;;  %v687_v34 = vld [vmem:[%s1108_s3 + $0xcc] sm:$0xf0]  ;;  %v685_v35 = vld [vmem:[%s1108_s3 + $0xc4] sm:$0xf]  ;;  %v625_v37 = vld [vmem:[%s1108_s3 + $0xd0] sm:$0xf0] }
   0x6   :  { %303 = vmatpush.bf16.msra.mxu1 %v644_v28  ;;  %317 = vmatpush.bf16.msra.mxu2 %v648_v29  ;;  %v624_v36 = vor.u32 %v687_v34, %v623_v33  ;;  %v631_v38 = vld [vmem:[%s1108_s3 + $0xc8] sm:$0xf]  ;;  %v688_v39 = vld [vmem:[%s1108_s3 + $0xd4] sm:$0xf0]  ;;  %v628_v40 = vor.u32 %v685_v35, %v625_v37  ;;  %v686_v42 = vld [vmem:[%s1108_s3 + $0xcc] sm:$0xf] }
   0x7   :  { %v697_v6 = vpop.eup %696  ;;  %331 = vmatpush.bf16.msra.mxu3 %v652_v32  ;;  %v632_v41 = vor.u32 %v688_v39, %v631_v38  ;;  %v633_v43 = vld [vmem:[%s1108_s3 + $0xd8] sm:$0xf0]  ;;  %v607_v45 = vld [vmem:[%s1108_s3 + $0xa0] sm:$0xf]  ;;  %v683_v46 = vld [vmem:[%s1108_s3 + $0xac] sm:$0xf0] }
   0x8   :  { %v31_v7 = vmul.f32 128.0, %v697_v6  ;;  %vm35_vm1 = vweird.f32 %v697_v6  ;;  %v636_v44 = vor.u32 %v686_v42, %v633_v43  ;;  %v681_v47 = vld [vmem:[%s1108_s3 + $0xa4] sm:$0xf]  ;;  %v608_v48 = vor.u32 %v683_v46, %v607_v45  ;;  %v609_v49 = vld [vmem:[%s1108_s3 + $0xb0] sm:$0xf0] }
   0x9   :  { %290 = vmatpush.bf16.msra.mxu0 %v624_v36  ;;  %v615_v50 = vld [vmem:[%s1108_s3 + $0xa8] sm:$0xf]  ;;  %v684_v51 = vld [vmem:[%s1108_s3 + $0xb4] sm:$0xf0]  ;;  %v612_v52 = vor.u32 %v681_v47, %v609_v49  ;;  %v682_v54 = vld [vmem:[%s1108_s3 + $0xac] sm:$0xf] }
   0xa   :  { %v32_v8 = vsub.f32 1.0, %v31_v7  ;;  %304 = vmatpush.bf16.msra.mxu1 %v628_v40  ;;  %318 = vmatpush.bf16.msra.mxu2 %v632_v41  ;;  %v616_v53 = vor.u32 %v684_v51, %v615_v50  ;;  %v617_v55 = vld [vmem:[%s1108_s3 + $0xb8] sm:$0xf0]  ;;  %v591_v57 = vld [vmem:[%s1108_s3 + $0x80] sm:$0xf] }
   0xb   :  { %332 = vmatpush.bf16.msra.mxu3 %v636_v44  ;;  %v620_v56 = vor.u32 %v682_v54, %v617_v55  ;;  %v679_v58 = vld [vmem:[%s1108_s3 + $0x8c] sm:$0xf0]  ;;  %v677_v59 = vld [vmem:[%s1108_s3 + $0x84] sm:$0xf]  ;;  %v593_v61 = vld [vmem:[%s1108_s3 + $0x90] sm:$0xf0] }
   0xc   :  { %v33_v9 = vmul.f32 %v697_v6, %v32_v8  ;;  %v592_v60 = vor.u32 %v679_v58, %v591_v57  ;;  %v599_v62 = vld [vmem:[%s1108_s3 + $0x88] sm:$0xf]  ;;  %v680_v63 = vld [vmem:[%s1108_s3 + $0x94] sm:$0xf0]  ;;  %v596_v0 = vor.u32 %v677_v59, %v593_v61  ;;  %v678_v2 = vld [vmem:[%s1108_s3 + $0x8c] sm:$0xf] }
   0xd   :  { %24 = vadd.xlane.f32.xlu0 %v22_v4  ;;  %291 = vmatpush.bf16.msra.mxu0 %v608_v48  ;;  %v601_v3 = vld [vmem:[%s1108_s3 + $0x98] sm:$0xf0]  ;;  %v575_v5 = vld [vmem:[%s1108_s3 + $0x60] sm:$0xf]  ;;  %v673_v7 = vld [vmem:[%s1108_s3 + $0x64] sm:$0xf] }
   0xe   :  { %v34_v11 = vadd.f32 %v697_v6, %v33_v9  ;;  %305 = vmatpush.bf16.msra.mxu1 %v612_v52  ;;  %319 = vmatpush.bf16.msra.mxu2 %v616_v53  ;;  %v577_v9 = vld [vmem:[%s1108_s3 + $0x70] sm:$0xf0]  ;;  %v671_v21 = vld [vmem:[%s1108_s3 + $0x4c] sm:$0xf0]  ;;  %v669_v22 = vld [vmem:[%s1108_s3 + $0x44] sm:$0xf] }
   0xf   :  { %333 = vmatpush.bf16.msra.mxu3 %v620_v56  ;;  %v561_v24 = vld [vmem:[%s1108_s3 + $0x50] sm:$0xf0]  ;;  %v567_v25 = vld [vmem:[%s1108_s3 + $0x48] sm:$0xf]  ;;  %v672_v26 = vld [vmem:[%s1108_s3 + $0x54] sm:$0xf0] }
  0x10   :  { %v772_v12 = vsel %vm35_vm1, %v697_v6, %v34_v11  ;;  %v675_v6 = vld [vmem:[%s1108_s3 + $0x6c] sm:$0xf0]  ;;  %v676_v11 = vld [vmem:[%s1108_s3 + $0x74] sm:$0xf0]  ;;  %v564_v27 = vor.u32 %v669_v22, %v561_v24  ;;  %v568_v28 = vor.u32 %v672_v26, %v567_v25  ;;  %v670_v29 = vld [vmem:[%s1108_s3 + $0x4c] sm:$0xf] }
  0x11   :  { %292 = vmatpush.bf16.msra.mxu0 %v592_v60  ;;  %v576_v8 = vor.u32 %v675_v6, %v575_v5  ;;  %v569_v30 = vld [vmem:[%s1108_s3 + $0x58] sm:$0xf0]  ;;  %v543_v32 = vld [vmem:[%s1108_s3 + $0x20] sm:$0xf]  ;;  %v667_v33 = vld [vmem:[%s1108_s3 + $0x2c] sm:$0xf0] }
  0x12   :  { %306 = vmatpush.bf16.msra.mxu1 %v596_v0  ;;  %v572_v31 = vor.u32 %v670_v29, %v569_v30  ;;  %v665_v34 = vld [vmem:[%s1108_s3 + $0x24] sm:$0xf]  ;;  %v544_v35 = vor.u32 %v667_v33, %v543_v32  ;;  %v545_v36 = vld [vmem:[%s1108_s3 + $0x30] sm:$0xf0]  ;;  %v551_v37 = vld [vmem:[%s1108_s3 + $0x28] sm:$0xf] }
  0x13   :  { %v668_v38 = vld [vmem:[%s1108_s3 + $0x34] sm:$0xf0]  ;;  %v548_v39 = vor.u32 %v665_v34, %v545_v36  ;;  %v666_v41 = vld [vmem:[%s1108_s3 + $0x2c] sm:$0xf]  ;;  %v553_v42 = vld [vmem:[%s1108_s3 + $0x38] sm:$0xf0] }
  0x14   :  { %v552_v40 = vor.u32 %v668_v38, %v551_v37  ;;  %v527_v43 = vld [vmem:[%s1108_s3] sm:$0xf]  ;;  %v556_v45 = vor.u32 %v666_v41, %v553_v42  ;;  %v663_v46 = vld [vmem:[%s1108_s3 + $0xc] sm:$0xf0]  ;;  %v661_v47 = vld [vmem:[%s1108_s3 + $0x4] sm:$0xf] }
  0x15   :  { %293 = vmatpush.bf16.msra.mxu0 %v576_v8  ;;  %v529_v48 = vld [vmem:[%s1108_s3 + $0x10] sm:$0xf0]  ;;  %v528_v50 = vor.u32 %v663_v46, %v527_v43  ;;  %v535_v52 = vld [vmem:[%s1108_s3 + $0x8] sm:$0xf]  ;;  %v664_v53 = vld [vmem:[%s1108_s3 + $0x14] sm:$0xf0] }
  0x16   :  { %v532_v51 = vor.u32 %v661_v47, %v529_v48  ;;  %v662_v54 = vld [vmem:[%s1108_s3 + $0xc] sm:$0xf]  ;;  %v536_v55 = vor.u32 %v664_v53, %v535_v52  ;;  %v537_v56 = vld [vmem:[%s1108_s3 + $0x18] sm:$0xf0] }
  0x17   :  { %v540_v58 = vor.u32 %v662_v54, %v537_v56 }
  0x78   :  { %v29_v10 = vpop.xlane.xlu0 %28 }
  0x79   :  { %v38_v15 = vmul.f32 %v772_v12, %v29_v10  ;;  %v583_v10 = vld [vmem:[%s1108_s3 + $0x68] sm:$0xf] }
  0x7b   :  { %v780_v18 = vsub.f32 %v23_v1, %v38_v15  ;;  %v600_v1 = vor.u32 %v680_v63, %v599_v62  ;;  %v674_v15 = vld [vmem:[%s1108_s3 + $0x6c] sm:$0xf] }
  0x7d   :  { %v42_v19 = vmul.f32 %v780_v18, %v780_v18  ;;  %320 = vmatpush.bf16.msra.mxu2 %v600_v1 }
  0x7f   :  { %v45_v20 = vsel %vm26_vm0, %v42_v19, 0.0 }
  0x80   :  { %v25_v13 = vpop.xlane.xlu0 %24 }
  0x81   :  { %v37_v14 = vmul.f32 %v772_v12, %v25_v13  ;;  %v580_v13 = vor.u32 %v673_v7, %v577_v9 }
  0x83   :  { %v776_v16 = vsub.f32 %v22_v4, %v37_v14  ;;  %v604_v4 = vor.u32 %v678_v2, %v601_v3  ;;  %v584_v14 = vor.u32 %v676_v11, %v583_v10  ;;  %307 = vmatpush.bf16.msra.mxu1 %v580_v13  ;;  %v694_v10 = vld [vmem:[%s1106_s1] ss:$0 sm:$0xff] }
  0x85   :  { %v41_v17 = vmul.f32 %v776_v16, %v776_v16  ;;  %334 = vmatpush.bf16.msra.mxu3 %v604_v4  ;;  %321 = vmatpush.bf16.msra.mxu2 %v584_v14 }
  0x87   :  { %43 = vadd.xlane.f32.xlu1 %v41_v17  ;;  %v585_v17 = vld [vmem:[%s1108_s3 + $0x78] sm:$0xf0]  ;;  %308 = vmatpush.bf16.msra.mxu1 %v564_v27 }
  0x88   :  { %v588_v19 = vor.u32 %v674_v15, %v585_v17  ;;  %v695_v17 = vld [vmem:[%s1107_s2] ss:$0 sm:$0xff] }
  0x89   :  { %322 = vmatpush.bf16.msra.mxu2 %v568_v28 }
  0x8a   :  { %335 = vmatpush.bf16.msra.mxu3 %v588_v19 }
  0x8b   :  { %309 = vmatpush.bf16.msra.mxu1 %v548_v39 }
  0x8d   :  { %323 = vmatpush.bf16.msra.mxu2 %v552_v40 }
  0x8e   :  { %336 = vmatpush.bf16.msra.mxu3 %v572_v31 }
  0x8f   :  { %46 = vadd.xlane.f32.xlu1 %v45_v20  ;;  %v559_v20 = vld [vmem:[%s1108_s3 + $0x40] sm:$0xf]  ;;  %310 = vmatpush.bf16.msra.mxu1 %v532_v51 }
  0x90   :  { %v560_v23 = vor.u32 %v671_v21, %v559_v20 }
  0x91   :  { %324 = vmatpush.bf16.msra.mxu2 %v536_v55 }
  0x92   :  { %294 = vmatpush.bf16.msra.mxu0 %v560_v23  ;;  %337 = vmatpush.bf16.msra.mxu3 %v556_v45 }
  0x96   :  { %295 = vmatpush.bf16.msra.mxu0 %v544_v35  ;;  %338 = vmatpush.bf16.msra.mxu3 %v540_v58 }
  0x9a   :  { %296 = vmatpush.bf16.msra.mxu0 %v528_v50 }
  0xfa   :  { %v44_v44 = vpop.xlane.xlu1 %43 }
  0xfb   :  { %v48_v49 = vmul.f32 %v44_v44, %v772_v12 }
  0xfd   :  { %v50_v57 = vadd.f32 1e-05, %v48_v49 }
  0xff   :  { %698 = vrsqrt.f32 %v50_v57  ;;  %vm58_vm3 = vweird.f32 %v50_v57 }
 0x102   :  { %v47_v59 = vpop.xlane.xlu1 %46 }
 0x103   :  { %v49_v60 = vmul.f32 %v47_v59, %v772_v12 }
 0x105   :  { %v699_v61 = vpop.eup %698  ;;  %v51_v62 = vadd.f32 1e-05, %v49_v60 }
 0x106   :  { %v53_v63 = vmul.f32 %v699_v61, %v50_v57  ;;  %vm59_vm2 = vweird.f32 %v699_v61 }
 0x107   :  { %700 = vrsqrt.f32 %v51_v62  ;;  %vm60_vm4 = vmor %vm58_vm3, %vm59_vm2  ;;  %vm68_vm6 = vweird.f32 %v51_v62 }
 0x108   :  { %v54_v0 = vmul.f32 %v699_v61, %v53_v63 }
 0x10a   :  { %v55_v1 = vmul.f32 0.5, %v54_v0 }
 0x10c   :  { %v56_v2 = vsub.f32 1.5, %v55_v1 }
 0x10d   :  { %v701_v3 = vpop.eup %700 }
 0x10e   :  { %v57_v4 = vmul.f32 %v699_v61, %v56_v2  ;;  %v63_v5 = vmul.f32 %v701_v3, %v51_v62  ;;  %vm69_vm5 = vweird.f32 %v701_v3 }
 0x10f   :  { %vm70_vm7 = vmor %vm68_vm6, %vm69_vm5 }
 0x110   :  { %v64_v6 = vmul.f32 %v701_v3, %v63_v5  ;;  %v61_v7 = vsel %vm60_vm4, %v699_v61, %v57_v4 }
 0x111   :  { %v72_v12 = vmul.f32 %v61_v7, %v776_v16  ;;  %v119_v16 = vld [vmem:[%s1109_s4] sm:$0xf] }
 0x112   :  { %v65_v8 = vmul.f32 0.5, %v64_v6  ;;  %v121_v23 = vperm.slane %v119_v16, 0  ;;  %v122_v24 = vperm.slane %v119_v16, 1  ;;  %v123_v30 = vperm.slane %v119_v16, 2 }
 0x113   :  { %v78_v15 = vmul.f32 %v694_v10, %v72_v12  ;;  %v124_v31 = vperm.slane %v119_v16, 3 }
 0x114   :  { %v66_v9 = vsub.f32 1.5, %v65_v8 }
 0x115   :  { %v84_v20 = vadd.f32 %v695_v17, %v78_v15 }
 0x116   :  { %v67_v11 = vmul.f32 %v701_v3, %v66_v9 }
 0x118   :  { %v71_v13 = vsel %vm70_vm7, %v701_v3, %v67_v11 }
 0x119   :  { %v73_v14 = vmul.f32 %v71_v13, %v780_v18 }
 0x11b   :  { %v79_v19 = vmul.f32 %v694_v10, %v73_v14 }
 0x11d   :  { %v85_v21 = vadd.f32 %v695_v17, %v79_v19 }
 0x11f   :  { %v86_v22 = vpack.c.bf16 %v85_v21, %v84_v20 }
 0x121   :  { %297 = vmatmul.bf16.vlgmr.msra.gmra.mxu0 %v86_v22  ;;  %311 = vmatmul.bf16.vlgmr.msra.gmra.mxu1 %v86_v22 }
 0x122   :  { %325 = vmatmul.bf16.vlgmr.msra.gmra.mxu2 %v86_v22  ;;  %339 = vmatmul.bf16.vlgmr.msra.gmra.mxu3 %v86_v22 }
 0x19e   :  { %v298_v18 = vpop.f32.mrf.mxu0  ;;  %v312_v25 = vpop.f32.mrf.mxu1 }
 0x19f   :  { %v990_v26 = vadd.f32 %v298_v18, %v121_v23  ;;  %v992_v27 = vadd.f32 %v312_v25, %v122_v24 }
 0x1a1   :  { %v653_v28 = vmul.f32 -1.702, %v990_v26  ;;  %v654_v29 = vmul.f32 -1.702, %v992_v27 }
 0x1a3   :  { %v361_v32 = vmul.f32 1.442695, %v653_v28  ;;  %v363_v33 = vmul.f32 1.442695, %v654_v29 }
 0x1a5   :  { %702 = vpow2.f32 %v361_v32  ;;  %v326_v34 = vpop.f32.mrf.mxu2  ;;  %v340_v35 = vpop.f32.mrf.mxu3 }
 0x1a6   :  { %704 = vpow2.f32 %v363_v33  ;;  %v996_v36 = vadd.f32 %v326_v34, %v123_v30  ;;  %v998_v37 = vadd.f32 %v340_v35, %v124_v31  ;;  %v300_v38 = vpop.f32.mrf.mxu0  ;;  %v314_v39 = vpop.f32.mrf.mxu1 }
 0x1a7   :  { %v1000_v40 = vadd.f32 %v300_v38, %v121_v23  ;;  %v1002_v41 = vadd.f32 %v314_v39, %v122_v24 }
 0x1a8   :  { %v655_v42 = vmul.f32 -1.702, %v996_v36  ;;  %v656_v43 = vmul.f32 -1.702, %v998_v37 }
 0x1a9   :  { %v657_v44 = vmul.f32 -1.702, %v1000_v40  ;;  %v658_v45 = vmul.f32 -1.702, %v1002_v41 }
 0x1aa   :  { %v365_v46 = vmul.f32 1.442695, %v655_v42  ;;  %v367_v47 = vmul.f32 1.442695, %v656_v43 }
 0x1ab   :  { %v703_v48 = vpop.eup %702  ;;  %v369_v51 = vmul.f32 1.442695, %v657_v44  ;;  %v371_v53 = vmul.f32 1.442695, %v658_v45 }
 0x1ac   :  { %v705_v49 = vpop.eup %704  ;;  %v377_v50 = vadd.f32 1.0, %v703_v48  ;;  %706 = vpow2.f32 %v365_v46 }
 0x1ad   :  { %v378_v52 = vadd.f32 1.0, %v705_v49  ;;  %708 = vpow2.f32 %v367_v47  ;;  %v328_v54 = vpop.f32.mrf.mxu2  ;;  %v342_v56 = vpop.f32.mrf.mxu3 }
 0x1ae   :  { %710 = vrcp.f32 %v377_v50  ;;  %v1008_v55 = vadd.f32 %v328_v54, %v123_v30  ;;  %v394_v60 = vand.u32 2147483647, %v377_v50  ;;  %v396_v63 = vand.u32 2147483648, %v377_v50 }
 0x1af   :  { %712 = vrcp.f32 %v378_v52  ;;  %v409_v0 = vand.u32 2147483647, %v378_v52  ;;  %v1015_v2 = vadd.f32 %v342_v56, %v124_v31  ;;  %vm390_vm8 = vweird.f32 %v377_v50 }
 0x1b0   :  { %714 = vpow2.f32 %v369_v51  ;;  %v659_v58 = vmul.f32 -1.702, %v1008_v55  ;;  %v411_v7 = vand.u32 2147483648, %v378_v52  ;;  %vm1018_vm9 = vcmp.eq.f32.partialorder %v394_v60, 8.507059e+37 }
 0x1b1   :  { %716 = vpow2.f32 %v371_v53  ;;  %vm405_vm10 = vweird.f32 %v378_v52  ;;  %v397_v11 = vor.u32 1.1754944e-38, %v396_v63  ;;  %vm1023_vm11 = vcmp.eq.f32.partialorder %v409_v0, 8.507059e+37 }
 0x1b2   :  { %v707_v57 = vpop.eup %706  ;;  %v373_v8 = vmul.f32 1.442695, %v659_v58  ;;  %v660_v15 = vmul.f32 -1.702, %v1015_v2  ;;  %v412_v22 = vor.u32 1.1754944e-38, %v411_v7 }
 0x1b3   :  { %v709_v59 = vpop.eup %708  ;;  %v1011_v61 = vadd.f32 1.0, %v707_v57 }
 0x1b4   :  { %v711_v62 = vpop.eup %710  ;;  %v1013_v1 = vadd.f32 1.0, %v709_v59  ;;  %v375_v32 = vmul.f32 1.442695, %v660_v15 }
 0x1b5   :  { %v713_v3 = vpop.eup %712  ;;  %v386_v4 = vmul.f32 %v711_v62, %v377_v50  ;;  %718 = vrcp.f32 %v1011_v61  ;;  %vm391_vm12 = vweird.f32 %v711_v62  ;;  %vm420_vm14 = vweird.f32 %v1011_v61 }
 0x1b6   :  { %v715_v5 = vpop.eup %714  ;;  %v401_v6 = vmul.f32 %v713_v3, %v378_v52  ;;  %720 = vrcp.f32 %v1013_v1  ;;  %vm406_vm13 = vweird.f32 %v713_v3  ;;  %v424_v24 = vand.u32 2147483647, %v1011_v61  ;;  %vm392_vm15 = vmor %vm390_vm8, %vm391_vm12 }
 0x1b7   :  { %v717_v9 = vpop.eup %716  ;;  %v387_v12 = vsub.f32 1.0, %v386_v4  ;;  %v1028_v19 = vadd.f32 1.0, %v715_v5  ;;  %722 = vpow2.f32 %v373_v8  ;;  %v426_v28 = vand.u32 2147483648, %v1011_v61  ;;  %vm407_vm1 = vmor %vm405_vm10, %vm406_vm13 }
 0x1b8   :  { %v402_v13 = vsub.f32 1.0, %v401_v6  ;;  %v1030_v20 = vadd.f32 1.0, %v717_v9  ;;  %vm435_vm0 = vweird.f32 %v1013_v1  ;;  %v439_v31 = vand.u32 2147483647, %v1013_v1 }
 0x1b9   :  { %v388_v17 = vmul.f32 %v711_v62, %v387_v12  ;;  %724 = vrcp.f32 %v1028_v19  ;;  %vm1049_vm2 = vcmp.eq.f32.partialorder %v424_v24, 8.507059e+37  ;;  %v441_v44 = vand.u32 2147483648, %v1013_v1 }
 0x1ba   :  { %v403_v21 = vmul.f32 %v713_v3, %v402_v13  ;;  %726 = vrcp.f32 %v1030_v20  ;;  %v427_v50 = vor.u32 1.1754944e-38, %v426_v28  ;;  %vm1060_vm6 = vcmp.eq.f32.partialorder %v439_v31, 8.507059e+37 }
 0x1bb   :  { %v719_v16 = vpop.eup %718  ;;  %v389_v23 = vadd.f32 %v711_v62, %v388_v17  ;;  %728 = vpow2.f32 %v375_v32  ;;  %v442_v57 = vor.u32 1.1754944e-38, %v441_v44  ;;  %vm450_vm7 = vweird.f32 %v1028_v19 }
 0x1bc   :  { %v404_v18 = vadd.f32 %v713_v3, %v403_v21  ;;  %v416_v25 = vmul.f32 %v719_v16, %v1011_v61  ;;  %v721_v29 = vpop.eup %720  ;;  %vm421_vm3 = vweird.f32 %v719_v16  ;;  %v454_v63 = vand.u32 2147483647, %v1028_v19 }
 0x1bd   :  { %v393_v30 = vsel %vm392_vm15, %v711_v62, %v389_v23  ;;  %v431_v38 = vmul.f32 %v721_v29, %v1013_v1  ;;  %v723_v45 = vpop.eup %722  ;;  %vm436_vm4 = vweird.f32 %v721_v29  ;;  %vm422_vm5 = vmor %vm420_vm14, %vm421_vm3  ;;  %v456_v0 = vand.u32 2147483648, %v1028_v19 }
 0x1be   :  { %v398_v33 = vsel %vm1018_vm9, %v397_v11, %v393_v30  ;;  %v408_v34 = vsel %vm407_vm1, %v713_v3, %v404_v18  ;;  %v417_v35 = vsub.f32 1.0, %v416_v25  ;;  %v1055_v51 = vadd.f32 1.0, %v723_v45  ;;  %vm437_vm8 = vmor %vm435_vm0, %vm436_vm4 }
 0x1bf   :  { %v505_v39 = vmul.f32 %v398_v33, %v990_v26  ;;  %v413_v42 = vsel %vm1023_vm11, %v412_v22, %v408_v34  ;;  %v432_v48 = vsub.f32 1.0, %v431_v38  ;;  %v725_v49 = vpop.eup %724  ;;  %v469_v9 = vand.u32 2147483647, %v1030_v20 }
 0x1c0   :  { %v506_v46 = vmul.f32 %v413_v42, %v992_v27  ;;  %v418_v47 = vmul.f32 %v719_v16, %v417_v35  ;;  %v446_v54 = vmul.f32 %v725_v49, %v1028_v19  ;;  %v727_v56 = vpop.eup %726  ;;  %730 = vrcp.f32 %v1055_v51 }
 0x1c1   :  { %v433_v53 = vmul.f32 %v721_v29, %v432_v48  ;;  %v461_v62 = vmul.f32 %v727_v56, %v1030_v20  ;;  %vm451_vm9 = vweird.f32 %v725_v49  ;;  %v729_v7 = vpop.eup %728  ;;  %vm466_vm10 = vweird.f32 %v727_v56 }
 0x1c2   :  { %v513_v26 = vpack.c.bf16 %v506_v46, %v505_v39  ;;  %v419_v52 = vadd.f32 %v719_v16, %v418_v47  ;;  %v447_v60 = vsub.f32 1.0, %v446_v54  ;;  %v471_v1 = vand.u32 2147483648, %v1030_v20  ;;  %vm452_vm11 = vmor %vm450_vm7, %vm451_vm9 }
 0x1c3   :  { %v434_v59 = vadd.f32 %v721_v29, %v433_v53  ;;  %v462_v6 = vsub.f32 1.0, %v461_v62  ;;  %v384_v13 = vadd.f32 1.0, %v729_v7  ;;  %vm455_vm12 = vcmp.eq.f32.partialorder %v454_v63, 8.507059e+37 }
 0x1c4   :  { %517 = vst [vmem:[%s1110_s5] sm:$0xff] %v513_v26  ;;  %v423_v58 = vsel %vm422_vm5, %v719_v16, %v419_v52  ;;  %v448_v5 = vmul.f32 %v725_v49, %v447_v60  ;;  %vm465_vm13 = vweird.f32 %v1030_v20  ;;  %vm470_vm15 = vcmp.eq.f32.partialorder %v469_v9, 8.507059e+37 }
 0x1c5   :  { %v428_v61 = vsel %vm1049_vm2, %v427_v50, %v423_v58  ;;  %v438_v4 = vsel %vm437_vm8, %v721_v29, %v434_v59  ;;  %v463_v11 = vmul.f32 %v727_v56, %v462_v6  ;;  %vm467_vm14 = vmor %vm465_vm13, %vm466_vm10  ;;  %732 = vrcp.f32 %v384_v13 }
 0x1c6   :  { %v507_v3 = vmul.f32 %v428_v61, %v996_v36  ;;  %v443_v8 = vsel %vm1060_vm6, %v442_v57, %v438_v4  ;;  %v449_v10 = vadd.f32 %v725_v49, %v448_v5  ;;  %v731_v14 = vpop.eup %730  ;;  %v457_v36 = vor.u32 1.1754944e-38, %v456_v0 }
 0x1c7   :  { %v508_v12 = vmul.f32 %v443_v8, %v998_v37  ;;  %v464_v21 = vadd.f32 %v727_v56, %v463_v11  ;;  %v476_v22 = vmul.f32 %v731_v14, %v1055_v51  ;;  %v472_v37 = vor.u32 1.1754944e-38, %v471_v1 }
 0x1c8   :  { %v453_v17 = vsel %vm452_vm11, %v725_v49, %v449_v10  ;;  %vm481_vm0 = vweird.f32 %v731_v14  ;;  %v486_v31 = vand.u32 2147483648, %v1055_v51  ;;  %vm480_vm1 = vweird.f32 %v1055_v51 }
 0x1c9   :  { %v514_v15 = vpack.c.bf16 %v508_v12, %v507_v3  ;;  %v458_v16 = vsel %vm455_vm12, %v457_v36, %v453_v17  ;;  %v468_v23 = vsel %vm467_vm14, %v727_v56, %v464_v21  ;;  %v477_v24 = vsub.f32 1.0, %v476_v22  ;;  %vm482_vm2 = vmor %vm480_vm1, %vm481_vm0 }
 0x1ca   :  { %v509_v19 = vmul.f32 %v458_v16, %v1000_v40  ;;  %v473_v20 = vsel %vm470_vm15, %v472_v37, %v468_v23  ;;  %v484_v40 = vand.u32 2147483647, %v1055_v51  ;;  %v501_v35 = vand.u32 2147483648, %v384_v13 }
 0x1cb   :  { %518 = vst [vmem:[%s1110_s5 + $0x8] sm:$0xff] %v514_v15  ;;  %v510_v18 = vmul.f32 %v473_v20, %v1002_v41  ;;  %v478_v25 = vmul.f32 %v731_v14, %v477_v24  ;;  %v733_v30 = vpop.eup %732  ;;  %v487_v41 = vor.u32 1.1754944e-38, %v486_v31  ;;  %v499_v39 = vand.u32 2147483647, %v384_v13 }
 0x1cc   :  { %v491_v32 = vmul.f32 %v733_v30, %v384_v13  ;;  %vm485_vm3 = vcmp.eq.f32.partialorder %v484_v40, 8.507059e+37  ;;  %vm496_vm4 = vweird.f32 %v733_v30  ;;  %vm495_vm5 = vweird.f32 %v384_v13 }
 0x1cd   :  { %v515_v28 = vpack.c.bf16 %v510_v18, %v509_v19  ;;  %v479_v29 = vadd.f32 %v731_v14, %v478_v25  ;;  %vm497_vm6 = vmor %vm495_vm5, %vm496_vm4  ;;  %v502_v44 = vor.u32 1.1754944e-38, %v501_v35  ;;  %vm500_vm7 = vcmp.eq.f32.partialorder %v499_v39, 8.507059e+37 }
 0x1ce   :  { %v492_v34 = vsub.f32 1.0, %v491_v32 }
 0x1cf   :  { %519 = vst [vmem:[%s1110_s5 + $0x10] sm:$0x11] %v515_v28  ;;  %v483_v33 = vsel %vm482_vm2, %v731_v14, %v479_v29 }
 0x1d0   :  { %v493_v38 = vmul.f32 %v733_v30, %v492_v34  ;;  %v488_v42 = vsel %vm485_vm3, %v487_v41, %v483_v33 }
 0x1d1   :  { %v511_v45 = vmul.f32 %v488_v42, %v1008_v55 }
 0x1d2   :  { %v494_v43 = vadd.f32 %v733_v30, %v493_v38 }
 0x1d4   :  { %v498_v46 = vsel %vm497_vm6, %v733_v30, %v494_v43 }
 0x1d5   :  { %v503_v47 = vsel %vm500_vm7, %v502_v44, %v498_v46 }
 0x1d6   :  { %v512_v48 = vmul.f32 %v503_v47, %v1015_v2 }
 0x1d8   :  { %v516_v49 = vpack.c.bf16 %v512_v48, %v511_v45 }
 0x1da   :  { %520 = vst [vmem:[%s1110_s5 + $0x18] sm:$0x11] %v516_v49 }

// kernel: clip_inference.35
= control target key start
LH: loop header
LB: loop body
LE: loop exit
PB: predicated region body
PF: predicated region fallthrough
CT: control target
= control target key end

     0   :  { %10 = vsyncpa [#allocation3], 0  ;;  %s780_s21 = smov [#allocation2]   ;;  %s781_s23 = smov 256   ;;  %s965_s0 = inlined_call_operand.vmem [shape: bf16[10,128], index: 0, kind: input, shape index: {}]   ;;  %s966_s1 = inlined_call_operand.vmem [shape: f32[1,128], index: 1, kind: input, shape index: {}]   ;;  %s967_s2 = inlined_call_operand.vmem [shape: f32[1,128], index: 2, kind: input, shape index: {}]   ;;  %s968_s3 = inlined_call_operand.hbm [shape: bf16[128,512], index: 3, kind: input, shape index: {}]   ;;  %s969_s4 = inlined_call_operand.vmem [shape: f32[1,512], index: 4, kind: input, shape index: {}]   ;;  %s970_s5 = inlined_call_operand.vmem [shape: bf16[10,512], index: 5, kind: output, shape index: {}]  }
   0x1   :  { %s21_s20 = sshll.u32 %s968_s3, 4  ;;  %s23_s22 = sshll.u32 %s780_s21, 4  ;;  %s22_s20 = int_to_ptr.hbm [resolvable:$true] %s21_s20  ;;  %s24_s22 = int_to_ptr.vmem [resolvable:$true] %s23_s22 }
   0x2   :  { %s782_s24 = smov 16  }
   0x3   :  { %29 = dma.hbm_to_vmem [thread:$0]  %s22_s20, 4096, %s24_s22, [#allocation3], %s781_s23, %s781_s23, %s782_s24  }
   0x4   :  { %778 = dma.done.wait [#allocation3], 4096  }
   0x5   :  { %779 = vsyncadd [#allocation3], 4294963200  ;;  %v37_v0 = vld [vmem:[%s965_s0 + $0x4] sm:$0x1]  ;;  %vm42_vm0 = vcmask 1041408   ;;  %v783_v5 = vmov 128.0  }
   0x6   :  { %v39_v1 = vunpack.c.l.bf16 %v37_v0  ;;  %v36_v3 = vld [vmem:[%s965_s0] sm:$0xf]  ;;  %716 = vrcp.f32 %v783_v5  ;;  %v708_v22 = vld [vmem:[#allocation2 + $0xec] sm:$0xf0]  ;;  %v706_v23 = vld [vmem:[#allocation2 + $0xe4] sm:$0xf] }
   0x7   :  { %v38_v4 = vunpack.c.l.bf16 %v36_v3  ;;  %v656_v21 = vld [vmem:[#allocation2 + $0xe0] sm:$0xf]  ;;  %v658_v25 = vld [vmem:[#allocation2 + $0xf0] sm:$0xf0]  ;;  %v664_v26 = vld [vmem:[#allocation2 + $0xe8] sm:$0xf] }
   0x8   :  { %v43_v2 = vsel %vm42_vm0, %v39_v1, 0.0  ;;  %v657_v24 = vor.u32 %v708_v22, %v656_v21  ;;  %v709_v27 = vld [vmem:[#allocation2 + $0xf4] sm:$0xf0]  ;;  %v661_v28 = vor.u32 %v706_v23, %v658_v25  ;;  %v707_v30 = vld [vmem:[#allocation2 + $0xec] sm:$0xf] }
   0x9   :  { %44 = vadd.xlane.f32.xlu0 %v43_v2  ;;  %v665_v29 = vor.u32 %v709_v27, %v664_v26  ;;  %v666_v31 = vld [vmem:[#allocation2 + $0xf8] sm:$0xf0]  ;;  %v640_v33 = vld [vmem:[#allocation2 + $0xc0] sm:$0xf]  ;;  %v704_v34 = vld [vmem:[#allocation2 + $0xcc] sm:$0xf0] }
   0xa   :  { %305 = vmatpush.bf16.msra.mxu0 %v657_v24  ;;  %v669_v32 = vor.u32 %v707_v30, %v666_v31  ;;  %319 = vmatpush.bf16.msra.mxu1 %v661_v28  ;;  %v702_v35 = vld [vmem:[#allocation2 + $0xc4] sm:$0xf]  ;;  %v641_v36 = vor.u32 %v704_v34, %v640_v33  ;;  %v642_v37 = vld [vmem:[#allocation2 + $0xd0] sm:$0xf0]  ;;  %v648_v38 = vld [vmem:[#allocation2 + $0xc8] sm:$0xf] }
   0xb   :  { %333 = vmatpush.bf16.msra.mxu2 %v665_v29  ;;  %v705_v39 = vld [vmem:[#allocation2 + $0xd4] sm:$0xf0]  ;;  %v645_v40 = vor.u32 %v702_v35, %v642_v37  ;;  %v703_v42 = vld [vmem:[#allocation2 + $0xcc] sm:$0xf]  ;;  %v650_v43 = vld [vmem:[#allocation2 + $0xd8] sm:$0xf0] }
   0xc   :  { %v717_v6 = vpop.eup %716  ;;  %347 = vmatpush.bf16.msra.mxu3 %v669_v32  ;;  %v649_v41 = vor.u32 %v705_v39, %v648_v38  ;;  %v653_v44 = vor.u32 %v703_v42, %v650_v43  ;;  %v624_v45 = vld [vmem:[#allocation2 + $0xa0] sm:$0xf]  ;;  %v700_v46 = vld [vmem:[#allocation2 + $0xac] sm:$0xf0]  ;;  %v698_v47 = vld [vmem:[#allocation2 + $0xa4] sm:$0xf] }
   0xd   :  { %v47_v7 = vmul.f32 128.0, %v717_v6  ;;  %vm51_vm1 = vweird.f32 %v717_v6  ;;  %v625_v48 = vor.u32 %v700_v46, %v624_v45  ;;  %v626_v49 = vld [vmem:[#allocation2 + $0xb0] sm:$0xf0]  ;;  %v632_v50 = vld [vmem:[#allocation2 + $0xa8] sm:$0xf] }
   0xe   :  { %306 = vmatpush.bf16.msra.mxu0 %v641_v36  ;;  %320 = vmatpush.bf16.msra.mxu1 %v645_v40  ;;  %v701_v51 = vld [vmem:[#allocation2 + $0xb4] sm:$0xf0]  ;;  %v629_v52 = vor.u32 %v698_v47, %v626_v49  ;;  %v699_v54 = vld [vmem:[#allocation2 + $0xac] sm:$0xf]  ;;  %v634_v55 = vld [vmem:[#allocation2 + $0xb8] sm:$0xf0] }
   0xf   :  { %v48_v8 = vsub.f32 1.0, %v47_v7  ;;  %334 = vmatpush.bf16.msra.mxu2 %v649_v41  ;;  %v633_v53 = vor.u32 %v701_v51, %v632_v50  ;;  %v637_v56 = vor.u32 %v699_v54, %v634_v55  ;;  %v608_v57 = vld [vmem:[#allocation2 + $0x80] sm:$0xf]  ;;  %v696_v58 = vld [vmem:[#allocation2 + $0x8c] sm:$0xf0] }
  0x10   :  { %348 = vmatpush.bf16.msra.mxu3 %v653_v44  ;;  %v694_v59 = vld [vmem:[#allocation2 + $0x84] sm:$0xf]  ;;  %v609_v60 = vor.u32 %v696_v58, %v608_v57  ;;  %v610_v61 = vld [vmem:[#allocation2 + $0x90] sm:$0xf0]  ;;  %v616_v62 = vld [vmem:[#allocation2 + $0x88] sm:$0xf] }
  0x11   :  { %40 = vadd.xlane.f32.xlu0 %v38_v4  ;;  %v49_v9 = vmul.f32 %v717_v6, %v48_v8  ;;  %v697_v63 = vld [vmem:[#allocation2 + $0x94] sm:$0xf0]  ;;  %v613_v0 = vor.u32 %v694_v59, %v610_v61  ;;  %v695_v2 = vld [vmem:[#allocation2 + $0x8c] sm:$0xf]  ;;  %v618_v3 = vld [vmem:[#allocation2 + $0x98] sm:$0xf0] }
  0x12   :  { %307 = vmatpush.bf16.msra.mxu0 %v625_v48  ;;  %321 = vmatpush.bf16.msra.mxu1 %v629_v52  ;;  %v592_v5 = vld [vmem:[#allocation2 + $0x60] sm:$0xf]  ;;  %v690_v7 = vld [vmem:[#allocation2 + $0x64] sm:$0xf]  ;;  %v688_v21 = vld [vmem:[#allocation2 + $0x4c] sm:$0xf0] }
  0x13   :  { %v50_v11 = vadd.f32 %v717_v6, %v49_v9  ;;  %335 = vmatpush.bf16.msra.mxu2 %v633_v53  ;;  %v594_v9 = vld [vmem:[#allocation2 + $0x70] sm:$0xf0]  ;;  %v686_v22 = vld [vmem:[#allocation2 + $0x44] sm:$0xf]  ;;  %v584_v25 = vld [vmem:[#allocation2 + $0x48] sm:$0xf] }
  0x14   :  { %349 = vmatpush.bf16.msra.mxu3 %v637_v56  ;;  %v578_v24 = vld [vmem:[#allocation2 + $0x50] sm:$0xf0]  ;;  %v689_v26 = vld [vmem:[#allocation2 + $0x54] sm:$0xf0]  ;;  %v687_v29 = vld [vmem:[#allocation2 + $0x4c] sm:$0xf] }
  0x15   :  { %v824_v12 = vsel %vm51_vm1, %v717_v6, %v50_v11  ;;  %v692_v6 = vld [vmem:[#allocation2 + $0x6c] sm:$0xf0]  ;;  %v693_v11 = vld [vmem:[#allocation2 + $0x74] sm:$0xf0]  ;;  %v581_v27 = vor.u32 %v686_v22, %v578_v24  ;;  %v585_v28 = vor.u32 %v689_v26, %v584_v25  ;;  %v586_v30 = vld [vmem:[#allocation2 + $0x58] sm:$0xf0] }
  0x16   :  { %308 = vmatpush.bf16.msra.mxu0 %v609_v60  ;;  %322 = vmatpush.bf16.msra.mxu1 %v613_v0  ;;  %v593_v8 = vor.u32 %v692_v6, %v592_v5  ;;  %v589_v31 = vor.u32 %v687_v29, %v586_v30  ;;  %v560_v32 = vld [vmem:[#allocation2 + $0x20] sm:$0xf]  ;;  %v684_v33 = vld [vmem:[#allocation2 + $0x2c] sm:$0xf0]  ;;  %v682_v34 = vld [vmem:[#allocation2 + $0x24] sm:$0xf] }
  0x17   :  { %v561_v35 = vor.u32 %v684_v33, %v560_v32  ;;  %v562_v36 = vld [vmem:[#allocation2 + $0x30] sm:$0xf0]  ;;  %v568_v37 = vld [vmem:[#allocation2 + $0x28] sm:$0xf]  ;;  %v685_v38 = vld [vmem:[#allocation2 + $0x34] sm:$0xf0] }
  0x18   :  { %v565_v39 = vor.u32 %v682_v34, %v562_v36  ;;  %v569_v40 = vor.u32 %v685_v38, %v568_v37  ;;  %v683_v41 = vld [vmem:[#allocation2 + $0x2c] sm:$0xf]  ;;  %v570_v42 = vld [vmem:[#allocation2 + $0x38] sm:$0xf0]  ;;  %v544_v43 = vld [vmem:[#allocation2] sm:$0xf] }
  0x19   :  { %v573_v45 = vor.u32 %v683_v41, %v570_v42  ;;  %v680_v46 = vld [vmem:[#allocation2 + $0xc] sm:$0xf0]  ;;  %v678_v47 = vld [vmem:[#allocation2 + $0x4] sm:$0xf]  ;;  %v546_v48 = vld [vmem:[#allocation2 + $0x10] sm:$0xf0] }
  0x1a   :  { %309 = vmatpush.bf16.msra.mxu0 %v593_v8  ;;  %v545_v50 = vor.u32 %v680_v46, %v544_v43  ;;  %v549_v51 = vor.u32 %v678_v47, %v546_v48  ;;  %v552_v52 = vld [vmem:[#allocation2 + $0x8] sm:$0xf]  ;;  %v681_v53 = vld [vmem:[#allocation2 + $0x14] sm:$0xf0]  ;;  %v679_v54 = vld [vmem:[#allocation2 + $0xc] sm:$0xf] }
  0x1b   :  { %v553_v55 = vor.u32 %v681_v53, %v552_v52  ;;  %v554_v56 = vld [vmem:[#allocation2 + $0x18] sm:$0xf0] }
  0x1c   :  { %v557_v58 = vor.u32 %v679_v54, %v554_v56 }
  0x7c   :  { %v45_v10 = vpop.xlane.xlu0 %44 }
  0x7d   :  { %v54_v15 = vmul.f32 %v824_v12, %v45_v10  ;;  %v600_v10 = vld [vmem:[#allocation2 + $0x68] sm:$0xf] }
  0x7f   :  { %v832_v18 = vsub.f32 %v39_v1, %v54_v15  ;;  %v617_v1 = vor.u32 %v697_v63, %v616_v62  ;;  %v691_v15 = vld [vmem:[#allocation2 + $0x6c] sm:$0xf] }
  0x81   :  { %v58_v19 = vmul.f32 %v832_v18, %v832_v18  ;;  %336 = vmatpush.bf16.msra.mxu2 %v617_v1 }
  0x83   :  { %v61_v20 = vsel %vm42_vm0, %v58_v19, 0.0 }
  0x84   :  { %v41_v13 = vpop.xlane.xlu0 %40 }
  0x85   :  { %v53_v14 = vmul.f32 %v824_v12, %v41_v13  ;;  %v597_v13 = vor.u32 %v690_v7, %v594_v9 }
  0x87   :  { %v828_v16 = vsub.f32 %v38_v4, %v53_v14  ;;  %v621_v4 = vor.u32 %v695_v2, %v618_v3  ;;  %v601_v14 = vor.u32 %v693_v11, %v600_v10  ;;  %323 = vmatpush.bf16.msra.mxu1 %v597_v13  ;;  %v714_v10 = vld [vmem:[%s966_s1] ss:$0 sm:$0xff] }
  0x89   :  { %v57_v17 = vmul.f32 %v828_v16, %v828_v16  ;;  %350 = vmatpush.bf16.msra.mxu3 %v621_v4  ;;  %337 = vmatpush.bf16.msra.mxu2 %v601_v14 }
  0x8b   :  { %59 = vadd.xlane.f32.xlu1 %v57_v17  ;;  %v602_v17 = vld [vmem:[#allocation2 + $0x78] sm:$0xf0]  ;;  %324 = vmatpush.bf16.msra.mxu1 %v581_v27 }
  0x8c   :  { %v605_v19 = vor.u32 %v691_v15, %v602_v17  ;;  %v715_v17 = vld [vmem:[%s967_s2] ss:$0 sm:$0xff] }
  0x8d   :  { %338 = vmatpush.bf16.msra.mxu2 %v585_v28 }
  0x8e   :  { %351 = vmatpush.bf16.msra.mxu3 %v605_v19 }
  0x8f   :  { %325 = vmatpush.bf16.msra.mxu1 %v565_v39 }
  0x91   :  { %339 = vmatpush.bf16.msra.mxu2 %v569_v40 }
  0x92   :  { %352 = vmatpush.bf16.msra.mxu3 %v589_v31 }
  0x93   :  { %62 = vadd.xlane.f32.xlu1 %v61_v20  ;;  %v576_v20 = vld [vmem:[#allocation2 + $0x40] sm:$0xf]  ;;  %326 = vmatpush.bf16.msra.mxu1 %v549_v51 }
  0x94   :  { %v577_v23 = vor.u32 %v688_v21, %v576_v20 }
  0x95   :  { %340 = vmatpush.bf16.msra.mxu2 %v553_v55 }
  0x96   :  { %310 = vmatpush.bf16.msra.mxu0 %v577_v23  ;;  %353 = vmatpush.bf16.msra.mxu3 %v573_v45 }
  0x9a   :  { %311 = vmatpush.bf16.msra.mxu0 %v561_v35  ;;  %354 = vmatpush.bf16.msra.mxu3 %v557_v58 }
  0x9e   :  { %312 = vmatpush.bf16.msra.mxu0 %v545_v50 }
  0xfe   :  { %v60_v44 = vpop.xlane.xlu1 %59 }
  0xff   :  { %v64_v49 = vmul.f32 %v60_v44, %v824_v12 }
 0x101   :  { %v66_v57 = vadd.f32 1e-05, %v64_v49 }
 0x103   :  { %718 = vrsqrt.f32 %v66_v57  ;;  %vm74_vm3 = vweird.f32 %v66_v57 }
 0x106   :  { %v63_v59 = vpop.xlane.xlu1 %62 }
 0x107   :  { %v65_v60 = vmul.f32 %v63_v59, %v824_v12 }
 0x109   :  { %v719_v61 = vpop.eup %718  ;;  %v67_v62 = vadd.f32 1e-05, %v65_v60 }
 0x10a   :  { %v69_v63 = vmul.f32 %v719_v61, %v66_v57  ;;  %vm75_vm2 = vweird.f32 %v719_v61 }
 0x10b   :  { %720 = vrsqrt.f32 %v67_v62  ;;  %vm76_vm4 = vmor %vm74_vm3, %vm75_vm2  ;;  %vm84_vm6 = vweird.f32 %v67_v62 }
 0x10c   :  { %v70_v0 = vmul.f32 %v719_v61, %v69_v63 }
 0x10e   :  { %v71_v1 = vmul.f32 0.5, %v70_v0 }
 0x110   :  { %v72_v2 = vsub.f32 1.5, %v71_v1 }
 0x111   :  { %v721_v3 = vpop.eup %720 }
 0x112   :  { %v73_v4 = vmul.f32 %v719_v61, %v72_v2  ;;  %v79_v5 = vmul.f32 %v721_v3, %v67_v62  ;;  %vm85_vm5 = vweird.f32 %v721_v3 }
 0x113   :  { %vm86_vm7 = vmor %vm84_vm6, %vm85_vm5 }
 0x114   :  { %v80_v6 = vmul.f32 %v721_v3, %v79_v5  ;;  %v77_v7 = vsel %vm76_vm4, %v719_v61, %v73_v4 }
 0x115   :  { %v88_v12 = vmul.f32 %v77_v7, %v828_v16  ;;  %v135_v16 = vld [vmem:[%s969_s4] sm:$0xf] }
 0x116   :  { %v81_v8 = vmul.f32 0.5, %v80_v6  ;;  %v137_v23 = vperm.slane %v135_v16, 0  ;;  %v138_v24 = vperm.slane %v135_v16, 1  ;;  %v139_v30 = vperm.slane %v135_v16, 2 }
 0x117   :  { %v94_v15 = vmul.f32 %v714_v10, %v88_v12  ;;  %v140_v31 = vperm.slane %v135_v16, 3 }
 0x118   :  { %v82_v9 = vsub.f32 1.5, %v81_v8 }
 0x119   :  { %v100_v20 = vadd.f32 %v715_v17, %v94_v15 }
 0x11a   :  { %v83_v11 = vmul.f32 %v721_v3, %v82_v9 }
 0x11c   :  { %v87_v13 = vsel %vm86_vm7, %v721_v3, %v83_v11 }
 0x11d   :  { %v89_v14 = vmul.f32 %v87_v13, %v832_v18 }
 0x11f   :  { %v95_v19 = vmul.f32 %v714_v10, %v89_v14 }
 0x121   :  { %v101_v21 = vadd.f32 %v715_v17, %v95_v19 }
 0x123   :  { %v102_v22 = vpack.c.bf16 %v101_v21, %v100_v20 }
 0x125   :  { %313 = vmatmul.bf16.vlgmr.msra.gmra.mxu0 %v102_v22  ;;  %327 = vmatmul.bf16.vlgmr.msra.gmra.mxu1 %v102_v22 }
 0x126   :  { %341 = vmatmul.bf16.vlgmr.msra.gmra.mxu2 %v102_v22  ;;  %355 = vmatmul.bf16.vlgmr.msra.gmra.mxu3 %v102_v22 }
 0x1a2   :  { %v314_v18 = vpop.f32.mrf.mxu0  ;;  %v328_v25 = vpop.f32.mrf.mxu1 }
 0x1a3   :  { %v850_v26 = vadd.f32 %v314_v18, %v137_v23  ;;  %v852_v27 = vadd.f32 %v328_v25, %v138_v24 }
 0x1a5   :  { %v670_v28 = vmul.f32 -1.702, %v850_v26  ;;  %v671_v29 = vmul.f32 -1.702, %v852_v27 }
 0x1a7   :  { %v377_v32 = vmul.f32 1.442695, %v670_v28  ;;  %v379_v33 = vmul.f32 1.442695, %v671_v29 }
 0x1a9   :  { %722 = vpow2.f32 %v377_v32  ;;  %v342_v34 = vpop.f32.mrf.mxu2  ;;  %v356_v35 = vpop.f32.mrf.mxu3 }
 0x1aa   :  { %724 = vpow2.f32 %v379_v33  ;;  %v856_v36 = vadd.f32 %v342_v34, %v139_v30  ;;  %v858_v37 = vadd.f32 %v356_v35, %v140_v31  ;;  %v316_v38 = vpop.f32.mrf.mxu0  ;;  %v330_v39 = vpop.f32.mrf.mxu1 }
 0x1ab   :  { %v860_v40 = vadd.f32 %v316_v38, %v137_v23  ;;  %v862_v41 = vadd.f32 %v330_v39, %v138_v24 }
 0x1ac   :  { %v672_v42 = vmul.f32 -1.702, %v856_v36  ;;  %v673_v43 = vmul.f32 -1.702, %v858_v37 }
 0x1ad   :  { %v674_v44 = vmul.f32 -1.702, %v860_v40  ;;  %v675_v45 = vmul.f32 -1.702, %v862_v41 }
 0x1ae   :  { %v381_v46 = vmul.f32 1.442695, %v672_v42  ;;  %v383_v47 = vmul.f32 1.442695, %v673_v43 }
 0x1af   :  { %v723_v48 = vpop.eup %722  ;;  %v385_v51 = vmul.f32 1.442695, %v674_v44  ;;  %v387_v53 = vmul.f32 1.442695, %v675_v45 }
 0x1b0   :  { %v725_v49 = vpop.eup %724  ;;  %v393_v50 = vadd.f32 1.0, %v723_v48  ;;  %726 = vpow2.f32 %v381_v46 }
 0x1b1   :  { %v394_v52 = vadd.f32 1.0, %v725_v49  ;;  %728 = vpow2.f32 %v383_v47  ;;  %v344_v54 = vpop.f32.mrf.mxu2  ;;  %v358_v56 = vpop.f32.mrf.mxu3 }
 0x1b2   :  { %730 = vrcp.f32 %v393_v50  ;;  %v868_v55 = vadd.f32 %v344_v54, %v139_v30  ;;  %v410_v60 = vand.u32 2147483647, %v393_v50  ;;  %v412_v63 = vand.u32 2147483648, %v393_v50 }
 0x1b3   :  { %732 = vrcp.f32 %v394_v52  ;;  %v425_v0 = vand.u32 2147483647, %v394_v52  ;;  %v875_v2 = vadd.f32 %v358_v56, %v140_v31  ;;  %vm406_vm8 = vweird.f32 %v393_v50 }
 0x1b4   :  { %734 = vpow2.f32 %v385_v51  ;;  %v676_v58 = vmul.f32 -1.702, %v868_v55  ;;  %v427_v7 = vand.u32 2147483648, %v394_v52  ;;  %vm878_vm9 = vcmp.eq.f32.partialorder %v410_v60, 8.507059e+37 }
 0x1b5   :  { %736 = vpow2.f32 %v387_v53  ;;  %vm421_vm10 = vweird.f32 %v394_v52  ;;  %v413_v11 = vor.u32 1.1754944e-38, %v412_v63  ;;  %vm883_vm11 = vcmp.eq.f32.partialorder %v425_v0, 8.507059e+37 }
 0x1b6   :  { %v727_v57 = vpop.eup %726  ;;  %v389_v8 = vmul.f32 1.442695, %v676_v58  ;;  %v677_v15 = vmul.f32 -1.702, %v875_v2  ;;  %v428_v22 = vor.u32 1.1754944e-38, %v427_v7 }
 0x1b7   :  { %v729_v59 = vpop.eup %728  ;;  %v871_v61 = vadd.f32 1.0, %v727_v57 }
 0x1b8   :  { %v731_v62 = vpop.eup %730  ;;  %v873_v1 = vadd.f32 1.0, %v729_v59  ;;  %v391_v32 = vmul.f32 1.442695, %v677_v15 }
 0x1b9   :  { %v733_v3 = vpop.eup %732  ;;  %v402_v4 = vmul.f32 %v731_v62, %v393_v50  ;;  %738 = vrcp.f32 %v871_v61  ;;  %vm407_vm12 = vweird.f32 %v731_v62  ;;  %vm436_vm14 = vweird.f32 %v871_v61 }
 0x1ba   :  { %v735_v5 = vpop.eup %734  ;;  %v417_v6 = vmul.f32 %v733_v3, %v394_v52  ;;  %740 = vrcp.f32 %v873_v1  ;;  %vm422_vm13 = vweird.f32 %v733_v3  ;;  %v440_v24 = vand.u32 2147483647, %v871_v61  ;;  %vm408_vm15 = vmor %vm406_vm8, %vm407_vm12 }
 0x1bb   :  { %v737_v9 = vpop.eup %736  ;;  %v403_v12 = vsub.f32 1.0, %v402_v4  ;;  %v888_v19 = vadd.f32 1.0, %v735_v5  ;;  %742 = vpow2.f32 %v389_v8  ;;  %v442_v28 = vand.u32 2147483648, %v871_v61  ;;  %vm423_vm1 = vmor %vm421_vm10, %vm422_vm13 }
 0x1bc   :  { %v418_v13 = vsub.f32 1.0, %v417_v6  ;;  %v890_v20 = vadd.f32 1.0, %v737_v9  ;;  %vm451_vm0 = vweird.f32 %v873_v1  ;;  %v455_v31 = vand.u32 2147483647, %v873_v1 }
 0x1bd   :  { %v404_v17 = vmul.f32 %v731_v62, %v403_v12  ;;  %744 = vrcp.f32 %v888_v19  ;;  %vm909_vm2 = vcmp.eq.f32.partialorder %v440_v24, 8.507059e+37  ;;  %v457_v44 = vand.u32 2147483648, %v873_v1 }
 0x1be   :  { %v419_v21 = vmul.f32 %v733_v3, %v418_v13  ;;  %746 = vrcp.f32 %v890_v20  ;;  %v443_v50 = vor.u32 1.1754944e-38, %v442_v28  ;;  %vm920_vm6 = vcmp.eq.f32.partialorder %v455_v31, 8.507059e+37 }
 0x1bf   :  { %v739_v16 = vpop.eup %738  ;;  %v405_v23 = vadd.f32 %v731_v62, %v404_v17  ;;  %748 = vpow2.f32 %v391_v32  ;;  %v458_v57 = vor.u32 1.1754944e-38, %v457_v44  ;;  %vm466_vm7 = vweird.f32 %v888_v19 }
 0x1c0   :  { %v420_v18 = vadd.f32 %v733_v3, %v419_v21  ;;  %v432_v25 = vmul.f32 %v739_v16, %v871_v61  ;;  %v741_v29 = vpop.eup %740  ;;  %vm437_vm3 = vweird.f32 %v739_v16  ;;  %v470_v63 = vand.u32 2147483647, %v888_v19 }
 0x1c1   :  { %v409_v30 = vsel %vm408_vm15, %v731_v62, %v405_v23  ;;  %v447_v38 = vmul.f32 %v741_v29, %v873_v1  ;;  %v743_v45 = vpop.eup %742  ;;  %vm452_vm4 = vweird.f32 %v741_v29  ;;  %vm438_vm5 = vmor %vm436_vm14, %vm437_vm3  ;;  %v472_v0 = vand.u32 2147483648, %v888_v19 }
 0x1c2   :  { %v414_v33 = vsel %vm878_vm9, %v413_v11, %v409_v30  ;;  %v424_v34 = vsel %vm423_vm1, %v733_v3, %v420_v18  ;;  %v433_v35 = vsub.f32 1.0, %v432_v25  ;;  %v915_v51 = vadd.f32 1.0, %v743_v45  ;;  %vm453_vm8 = vmor %vm451_vm0, %vm452_vm4 }
 0x1c3   :  { %v521_v39 = vmul.f32 %v414_v33, %v850_v26  ;;  %v429_v42 = vsel %vm883_vm11, %v428_v22, %v424_v34  ;;  %v448_v48 = vsub.f32 1.0, %v447_v38  ;;  %v745_v49 = vpop.eup %744  ;;  %v485_v9 = vand.u32 2147483647, %v890_v20 }
 0x1c4   :  { %v522_v46 = vmul.f32 %v429_v42, %v852_v27  ;;  %v434_v47 = vmul.f32 %v739_v16, %v433_v35  ;;  %v462_v54 = vmul.f32 %v745_v49, %v888_v19  ;;  %v747_v56 = vpop.eup %746  ;;  %750 = vrcp.f32 %v915_v51 }
 0x1c5   :  { %v449_v53 = vmul.f32 %v741_v29, %v448_v48  ;;  %v477_v62 = vmul.f32 %v747_v56, %v890_v20  ;;  %vm467_vm9 = vweird.f32 %v745_v49  ;;  %v749_v7 = vpop.eup %748  ;;  %vm482_vm10 = vweird.f32 %v747_v56 }
 0x1c6   :  { %v529_v26 = vpack.c.bf16 %v522_v46, %v521_v39  ;;  %v435_v52 = vadd.f32 %v739_v16, %v434_v47  ;;  %v463_v60 = vsub.f32 1.0, %v462_v54  ;;  %v487_v1 = vand.u32 2147483648, %v890_v20  ;;  %vm468_vm11 = vmor %vm466_vm7, %vm467_vm9 }
 0x1c7   :  { %v450_v59 = vadd.f32 %v741_v29, %v449_v53  ;;  %v478_v6 = vsub.f32 1.0, %v477_v62  ;;  %v400_v13 = vadd.f32 1.0, %v749_v7  ;;  %vm471_vm12 = vcmp.eq.f32.partialorder %v470_v63, 8.507059e+37 }
 0x1c8   :  { %533 = vst [vmem:[%s970_s5] sm:$0xff] %v529_v26  ;;  %v439_v58 = vsel %vm438_vm5, %v739_v16, %v435_v52  ;;  %v464_v5 = vmul.f32 %v745_v49, %v463_v60  ;;  %vm481_vm13 = vweird.f32 %v890_v20  ;;  %vm486_vm15 = vcmp.eq.f32.partialorder %v485_v9, 8.507059e+37 }
 0x1c9   :  { %v444_v61 = vsel %vm909_vm2, %v443_v50, %v439_v58  ;;  %v454_v4 = vsel %vm453_vm8, %v741_v29, %v450_v59  ;;  %v479_v11 = vmul.f32 %v747_v56, %v478_v6  ;;  %vm483_vm14 = vmor %vm481_vm13, %vm482_vm10  ;;  %752 = vrcp.f32 %v400_v13 }
 0x1ca   :  { %v523_v3 = vmul.f32 %v444_v61, %v856_v36  ;;  %v459_v8 = vsel %vm920_vm6, %v458_v57, %v454_v4  ;;  %v465_v10 = vadd.f32 %v745_v49, %v464_v5  ;;  %v751_v14 = vpop.eup %750  ;;  %v473_v36 = vor.u32 1.1754944e-38, %v472_v0 }
 0x1cb   :  { %v524_v12 = vmul.f32 %v459_v8, %v858_v37  ;;  %v480_v21 = vadd.f32 %v747_v56, %v479_v11  ;;  %v492_v22 = vmul.f32 %v751_v14, %v915_v51  ;;  %v488_v37 = vor.u32 1.1754944e-38, %v487_v1 }
 0x1cc   :  { %v469_v17 = vsel %vm468_vm11, %v745_v49, %v465_v10  ;;  %vm497_vm0 = vweird.f32 %v751_v14  ;;  %v502_v31 = vand.u32 2147483648, %v915_v51  ;;  %vm496_vm1 = vweird.f32 %v915_v51 }
 0x1cd   :  { %v530_v15 = vpack.c.bf16 %v524_v12, %v523_v3  ;;  %v474_v16 = vsel %vm471_vm12, %v473_v36, %v469_v17  ;;  %v484_v23 = vsel %vm483_vm14, %v747_v56, %v480_v21  ;;  %v493_v24 = vsub.f32 1.0, %v492_v22  ;;  %vm498_vm2 = vmor %vm496_vm1, %vm497_vm0 }
 0x1ce   :  { %v525_v19 = vmul.f32 %v474_v16, %v860_v40  ;;  %v489_v20 = vsel %vm486_vm15, %v488_v37, %v484_v23  ;;  %v500_v40 = vand.u32 2147483647, %v915_v51  ;;  %v517_v35 = vand.u32 2147483648, %v400_v13 }
 0x1cf   :  { %534 = vst [vmem:[%s970_s5 + $0x8] sm:$0xff] %v530_v15  ;;  %v526_v18 = vmul.f32 %v489_v20, %v862_v41  ;;  %v494_v25 = vmul.f32 %v751_v14, %v493_v24  ;;  %v753_v30 = vpop.eup %752  ;;  %v503_v41 = vor.u32 1.1754944e-38, %v502_v31  ;;  %v515_v39 = vand.u32 2147483647, %v400_v13 }
 0x1d0   :  { %v507_v32 = vmul.f32 %v753_v30, %v400_v13  ;;  %vm501_vm3 = vcmp.eq.f32.partialorder %v500_v40, 8.507059e+37  ;;  %vm512_vm4 = vweird.f32 %v753_v30  ;;  %vm511_vm5 = vweird.f32 %v400_v13 }
 0x1d1   :  { %v531_v28 = vpack.c.bf16 %v526_v18, %v525_v19  ;;  %v495_v29 = vadd.f32 %v751_v14, %v494_v25  ;;  %vm513_vm6 = vmor %vm511_vm5, %vm512_vm4  ;;  %v518_v44 = vor.u32 1.1754944e-38, %v517_v35  ;;  %vm516_vm7 = vcmp.eq.f32.partialorder %v515_v39, 8.507059e+37 }
 0x1d2   :  { %v508_v34 = vsub.f32 1.0, %v507_v32 }
 0x1d3   :  { %535 = vst [vmem:[%s970_s5 + $0x10] sm:$0x11] %v531_v28  ;;  %v499_v33 = vsel %vm498_vm2, %v751_v14, %v495_v29 }
 0x1d4   :  { %v509_v38 = vmul.f32 %v753_v30, %v508_v34  ;;  %v504_v42 = vsel %vm501_vm3, %v503_v41, %v499_v33 }
 0x1d5   :  { %v527_v45 = vmul.f32 %v504_v42, %v868_v55 }
 0x1d6   :  { %v510_v43 = vadd.f32 %v753_v30, %v509_v38 }
 0x1d8   :  { %v514_v46 = vsel %vm513_vm6, %v753_v30, %v510_v43 }
 0x1d9   :  { %v519_v47 = vsel %vm516_vm7, %v518_v44, %v514_v46 }
 0x1da   :  { %v528_v48 = vmul.f32 %v519_v47, %v875_v2 }
 0x1dc   :  { %v532_v49 = vpack.c.bf16 %v528_v48, %v527_v45 }
 0x1de   :  { %536 = vst [vmem:[%s970_s5 + $0x18] sm:$0x11] %v532_v49 }
 0x1df   :  { %541 = vsyncpa [#allocation3], 1 }

// kernel: clip_inference.36
= control target key start
LH: loop header
LB: loop body
LE: loop exit
PB: predicated region body
PF: predicated region fallthrough
CT: control target
= control target key end

     0   :  { %9 = vsyncpa [#allocation3], 0  ;;  %s598_s18 = smov [#allocation2]   ;;  %s599_s20 = smov 64   ;;  %s668_s0 = inlined_call_operand.vmem [shape: bf16[10,512], index: 0, kind: input, shape index: {}]   ;;  %s669_s1 = inlined_call_operand.hbm [shape: bf16[512,128], index: 1, kind: input, shape index: {}]   ;;  %s670_s2 = inlined_call_operand.vmem [shape: f32[1,128], index: 2, kind: input, shape index: {}]   ;;  %s671_s3 = inlined_call_operand.vmem [shape: bf16[10,128], index: 3, kind: input, shape index: {}]   ;;  %s672_s4 = inlined_call_operand.vmem [shape: bf16[10,128], index: 4, kind: output, shape index: {}]  }
   0x1   :  { %s16_s17 = sshll.u32 %s669_s1, 4  ;;  %s18_s19 = sshll.u32 %s598_s18, 4  ;;  %s17_s17 = int_to_ptr.hbm [resolvable:$true] %s16_s17  ;;  %s19_s19 = int_to_ptr.vmem [resolvable:$true] %s18_s19 }
   0x2   :  { %s600_s21 = smov 4  }
   0x3   :  { %24 = dma.hbm_to_vmem [thread:$0]  %s17_s17, 4096, %s19_s19, [#allocation3], %s599_s20, %s599_s20, %s600_s21  }
   0x4   :  { %596 = dma.done.wait [#allocation3], 4096  }
   0x5   :  { %597 = vsyncadd [#allocation3], 4294963200  ;;  %v543_v0 = vld [vmem:[#allocation2 + $0x38] sm:$0xff]  ;;  %v542_v4 = vld [vmem:[#allocation2 + $0x30] sm:$0xff] }
   0x6   :  { %v551_v1 = vld [vmem:[#allocation2 + $0x78] sm:$0xff]  ;;  %317 = vmatpush.bf16.msra.mxu0 %v543_v0  ;;  %v550_v5 = vld [vmem:[#allocation2 + $0x70] sm:$0xff]  ;;  %v541_v8 = vld [vmem:[#allocation2 + $0x28] sm:$0xff] }
   0x7   :  { %v559_v2 = vld [vmem:[#allocation2 + $0xb8] sm:$0xff]  ;;  %331 = vmatpush.bf16.msra.mxu1 %v551_v1  ;;  %v558_v6 = vld [vmem:[#allocation2 + $0xb0] sm:$0xff]  ;;  %v549_v9 = vld [vmem:[#allocation2 + $0x68] sm:$0xff] }
   0x8   :  { %v567_v3 = vld [vmem:[#allocation2 + $0xf8] sm:$0xff]  ;;  %345 = vmatpush.bf16.msra.mxu2 %v559_v2  ;;  %v566_v7 = vld [vmem:[#allocation2 + $0xf0] sm:$0xff]  ;;  %v557_v10 = vld [vmem:[#allocation2 + $0xa8] sm:$0xff] }
   0x9   :  { %359 = vmatpush.bf16.msra.mxu3 %v567_v3  ;;  %v565_v11 = vld [vmem:[#allocation2 + $0xe8] sm:$0xff]  ;;  %v540_v12 = vld [vmem:[#allocation2 + $0x20] sm:$0xff]  ;;  %v539_v16 = vld [vmem:[#allocation2 + $0x18] sm:$0xff] }
   0xa   :  { %318 = vmatpush.bf16.msra.mxu0 %v542_v4  ;;  %v548_v13 = vld [vmem:[#allocation2 + $0x60] sm:$0xff]  ;;  %v547_v17 = vld [vmem:[#allocation2 + $0x58] sm:$0xff]  ;;  %v538_v20 = vld [vmem:[#allocation2 + $0x10] sm:$0xff] }
   0xb   :  { %332 = vmatpush.bf16.msra.mxu1 %v550_v5  ;;  %v556_v14 = vld [vmem:[#allocation2 + $0xa0] sm:$0xff]  ;;  %v555_v18 = vld [vmem:[#allocation2 + $0x98] sm:$0xff]  ;;  %v546_v21 = vld [vmem:[#allocation2 + $0x50] sm:$0xff] }
   0xc   :  { %346 = vmatpush.bf16.msra.mxu2 %v558_v6  ;;  %v564_v15 = vld [vmem:[#allocation2 + $0xe0] sm:$0xff]  ;;  %v563_v19 = vld [vmem:[#allocation2 + $0xd8] sm:$0xff]  ;;  %v554_v22 = vld [vmem:[#allocation2 + $0x90] sm:$0xff] }
   0xd   :  { %360 = vmatpush.bf16.msra.mxu3 %v566_v7  ;;  %v562_v23 = vld [vmem:[#allocation2 + $0xd0] sm:$0xff]  ;;  %v537_v24 = vld [vmem:[#allocation2 + $0x8] sm:$0xff]  ;;  %v536_v28 = vld [vmem:[#allocation2] sm:$0xff] }
   0xe   :  { %319 = vmatpush.bf16.msra.mxu0 %v541_v8  ;;  %v545_v25 = vld [vmem:[#allocation2 + $0x48] sm:$0xff]  ;;  %v544_v29 = vld [vmem:[#allocation2 + $0x40] sm:$0xff]  ;;  %v534_v33 = vld [vmem:[%s668_s0 + $0xc] sm:$0x10] }
   0xf   :  { %333 = vmatpush.bf16.msra.mxu1 %v549_v9  ;;  %v553_v26 = vld [vmem:[#allocation2 + $0x88] sm:$0xff]  ;;  %v552_v30 = vld [vmem:[#allocation2 + $0x80] sm:$0xff]  ;;  %v392_v35 = vld [vmem:[%s668_s0 + $0x10] sm:$0x10] }
  0x10   :  { %347 = vmatpush.bf16.msra.mxu2 %v557_v10  ;;  %v561_v27 = vld [vmem:[#allocation2 + $0xc8] sm:$0xff]  ;;  %v560_v31 = vld [vmem:[#allocation2 + $0xc0] sm:$0xff]  ;;  %v535_v37 = vld [vmem:[%s668_s0 + $0x14] sm:$0x10] }
  0x11   :  { %361 = vmatpush.bf16.msra.mxu3 %v565_v11  ;;  %v390_v32 = vld [vmem:[%s668_s0] sm:$0xf]  ;;  %v532_v34 = vld [vmem:[%s668_s0 + $0x4] sm:$0xf]  ;;  %v398_v36 = vld [vmem:[%s668_s0 + $0x8] sm:$0xf] }
  0x12   :  { %320 = vmatpush.bf16.msra.mxu0 %v540_v12  ;;  %v533_v38 = vld [vmem:[%s668_s0 + $0xc] sm:$0xf]  ;;  %v400_v39 = vld [vmem:[%s668_s0 + $0x18] sm:$0x10]  ;;  %v391_v40 = vor.u32 %v534_v33, %v390_v32  ;;  %v395_v41 = vor.u32 %v532_v34, %v392_v35  ;;  %v399_v42 = vor.u32 %v535_v37, %v398_v36  ;;  %v571_v44 = vld [vmem:[%s670_s2] ss:$0 sm:$0xff] }
  0x13   :  { %334 = vmatpush.bf16.msra.mxu1 %v548_v13  ;;  %v403_v43 = vor.u32 %v533_v38, %v400_v39  ;;  %v373_v49 = vld [vmem:[%s671_s3] sm:$0xf]  ;;  %v374_v59 = vld [vmem:[%s671_s3 + $0x4] sm:$0x1] }
  0x14   :  { %348 = vmatpush.bf16.msra.mxu2 %v556_v14  ;;  %v375_v53 = vunpack.c.l.bf16 %v373_v49  ;;  %v376_v0 = vunpack.c.l.bf16 %v374_v59 }
  0x15   :  { %362 = vmatpush.bf16.msra.mxu3 %v564_v15 }
  0x16   :  { %321 = vmatpush.bf16.msra.mxu0 %v539_v16 }
  0x17   :  { %335 = vmatpush.bf16.msra.mxu1 %v547_v17 }
  0x18   :  { %349 = vmatpush.bf16.msra.mxu2 %v555_v18 }
  0x19   :  { %363 = vmatpush.bf16.msra.mxu3 %v563_v19 }
  0x1a   :  { %322 = vmatpush.bf16.msra.mxu0 %v538_v20 }
  0x1b   :  { %336 = vmatpush.bf16.msra.mxu1 %v546_v21 }
  0x1c   :  { %350 = vmatpush.bf16.msra.mxu2 %v554_v22 }
  0x1d   :  { %364 = vmatpush.bf16.msra.mxu3 %v562_v23 }
  0x1e   :  { %323 = vmatpush.bf16.msra.mxu0 %v537_v24 }
  0x1f   :  { %337 = vmatpush.bf16.msra.mxu1 %v545_v25 }
  0x20   :  { %351 = vmatpush.bf16.msra.mxu2 %v553_v26 }
  0x21   :  { %365 = vmatpush.bf16.msra.mxu3 %v561_v27 }
  0x22   :  { %324 = vmatpush.bf16.msra.mxu0 %v536_v28 }
  0x23   :  { %338 = vmatpush.bf16.msra.mxu1 %v544_v29 }
  0x24   :  { %352 = vmatpush.bf16.msra.mxu2 %v552_v30 }
  0x25   :  { %366 = vmatpush.bf16.msra.mxu3 %v560_v31  ;;  %325 = vmatmul.bf16.vlgmr.msra.gmra.mxu0 %v391_v40 }
  0x26   :  { %339 = vmatmul.bf16.vlgmr.msra.gmra.mxu1 %v395_v41 }
  0x27   :  { %353 = vmatmul.bf16.vlgmr.msra.gmra.mxu2 %v399_v42 }
  0x28   :  { %367 = vmatmul.bf16.vlgmr.msra.gmra.mxu3 %v403_v43 }
  0xa2   :  { %v326_v45 = vpop.f32.mrf.mxu0 }
  0xa3   :  { %v327_v46 = vadd.f32 %v571_v44, %v326_v45  ;;  %v340_v47 = vpop.f32.mrf.mxu1 }
  0xa5   :  { %v341_v48 = vadd.f32 %v340_v47, %v327_v46 }
  0xaa   :  { %v354_v50 = vpop.f32.mrf.mxu2  ;;  %v328_v54 = vpop.f32.mrf.mxu0 }
  0xab   :  { %v368_v51 = vpop.f32.mrf.mxu3  ;;  %v355_v52 = vadd.f32 %v354_v50, %v341_v48  ;;  %v329_v56 = vadd.f32 %v571_v44, %v328_v54  ;;  %v342_v58 = vpop.f32.mrf.mxu1 }
  0xad   :  { %v369_v55 = vadd.f32 %v368_v51, %v355_v52  ;;  %v343_v61 = vadd.f32 %v342_v58, %v329_v56 }
  0xaf   :  { %v377_v57 = vadd.f32 %v375_v53, %v369_v55 }
  0xb1   :  { %v379_v60 = vpack.c.bf16 %v377_v57, %v377_v57 }
  0xb2   :  { %v356_v62 = vpop.f32.mrf.mxu2 }
  0xb3   :  { %381 = vst [vmem:[%s672_s4] sm:$0xf] %v379_v60  ;;  %v357_v63 = vadd.f32 %v356_v62, %v343_v61  ;;  %v370_v1 = vpop.f32.mrf.mxu3 }
  0xb5   :  { %v371_v2 = vadd.f32 %v370_v1, %v357_v63 }
  0xb7   :  { %v378_v3 = vadd.f32 %v376_v0, %v371_v2 }
  0xb9   :  { %v380_v4 = vpack.c.bf16 %v378_v3, %v378_v3 }
  0xbb   :  { %382 = vst [vmem:[%s672_s4 + $0x4] sm:$0x1] %v380_v4 }
  0xbc   :  { %387 = vsyncpa [#allocation3], 1 }

// kernel: clip_inference.37
= control target key start
LH: loop header
LB: loop body
LE: loop exit
PB: predicated region body
PF: predicated region fallthrough
CT: control target
= control target key end

     0   :  { %vm22_vm0 = vcmask 1041408   ;;  %v199_v3 = vmov 128.0   ;;  %vm145_vm5 = vcmask 253952   ;;  %s271_s0 = inlined_call_operand.vmem [shape: bf16[2,128], index: 0, kind: input, shape index: {}]   ;;  %s272_s3 = inlined_call_operand.vmem [shape: bf16[128,32], index: 3, kind: input, shape index: {}]   ;;  %s273_s1 = inlined_call_operand.vmem [shape: f32[1,128], index: 1, kind: input, shape index: {}]   ;;  %s274_s2 = inlined_call_operand.vmem [shape: f32[1,128], index: 2, kind: input, shape index: {}]   ;;  %s275_s4 = inlined_call_operand.vmem [shape: f32[1,32], index: 4, kind: input, shape index: {}]   ;;  %s276_s5 = inlined_call_operand.vmem [shape: bf16[2,32], index: 5, kind: output, shape index: {}]  }
   0x1   :  { %v20_v0 = vld [vmem:[%s271_s0] sm:$0x1]  ;;  %195 = vrcp.f32 %v199_v3  ;;  %v190_v4 = vld [vmem:[%s272_s3 + $0x38] sm:$0xff]  ;;  %v189_v16 = vld [vmem:[%s272_s3 + $0x30] sm:$0xff] }
   0x2   :  { %v21_v1 = vunpack.c.l.bf16 %v20_v0  ;;  %131 = vmatpush.bf16.msra.mxu0 %v190_v4  ;;  %v188_v17 = vld [vmem:[%s272_s3 + $0x28] sm:$0xff]  ;;  %v187_v18 = vld [vmem:[%s272_s3 + $0x20] sm:$0xff]  ;;  %v186_v19 = vld [vmem:[%s272_s3 + $0x18] sm:$0xff] }
   0x3   :  { %v185_v20 = vld [vmem:[%s272_s3 + $0x10] sm:$0xff]  ;;  %v184_v21 = vld [vmem:[%s272_s3 + $0x8] sm:$0xff]  ;;  %v183_v22 = vld [vmem:[%s272_s3] sm:$0xff] }
   0x4   :  { %v23_v2 = vsel %vm22_vm0, %v21_v1, 0.0  ;;  %v192_v32 = vld [vmem:[%s273_s1] ss:$0 sm:$0xff] }
   0x5   :  { %24 = vadd.xlane.f32.xlu0 %v23_v2  ;;  %v193_v35 = vld [vmem:[%s274_s2] ss:$0 sm:$0xff] }
   0x6   :  { %132 = vmatpush.bf16.msra.mxu0 %v189_v16  ;;  %v194_v39 = vld [vmem:[%s275_s4] ss:$0 sm:$0xff] }
   0x7   :  { %v196_v5 = vpop.eup %195 }
   0x8   :  { %v27_v6 = vmul.f32 128.0, %v196_v5  ;;  %vm31_vm1 = vweird.f32 %v196_v5 }
   0xa   :  { %v28_v7 = vsub.f32 1.0, %v27_v6  ;;  %133 = vmatpush.bf16.msra.mxu0 %v188_v17 }
   0xc   :  { %v29_v8 = vmul.f32 %v196_v5, %v28_v7 }
   0xe   :  { %v30_v9 = vadd.f32 %v196_v5, %v29_v8  ;;  %134 = vmatpush.bf16.msra.mxu0 %v187_v18 }
  0x10   :  { %v32_v10 = vsel %vm31_vm1, %v196_v5, %v30_v9 }
  0x12   :  { %135 = vmatpush.bf16.msra.mxu0 %v186_v19 }
  0x16   :  { %136 = vmatpush.bf16.msra.mxu0 %v185_v20 }
  0x1a   :  { %137 = vmatpush.bf16.msra.mxu0 %v184_v21 }
  0x1e   :  { %138 = vmatpush.bf16.msra.mxu0 %v183_v22 }
  0x78   :  { %v25_v11 = vpop.xlane.xlu0 %24 }
  0x79   :  { %v33_v12 = vmul.f32 %v32_v10, %v25_v11 }
  0x7b   :  { %v34_v13 = vsub.f32 %v21_v1, %v33_v12 }
  0x7d   :  { %v35_v14 = vmul.f32 %v34_v13, %v34_v13 }
  0x7f   :  { %v36_v15 = vsel %vm22_vm0, %v35_v14, 0.0 }
  0x80   :  { %37 = vadd.xlane.f32.xlu0 %v36_v15 }
  0xf3   :  { %v38_v23 = vpop.xlane.xlu0 %37 }
  0xf4   :  { %v39_v24 = vmul.f32 %v38_v23, %v32_v10 }
  0xf6   :  { %v40_v25 = vadd.f32 1e-05, %v39_v24 }
  0xf8   :  { %197 = vrsqrt.f32 %v40_v25  ;;  %vm47_vm3 = vweird.f32 %v40_v25 }
  0xfe   :  { %v198_v26 = vpop.eup %197 }
  0xff   :  { %v42_v27 = vmul.f32 %v198_v26, %v40_v25  ;;  %vm48_vm2 = vweird.f32 %v198_v26 }
 0x100   :  { %vm49_vm4 = vmor %vm47_vm3, %vm48_vm2 }
 0x101   :  { %v43_v28 = vmul.f32 %v198_v26, %v42_v27 }
 0x103   :  { %v44_v29 = vmul.f32 0.5, %v43_v28 }
 0x105   :  { %v45_v30 = vsub.f32 1.5, %v44_v29 }
 0x107   :  { %v46_v31 = vmul.f32 %v198_v26, %v45_v30 }
 0x109   :  { %v50_v33 = vsel %vm49_vm4, %v198_v26, %v46_v31 }
 0x10a   :  { %v51_v34 = vmul.f32 %v50_v33, %v34_v13 }
 0x10c   :  { %v56_v36 = vmul.f32 %v192_v32, %v51_v34 }
 0x10e   :  { %v61_v37 = vadd.f32 %v193_v35, %v56_v36 }
 0x110   :  { %v62_v38 = vpack.c.bf16 %v61_v37, %v61_v37 }
 0x112   :  { %139 = vmatmul.bf16.vlgmr.msra.gmra.mxu0 %v62_v38 }
 0x18f   :  { %v140_v40 = vpop.f32.mrf.mxu0 }
 0x190   :  { %v141_v41 = vadd.f32 %v194_v39, %v140_v40 }
 0x192   :  { %v144_v42 = vpack.c.bf16 %v141_v41, %v141_v41 }
 0x194   :  { %146 = vst.msk [vmem:[%s276_s5] sm:$0x1] %vm145_vm5, %v144_v42 }
 0x197   :  { %v142_v43 = vpop.f32.mrf.mxu0 }

// kernel: clip_inference.40
= control target key start
LH: loop header
LB: loop body
LE: loop exit
PB: predicated region body
PF: predicated region fallthrough
CT: control target
= control target key end

     0   :  { %vm66_vm0 = vcmask 261120   ;;  %vm140_vm1 = vcmask 257024   ;;  %s303_s1 = inlined_call_operand.vmem [shape: bf16[32,32], index: 1, kind: input, shape index: {}]   ;;  %s304_s2 = inlined_call_operand.vmem [shape: f32[1,32], index: 2, kind: input, shape index: {}]   ;;  %s305_s0 = inlined_call_operand.vmem [shape: bf16[64,32], index: 0, kind: input, shape index: {}]   ;;  %s306_s3 = inlined_call_operand.vmem [shape: bf16[64,32], index: 3, kind: input, shape index: {}]   ;;  %s307_s4 = inlined_call_operand.vmem [shape: bf16[64,32], index: 4, kind: output, shape index: {}]  }
   0x1   :  { %v186_v0 = vld [vmem:[%s303_s1 + $0x8] sm:$0xff]  ;;  %v185_v1 = vld [vmem:[%s303_s1] sm:$0xff]  ;;  %v183_v4 = vld [vmem:[%s305_s0 + $0x10] sm:$0xff] }
   0x2   :  { %85 = vmatpush.bf16.msra.mxu0 %v186_v0  ;;  %206 = vmatpush.bf16.msra.mxu1 %v186_v0  ;;  %v181_v2 = vld [vmem:[%s305_s0] sm:$0xff]  ;;  %v182_v3 = vld [vmem:[%s305_s0 + $0x8] sm:$0xff]  ;;  %v184_v5 = vld [vmem:[%s305_s0 + $0x18] sm:$0xff] }
   0x3   :  { %207 = vmatpush.bf16.msra.mxu2 %v186_v0  ;;  %208 = vmatpush.bf16.msra.mxu3 %v186_v0  ;;  %v188_v6 = vld [vmem:[%s306_s3] sm:$0xff]   ;;  %v203_v7 = vld [vmem:[%s306_s3 + $0x8] sm:$0xff]   ;;  %v204_v17 = vld [vmem:[%s306_s3 + $0x10] sm:$0xff]  }
   0x4   :  { %v212_v8 = vld [vmem:[%s304_s2] ss:$0 sm:$0xff]  ;;  %v189_v9 = vunpack.c.l.bf16 %v188_v6  ;;  %v193_v10 = vunpack.c.l.bf16 %v203_v7  ;;  %v205_v18 = vld [vmem:[%s306_s3 + $0x18] sm:$0xff]   ;;  %v197_v21 = vunpack.c.l.bf16 %v204_v17  ;;  %v190_v25 = vunpack.c.h.bf16 %v188_v6 }
   0x5   :  { %v201_v22 = vunpack.c.l.bf16 %v205_v18  ;;  %v194_v26 = vunpack.c.h.bf16 %v203_v7  ;;  %v198_v41 = vunpack.c.h.bf16 %v204_v17  ;;  %v202_v42 = vunpack.c.h.bf16 %v205_v18 }
   0x6   :  { %86 = vmatpush.bf16.msra.mxu0 %v185_v1  ;;  %209 = vmatpush.bf16.msra.mxu1 %v185_v1 }
   0x7   :  { %210 = vmatpush.bf16.msra.mxu2 %v185_v1  ;;  %211 = vmatpush.bf16.msra.mxu3 %v185_v1 }
   0x9   :  { %177 = vmatmul.msk.bf16.vlgmr.msra.gmra.mxu0 %vm66_vm0, %v181_v2  ;;  %178 = vmatmul.msk.bf16.vlgmr.msra.gmra.mxu1 %vm66_vm0, %v182_v3 }
   0xa   :  { %179 = vmatmul.msk.bf16.vlgmr.msra.gmra.mxu2 %vm66_vm0, %v183_v4  ;;  %180 = vmatmul.msk.bf16.vlgmr.msra.gmra.mxu3 %vm66_vm0, %v184_v5 }
  0x86   :  { %v88_v11 = vpop.f32.mrf.mxu0  ;;  %v93_v12 = vpop.f32.mrf.mxu1 }
  0x87   :  { %v89_v13 = vadd.f32 %v212_v8, %v88_v11  ;;  %v94_v14 = vadd.f32 %v212_v8, %v93_v12 }
  0x89   :  { %v124_v15 = vadd.f32 %v189_v9, %v89_v13  ;;  %v126_v16 = vadd.f32 %v193_v10, %v94_v14 }
  0x8b   :  { %v132_v19 = vpack.c.bf16 %v124_v15, %v124_v15  ;;  %v134_v20 = vpack.c.bf16 %v126_v16, %v126_v16 }
  0x8d   :  { %141 = vst.msk [vmem:[%s307_s4] sm:$0xf] %vm140_vm1, %v132_v19  ;;  %v98_v23 = vpop.f32.mrf.mxu2  ;;  %v103_v24 = vpop.f32.mrf.mxu3 }
  0x8e   :  { %143 = vst.msk [vmem:[%s307_s4 + $0x8] sm:$0xf] %vm140_vm1, %v134_v20  ;;  %v99_v27 = vadd.f32 %v212_v8, %v98_v23  ;;  %v104_v28 = vadd.f32 %v212_v8, %v103_v24  ;;  %v90_v29 = vpop.f32.mrf.mxu0  ;;  %v95_v30 = vpop.f32.mrf.mxu1 }
  0x8f   :  { %v91_v31 = vadd.f32 %v212_v8, %v90_v29  ;;  %v96_v32 = vadd.f32 %v212_v8, %v95_v30 }
  0x90   :  { %v128_v33 = vadd.f32 %v197_v21, %v99_v27  ;;  %v130_v34 = vadd.f32 %v201_v22, %v104_v28 }
  0x91   :  { %v125_v35 = vadd.f32 %v190_v25, %v91_v31  ;;  %v127_v36 = vadd.f32 %v194_v26, %v96_v32 }
  0x92   :  { %v136_v37 = vpack.c.bf16 %v128_v33, %v128_v33  ;;  %v138_v38 = vpack.c.bf16 %v130_v34, %v130_v34 }
  0x93   :  { %v133_v39 = vpack.c.bf16 %v125_v35, %v125_v35  ;;  %v135_v40 = vpack.c.bf16 %v127_v36, %v127_v36 }
  0x94   :  { %145 = vst.msk [vmem:[%s307_s4 + $0x10] sm:$0xf] %vm140_vm1, %v136_v37 }
  0x95   :  { %147 = vst.msk [vmem:[%s307_s4 + $0x18] sm:$0xf] %vm140_vm1, %v138_v38  ;;  %v100_v43 = vpop.f32.mrf.mxu2  ;;  %v105_v44 = vpop.f32.mrf.mxu3 }
  0x96   :  { %142 = vst.msk [vmem:[%s307_s4 + $0x4] sm:$0xf] %vm140_vm1, %v133_v39  ;;  %v101_v45 = vadd.f32 %v212_v8, %v100_v43  ;;  %v106_v46 = vadd.f32 %v212_v8, %v105_v44 }
  0x97   :  { %144 = vst.msk [vmem:[%s307_s4 + $0xc] sm:$0xf] %vm140_vm1, %v135_v40 }
  0x98   :  { %v129_v47 = vadd.f32 %v198_v41, %v101_v45  ;;  %v131_v48 = vadd.f32 %v202_v42, %v106_v46 }
  0x9a   :  { %v137_v49 = vpack.c.bf16 %v129_v47, %v129_v47  ;;  %v139_v50 = vpack.c.bf16 %v131_v48, %v131_v48 }
  0x9c   :  { %146 = vst.msk [vmem:[%s307_s4 + $0x14] sm:$0xf] %vm140_vm1, %v137_v49 }
  0x9d   :  { %148 = vst.msk [vmem:[%s307_s4 + $0x1c] sm:$0xf] %vm140_vm1, %v139_v50 }

// kernel: clip_inference.38
= control target key start
LH: loop header
LB: loop body
LE: loop exit
PB: predicated region body
PF: predicated region fallthrough
CT: control target
= control target key end

     0   :  { %vm37_vm0 = vcmask 261120   ;;  %v392_v20 = vmov 32.0   ;;  %s620_s0 = inlined_call_operand.vmem [shape: bf16[64,32], index: 0, kind: input, shape index: {}]   ;;  %s621_s1 = inlined_call_operand.vmem [shape: f32[1,32], index: 1, kind: input, shape index: {}]   ;;  %s622_s2 = inlined_call_operand.vmem [shape: f32[1,32], index: 2, kind: input, shape index: {}]   ;;  %s623_s4 = inlined_call_operand.vmem [shape: f32[1,96], index: 4, kind: input, shape index: {}]   ;;  %s624_s3 = inlined_call_operand.vmem [shape: bf16[32,96], index: 3, kind: input, shape index: {}]   ;;  %s625_s5 = inlined_call_operand.vmem [shape: bf16[64,96], index: 5, kind: output, shape index: {}]  }
   0x1   :  { %v363_v0 = vld [vmem:[%s620_s0 + $0x18] sm:$0xff]   ;;  %v362_v1 = vld [vmem:[%s620_s0 + $0x10] sm:$0xff]   ;;  %v346_v2 = vld [vmem:[%s620_s0] sm:$0xff]   ;;  %374 = vrcp.f32 %v392_v20 }
   0x2   :  { %v359_v3 = vunpack.c.l.bf16 %v363_v0  ;;  %v355_v4 = vunpack.c.l.bf16 %v362_v1  ;;  %v347_v5 = vunpack.c.l.bf16 %v346_v2  ;;  %v360_v9 = vunpack.c.h.bf16 %v363_v0  ;;  %v361_v15 = vld [vmem:[%s620_s0 + $0x8] sm:$0xff]  }
   0x3   :  { %v356_v10 = vunpack.c.h.bf16 %v362_v1  ;;  %v348_v11 = vunpack.c.h.bf16 %v346_v2  ;;  %v351_v16 = vunpack.c.l.bf16 %v361_v15  ;;  %v352_v17 = vunpack.c.h.bf16 %v361_v15 }
   0x4   :  { %v56_v6 = vsel %vm37_vm0, %v359_v3, 0.0  ;;  %v50_v7 = vsel %vm37_vm0, %v355_v4, 0.0  ;;  %v38_v8 = vsel %vm37_vm0, %v347_v5, 0.0  ;;  %v59_v12 = vsel %vm37_vm0, %v360_v9, 0.0 }
   0x5   :  { %57 = vadd.xlane.f32.xlu1 %v56_v6  ;;  %51 = vadd.xlane.f32.xlu0 %v50_v7  ;;  %v53_v13 = vsel %vm37_vm0, %v356_v10, 0.0  ;;  %v41_v14 = vsel %vm37_vm0, %v348_v11, 0.0  ;;  %v44_v18 = vsel %vm37_vm0, %v351_v16, 0.0  ;;  %v47_v19 = vsel %vm37_vm0, %v352_v17, 0.0  ;;  %v344_v7 = vld [vmem:[%s624_s3 + $0x8] sm:$0xff] }
   0x6   :  { %39 = vadd.xlane.f32.xlu2 %v38_v8  ;;  %365 = vmatpush.bf16.msra.mxu2 %v344_v7 }
   0x7   :  { %v375_v21 = vpop.eup %374  ;;  %366 = vmatpush.bf16.msra.mxu3 %v344_v7  ;;  %287 = vmatpush.bf16.msra.mxu0 %v344_v7 }
   0x8   :  { %v63_v22 = vmul.f32 32.0, %v375_v21  ;;  %vm67_vm1 = vweird.f32 %v375_v21  ;;  %364 = vmatpush.bf16.msra.mxu1 %v344_v7 }
   0xa   :  { %v64_v23 = vsub.f32 1.0, %v63_v22 }
   0xc   :  { %v65_v24 = vmul.f32 %v375_v21, %v64_v23 }
   0xd   :  { %60 = vadd.xlane.f32.xlu1 %v59_v12  ;;  %54 = vadd.xlane.f32.xlu0 %v53_v13 }
   0xe   :  { %42 = vadd.xlane.f32.xlu2 %v41_v14  ;;  %v66_v25 = vadd.f32 %v375_v21, %v65_v24 }
  0x10   :  { %v443_v26 = vsel %vm67_vm1, %v375_v21, %v66_v25 }
  0x15   :  { %45 = vadd.xlane.f32.xlu0 %v44_v18  ;;  %48 = vadd.xlane.f32.xlu1 %v47_v19 }
  0x78   :  { %v58_v27 = vpop.xlane.xlu1 %57  ;;  %v52_v28 = vpop.xlane.xlu0 %51 }
  0x79   :  { %v75_v29 = vmul.f32 %v443_v26, %v58_v27  ;;  %v73_v30 = vmul.f32 %v443_v26, %v52_v28  ;;  %v40_v31 = vpop.xlane.xlu2 %39 }
  0x7a   :  { %v69_v40 = vmul.f32 %v443_v26, %v40_v31 }
  0x7b   :  { %v447_v32 = vsub.f32 %v359_v3, %v75_v29  ;;  %v449_v33 = vsub.f32 %v355_v4, %v73_v30 }
  0x7c   :  { %v467_v48 = vsub.f32 %v347_v5, %v69_v40 }
  0x7d   :  { %v91_v34 = vmul.f32 %v447_v32, %v447_v32  ;;  %v89_v35 = vmul.f32 %v449_v33, %v449_v33 }
  0x7e   :  { %v85_v59 = vmul.f32 %v467_v48, %v467_v48 }
  0x7f   :  { %v111_v36 = vsel %vm37_vm0, %v91_v34, 0.0  ;;  %v105_v37 = vsel %vm37_vm0, %v89_v35, 0.0 }
  0x80   :  { %v61_v38 = vpop.xlane.xlu1 %60  ;;  %v55_v39 = vpop.xlane.xlu0 %54  ;;  %112 = vadd.xlane.f32.xlu1 %v111_v36  ;;  %106 = vadd.xlane.f32.xlu2 %v105_v37  ;;  %v93_v63 = vsel %vm37_vm0, %v85_v59, 0.0 }
  0x81   :  { %v76_v41 = vmul.f32 %v443_v26, %v61_v38  ;;  %v74_v42 = vmul.f32 %v443_v26, %v55_v39  ;;  %v43_v43 = vpop.xlane.xlu2 %42 }
  0x82   :  { %v70_v44 = vmul.f32 %v443_v26, %v43_v43 }
  0x83   :  { %v461_v45 = vsub.f32 %v360_v9, %v76_v41  ;;  %v463_v46 = vsub.f32 %v356_v10, %v74_v42  ;;  %v343_v10 = vld [vmem:[%s624_s3] sm:$0xff] }
  0x84   :  { %v465_v47 = vsub.f32 %v348_v11, %v70_v44  ;;  %368 = vmatpush.bf16.msra.mxu2 %v343_v10  ;;  %369 = vmatpush.bf16.msra.mxu3 %v343_v10 }
  0x85   :  { %v90_v49 = vmul.f32 %v463_v46, %v463_v46  ;;  %v92_v50 = vmul.f32 %v461_v45, %v461_v45  ;;  %288 = vmatpush.bf16.msra.mxu0 %v343_v10  ;;  %367 = vmatpush.bf16.msra.mxu1 %v343_v10 }
  0x86   :  { %v86_v51 = vmul.f32 %v465_v47, %v465_v47 }
  0x87   :  { %v108_v52 = vsel %vm37_vm0, %v90_v49, 0.0  ;;  %v114_v53 = vsel %vm37_vm0, %v92_v50, 0.0 }
  0x88   :  { %109 = vadd.xlane.f32.xlu0 %v108_v52  ;;  %v46_v54 = vpop.xlane.xlu0 %45  ;;  %115 = vadd.xlane.f32.xlu2 %v114_v53  ;;  %v96_v55 = vsel %vm37_vm0, %v86_v51, 0.0  ;;  %v49_v56 = vpop.xlane.xlu1 %48 }
  0x89   :  { %v71_v57 = vmul.f32 %v443_v26, %v46_v54  ;;  %97 = vadd.xlane.f32.xlu1 %v96_v55  ;;  %v72_v58 = vmul.f32 %v443_v26, %v49_v56 }
  0x8b   :  { %v482_v60 = vsub.f32 %v351_v16, %v71_v57  ;;  %v484_v61 = vsub.f32 %v352_v17, %v72_v58 }
  0x8d   :  { %v87_v62 = vmul.f32 %v482_v60, %v482_v60  ;;  %v88_v1 = vmul.f32 %v484_v61, %v484_v61 }
  0x8f   :  { %v99_v0 = vsel %vm37_vm0, %v87_v62, 0.0  ;;  %v102_v2 = vsel %vm37_vm0, %v88_v1, 0.0 }
  0x90   :  { %100 = vadd.xlane.f32.xlu2 %v99_v0  ;;  %94 = vadd.xlane.f32.xlu0 %v93_v63 }
  0x98   :  { %103 = vadd.xlane.f32.xlu0 %v102_v2 }
  0xf3   :  { %v113_v3 = vpop.xlane.xlu1 %112  ;;  %v107_v4 = vpop.xlane.xlu2 %106 }
  0xf4   :  { %v123_v5 = vmul.f32 %v113_v3, %v443_v26  ;;  %v121_v6 = vmul.f32 %v107_v4, %v443_v26  ;;  %v540_v3 = vld [vmem:[%s621_s1] ss:$0 sm:$0xff] }
  0xf6   :  { %v131_v8 = vadd.f32 1e-05, %v123_v5  ;;  %v129_v9 = vadd.f32 1e-05, %v121_v6 }
  0xf8   :  { %376 = vrsqrt.f32 %v131_v8  ;;  %vm199_vm2 = vweird.f32 %v131_v8  ;;  %vm179_vm5 = vweird.f32 %v129_v9 }
  0xf9   :  { %378 = vrsqrt.f32 %v129_v9 }
  0xfb   :  { %v110_v11 = vpop.xlane.xlu0 %109  ;;  %v116_v12 = vpop.xlane.xlu2 %115 }
  0xfc   :  { %v122_v13 = vmul.f32 %v110_v11, %v443_v26  ;;  %v98_v14 = vpop.xlane.xlu1 %97  ;;  %v124_v15 = vmul.f32 %v116_v12, %v443_v26 }
  0xfd   :  { %v118_v16 = vmul.f32 %v98_v14, %v443_v26 }
  0xfe   :  { %v377_v17 = vpop.eup %376  ;;  %v130_v18 = vadd.f32 1e-05, %v122_v13  ;;  %v504_v19 = vadd.f32 1e-05, %v124_v15  ;;  %v372_v15 = vld [vmem:[%s622_s2] ss:$0 sm:$0xff] }
  0xff   :  { %v379_v20 = vpop.eup %378  ;;  %v194_v21 = vmul.f32 %v377_v17, %v131_v8  ;;  %v126_v22 = vadd.f32 1e-05, %v118_v16  ;;  %vm200_vm4 = vweird.f32 %v377_v17 }
 0x100   :  { %v174_v23 = vmul.f32 %v379_v20, %v129_v9  ;;  %380 = vrsqrt.f32 %v130_v18  ;;  %vm180_vm3 = vweird.f32 %v379_v20  ;;  %vm189_vm7 = vweird.f32 %v130_v18  ;;  %vm527_vm8 = vmor %vm199_vm2, %vm200_vm4 }
 0x101   :  { %v195_v24 = vmul.f32 %v377_v17, %v194_v21  ;;  %382 = vrsqrt.f32 %v126_v22  ;;  %vm517_vm6 = vmor %vm179_vm5, %vm180_vm3  ;;  %vm149_vm9 = vweird.f32 %v126_v22  ;;  %vm209_vm12 = vweird.f32 %v504_v19 }
 0x102   :  { %v175_v25 = vmul.f32 %v379_v20, %v174_v23  ;;  %384 = vrsqrt.f32 %v504_v19 }
 0x103   :  { %v196_v27 = vmul.f32 0.5, %v195_v24  ;;  %v95_v28 = vpop.xlane.xlu0 %94  ;;  %v101_v29 = vpop.xlane.xlu2 %100 }
 0x104   :  { %v176_v30 = vmul.f32 0.5, %v175_v25  ;;  %v117_v31 = vmul.f32 %v95_v28, %v443_v26  ;;  %v119_v34 = vmul.f32 %v101_v29, %v443_v26 }
 0x105   :  { %v197_v35 = vsub.f32 1.5, %v196_v27 }
 0x106   :  { %v381_v36 = vpop.eup %380  ;;  %v177_v37 = vsub.f32 1.5, %v176_v30  ;;  %v509_v38 = vadd.f32 1e-05, %v117_v31  ;;  %v513_v41 = vadd.f32 1e-05, %v119_v34 }
 0x107   :  { %v511_v39 = vpop.eup %382  ;;  %v184_v40 = vmul.f32 %v381_v36, %v130_v18  ;;  %v198_v43 = vmul.f32 %v377_v17, %v197_v35  ;;  %vm190_vm10 = vweird.f32 %v381_v36 }
 0x108   :  { %v385_v42 = vpop.eup %384  ;;  %v178_v44 = vmul.f32 %v379_v20, %v177_v37  ;;  %v144_v49 = vmul.f32 %v511_v39, %v126_v22  ;;  %386 = vrsqrt.f32 %v509_v38  ;;  %vm150_vm11 = vweird.f32 %v511_v39  ;;  %vm191_vm14 = vmor %vm189_vm7, %vm190_vm10 }
 0x109   :  { %v185_v51 = vmul.f32 %v381_v36, %v184_v40  ;;  %v204_v52 = vmul.f32 %v385_v42, %v504_v19  ;;  %388 = vrsqrt.f32 %v513_v41  ;;  %v202_v59 = vsel %vm527_vm8, %v377_v17, %v198_v43  ;;  %vm549_vm15 = vmor %vm149_vm9, %vm150_vm11 }
 0x10a   :  { %v182_v53 = vsel %vm517_vm6, %v379_v20, %v178_v44  ;;  %v145_v54 = vmul.f32 %v511_v39, %v144_v49  ;;  %vm210_vm13 = vweird.f32 %v385_v42  ;;  %v219_v7 = vmul.f32 %v202_v59, %v447_v32 }
 0x10b   :  { %v186_v56 = vmul.f32 0.5, %v185_v51  ;;  %v205_v57 = vmul.f32 %v385_v42, %v204_v52  ;;  %v104_v58 = vpop.xlane.xlu0 %103  ;;  %v217_v0 = vmul.f32 %v182_v53, %v449_v33  ;;  %vm211_vm1 = vmor %vm209_vm12, %vm210_vm13  ;;  %vm139_vm2 = vweird.f32 %v509_v38 }
 0x10c   :  { %v146_v62 = vmul.f32 0.5, %v145_v54  ;;  %v120_v63 = vmul.f32 %v104_v58, %v443_v26  ;;  %v231_v22 = vmul.f32 %v540_v3, %v219_v7  ;;  %vm159_vm4 = vweird.f32 %v513_v41 }
 0x10d   :  { %v187_v1 = vsub.f32 1.5, %v186_v56  ;;  %v206_v2 = vmul.f32 0.5, %v205_v57  ;;  %v229_v32 = vmul.f32 %v540_v3, %v217_v0  ;;  %vm318_vm11 = vcmask 781312  }
 0x10e   :  { %v387_v4 = vpop.eup %386  ;;  %v147_v5 = vsub.f32 1.5, %v146_v62  ;;  %v128_v6 = vadd.f32 1e-05, %v120_v63 }
 0x10f   :  { %v188_v26 = vmul.f32 %v381_v36, %v187_v1  ;;  %v207_v33 = vsub.f32 1.5, %v206_v2  ;;  %v134_v8 = vmul.f32 %v387_v4, %v509_v38  ;;  %v389_v11 = vpop.eup %388  ;;  %vm140_vm3 = vweird.f32 %v387_v4 }
 0x110   :  { %v148_v9 = vmul.f32 %v511_v39, %v147_v5  ;;  %390 = vrsqrt.f32 %v128_v6  ;;  %v154_v17 = vmul.f32 %v389_v11, %v513_v41  ;;  %v241_v19 = vadd.f32 %v372_v15, %v229_v32  ;;  %vm141_vm5 = vmor %vm139_vm2, %vm140_vm3 }
 0x111   :  { %v192_v12 = vsel %vm191_vm14, %v381_v36, %v188_v26  ;;  %v208_v13 = vmul.f32 %v385_v42, %v207_v33  ;;  %v135_v14 = vmul.f32 %v387_v4, %v134_v8  ;;  %vm160_vm6 = vweird.f32 %v389_v11 }
 0x112   :  { %v218_v16 = vmul.f32 %v192_v12, %v463_v46  ;;  %v152_v18 = vsel %vm549_vm15, %v511_v39, %v148_v9  ;;  %v155_v24 = vmul.f32 %v389_v11, %v154_v17  ;;  %vm161_vm7 = vmor %vm159_vm4, %vm160_vm6  ;;  %vm169_vm9 = vweird.f32 %v128_v6 }
 0x113   :  { %v212_v20 = vsel %vm211_vm1, %v385_v42, %v208_v13  ;;  %v136_v21 = vmul.f32 0.5, %v135_v14  ;;  %v214_v28 = vmul.f32 %v152_v18, %v465_v47 }
 0x114   :  { %v220_v23 = vmul.f32 %v212_v20, %v461_v45  ;;  %v230_v25 = vmul.f32 %v540_v3, %v218_v16  ;;  %v156_v29 = vmul.f32 0.5, %v155_v24  ;;  %v243_v45 = vadd.f32 %v372_v15, %v231_v22 }
 0x115   :  { %v137_v46 = vsub.f32 1.5, %v136_v21  ;;  %v226_v44 = vmul.f32 %v540_v3, %v214_v28 }
 0x116   :  { %v391_v27 = vpop.eup %390  ;;  %v242_v30 = vadd.f32 %v372_v15, %v230_v25  ;;  %v232_v31 = vmul.f32 %v540_v3, %v220_v23  ;;  %v157_v36 = vsub.f32 1.5, %v156_v29 }
 0x117   :  { %v138_v34 = vmul.f32 %v387_v4, %v137_v46  ;;  %v164_v35 = vmul.f32 %v391_v27, %v128_v6  ;;  %vm170_vm8 = vweird.f32 %v391_v27  ;;  %v238_v54 = vadd.f32 %v372_v15, %v226_v44 }
 0x118   :  { %v247_v37 = vpack.c.bf16 %v242_v30, %v241_v19  ;;  %v244_v39 = vadd.f32 %v372_v15, %v232_v31  ;;  %v158_v43 = vmul.f32 %v389_v11, %v157_v36  ;;  %vm171_vm10 = vmor %vm169_vm9, %vm170_vm8 }
 0x119   :  { %v142_v38 = vsel %vm141_vm5, %v387_v4, %v138_v34  ;;  %v165_v40 = vmul.f32 %v391_v27, %v164_v35 }
 0x11a   :  { %v213_v42 = vmul.f32 %v142_v38, %v467_v48  ;;  %341 = vmatmul.msk.bf16.vlgmr.msra.gmra.mxu2 %vm37_vm0, %v247_v37  ;;  %v248_v47 = vpack.c.bf16 %v244_v39, %v243_v45  ;;  %v162_v50 = vsel %vm161_vm7, %v389_v11, %v158_v43 }
 0x11b   :  { %v166_v49 = vmul.f32 0.5, %v165_v40  ;;  %v215_v53 = vmul.f32 %v162_v50, %v482_v60  ;;  %v373_v60 = vld [vmem:[%s623_s4] ss:$0 sm:$0xff] }
 0x11c   :  { %342 = vmatmul.msk.bf16.vlgmr.msra.gmra.mxu3 %vm37_vm0, %v248_v47  ;;  %v225_v51 = vmul.f32 %v540_v3, %v213_v42 }
 0x11d   :  { %v167_v52 = vsub.f32 1.5, %v166_v49  ;;  %v227_v58 = vmul.f32 %v540_v3, %v215_v53 }
 0x11e   :  { %v237_v48 = vadd.f32 %v372_v15, %v225_v51 }
 0x11f   :  { %v168_v55 = vmul.f32 %v391_v27, %v167_v52  ;;  %v239_v62 = vadd.f32 %v372_v15, %v227_v58 }
 0x120   :  { %v245_v56 = vpack.c.bf16 %v238_v54, %v237_v48 }
 0x121   :  { %v172_v57 = vsel %vm171_vm10, %v391_v27, %v168_v55 }
 0x122   :  { %v216_v41 = vmul.f32 %v172_v57, %v484_v61  ;;  %339 = vmatmul.msk.bf16.vlgmr.msra.gmra.mxu0 %vm37_vm0, %v245_v56 }
 0x124   :  { %v228_v59 = vmul.f32 %v540_v3, %v216_v41 }
 0x126   :  { %v240_v63 = vadd.f32 %v372_v15, %v228_v59 }
 0x128   :  { %v246_v0 = vpack.c.bf16 %v240_v63, %v239_v62 }
 0x12a   :  { %340 = vmatmul.msk.bf16.vlgmr.msra.gmra.mxu1 %vm37_vm0, %v246_v0 }
 0x19d   :  { %v300_v1 = vpop.f32.mrf.mxu2 }
 0x19e   :  { %v301_v2 = vadd.f32 %v373_v60, %v300_v1 }
 0x19f   :  { %v305_v4 = vpop.f32.mrf.mxu3  ;;  %v290_v61 = vpop.f32.mrf.mxu0 }
 0x1a0   :  { %v314_v5 = vpack.c.bf16 %v301_v2, %v301_v2  ;;  %v306_v6 = vadd.f32 %v373_v60, %v305_v4  ;;  %v291_v7 = vadd.f32 %v373_v60, %v290_v61 }
 0x1a2   :  { %323 = vst.msk [vmem:[%s625_s5 + $0x10] sm:$0xf] %vm318_vm11, %v314_v5  ;;  %v316_v3 = vpack.c.bf16 %v306_v6, %v306_v6  ;;  %v310_v26 = vpack.c.bf16 %v291_v7, %v291_v7 }
 0x1a4   :  { %325 = vst.msk [vmem:[%s625_s5 + $0x18] sm:$0xf] %vm318_vm11, %v316_v3 }
 0x1a5   :  { %319 = vst.msk [vmem:[%s625_s5] sm:$0xf] %vm318_vm11, %v310_v26  ;;  %v302_v33 = vpop.f32.mrf.mxu2 }
 0x1a6   :  { %v303_v8 = vadd.f32 %v373_v60, %v302_v33 }
 0x1a7   :  { %v307_v9 = vpop.f32.mrf.mxu3  ;;  %v292_v10 = vpop.f32.mrf.mxu0 }
 0x1a8   :  { %v315_v11 = vpack.c.bf16 %v303_v8, %v303_v8  ;;  %v308_v12 = vadd.f32 %v373_v60, %v307_v9  ;;  %v293_v13 = vadd.f32 %v373_v60, %v292_v10  ;;  %v295_v14 = vpop.f32.mrf.mxu1 }
 0x1a9   :  { %v296_v32 = vadd.f32 %v373_v60, %v295_v14 }
 0x1aa   :  { %324 = vst.msk [vmem:[%s625_s5 + $0x14] sm:$0xf] %vm318_vm11, %v315_v11  ;;  %v317_v15 = vpack.c.bf16 %v308_v12, %v308_v12  ;;  %v311_v16 = vpack.c.bf16 %v293_v13, %v293_v13 }
 0x1ab   :  { %v312_v17 = vpack.c.bf16 %v296_v32, %v296_v32 }
 0x1ac   :  { %326 = vst.msk [vmem:[%s625_s5 + $0x1c] sm:$0xf] %vm318_vm11, %v317_v15 }
 0x1ad   :  { %320 = vst.msk [vmem:[%s625_s5 + $0x4] sm:$0xf] %vm318_vm11, %v311_v16 }
 0x1ae   :  { %321 = vst.msk [vmem:[%s625_s5 + $0x8] sm:$0xf] %vm318_vm11, %v312_v17 }
 0x1b0   :  { %v297_v18 = vpop.f32.mrf.mxu1 }
 0x1b1   :  { %v298_v20 = vadd.f32 %v373_v60, %v297_v18 }
 0x1b3   :  { %v313_v21 = vpack.c.bf16 %v298_v20, %v298_v20 }
 0x1b5   :  { %322 = vst.msk [vmem:[%s625_s5 + $0xc] sm:$0xf] %vm318_vm11, %v313_v21 }

// kernel: clip_inference.39
= control target key start
LH: loop header
LB: loop body
LE: loop exit
PB: predicated region body
PF: predicated region fallthrough
CT: control target
= control target key end

     0   :  { %s621_s6 = smov 0   ;;  %s723_s0 = inlined_call_operand.vmem [shape: bf16[4,16,96], index: 0, kind: input, shape index: {}]   ;;  %s724_s1 = inlined_call_operand.vmem [shape: bf16[4,16,32], index: 1, kind: output, shape index: {}]  }
   0x1 LB: > { %s507_s7 = sadd.s32 4294967295, %s594_s6   ;;  %p511_p0 = scmp.ge.s32.totalorder %s594_s6, 1  ;;  %s594_s6 = sphi %s621_s6, %s11_s6  }
   0x2   : > { %p87_p1 = scmp.lt.s32.totalorder %s594_s6, 5 }
   0x4   : > { %p88_p2 = pnand %p511_p0, %p87_p1 }
   0x5   : > { %p107_p3 = scmp.lt.s32.totalorder (!%p88_p2), %s507_s7, 3  ;;  %s596_s12 = smov (!%p88_p2), 96  }
   0x6   : > { %91 = sbr.rel (%p88_p2) target bundleno = 950 (0x3b6), region = 24  ;;  %s597_s13 = smov (!%p88_p2), 88  }
   0x7   : > { %s598_s14 = smov (!%p88_p2), 120   ;;  %s599_s15 = smov (!%p88_p2), 64  }
   0x8   : > { %s600_s16 = smov (!%p88_p2), 80   ;;  %s601_s17 = smov (!%p88_p2), 72  }
   0x9   : > { %s602_s18 = smov (!%p88_p2), 112   ;;  %s604_s19 = smov (!%p88_p2), 56  }
   0xa   : > { %s605_s20 = smov (!%p88_p2), 104   ;;  %s606_s21 = smov (!%p88_p2), 48  }
   0xb   : > { %s726_s7 = smov (!%p107_p3, %s507_s7), 3  ;;  %vm141_vm0 = vcmask 64512   ;;  %v120_v12 = vlaneseq  ;;  %v603_v15 = vmov 0.0   ;;  %vm162_vm2 = vcmask 130048   ;;  %s607_s22 = smov 40  }
   0xc   : > { %s530_s8 = sshll.u32 %s726_s7, 3  ;;  %s608_s23 = smov 8   ;;  %vm208_vm4 = vcmask 60416   ;;  %vm289_vm5 = vcmask 126016   ;;  %vm369_vm6 = vcmask 191616   ;;  %vm449_vm7 = vcmask 257216  }
   0xd   : > { %s111_s11 = scalar_lea.vmem %s723_s0, %s530_s8  ;;  %v121_v13 = vshrl.u32 %v120_v12, 7  ;;  %v124_v14 = vand.u32 127, %v120_v12  ;;  %s609_s24 = smov 24  }
   0xe   : > { %v637_v0 = vld [vmem:[%s111_s11] sm:$0xff]  ;;  %s610_s25 = smov 16   ;;  %s705_s28 = scalar_lea.vmem %s724_s1, %s530_s8 }
   0xf   : > { %139 = vrot.lane.b32.xlu0 %v637_v0, %s596_s12  ;;  %214 = vrot.lane.b32.xlu1 %v637_v0, %s597_s13  ;;  %v118_v1 = vld [vmem:[%s111_s11] sm:$0xff]   ;;  %vm125_vm1 = vcmp.gt.s32.totalorder %v124_v14, %v121_v13  ;;  %v122_v17 = vadd.s32 8, %v121_v13 }
  0x10   : > { %v129_v2 = vunpack.c.l.bf16 %v118_v1  ;;  %v130_v3 = vunpack.c.h.bf16 %v118_v1  ;;  %v648_v16 = vsel %vm125_vm1, -1e+30, %v603_v15 }
  0x11   : > { %vm126_vm3 = vcmp.gt.s32.totalorder %v124_v14, %v122_v17 }
  0x12   : > { %v131_v4 = vmul.f32 0.35351563, %v129_v2  ;;  %v132_v5 = vmul.f32 0.35351563, %v130_v3  ;;  %v652_v21 = vsel %vm126_vm3, -1e+30, %v603_v15 }
  0x14   : > { %v133_v6 = vpack.c.bf16 %v132_v5, %v131_v4 }
  0x16   : > { %212 = vrot.lane.b32.xlu2 %v133_v6, %s598_s14 }
  0x1e   : > { %184 = vrot.lane.b32.xlu2 %v637_v0, %s599_s15 }
  0x26   : > { %294 = vrot.lane.b32.xlu2 %v637_v0, %s600_s16 }
  0x2e   : > { %374 = vrot.lane.b32.xlu2 %v637_v0, %s601_s17 }
  0x36   : > { %292 = vrot.lane.b32.xlu2 %v133_v6, %s602_s18 }
  0x70   : > { %v213_v11 = vpop.permute.xlu2 %212 }
  0x78   : > { %v185_v27 = vpop.permute.xlu2 %184 }
  0x79   : > { %197 = vmatpush.bf16.msra.mxu1 %v185_v27 }
  0x80   : > { %v295_v32 = vpop.permute.xlu2 %294 }
  0x81   : > { %v140_v7 = vpop.permute.xlu0 %139  ;;  %v215_v8 = vpop.permute.xlu1 %214  ;;  %v300_v33 = vsel %vm141_vm0, %v295_v32, 0 }
  0x82   : > { %v146_v9 = vsel %vm141_vm0, %v140_v7, 0  ;;  %v220_v10 = vsel %vm141_vm0, %v215_v8, 0  ;;  %309 = vmatpush.bf16.xpose.msrb.mxu1 %v300_v33 }
  0x83   : > { %155 = vmatpush.bf16.xpose.msra.mxu0 %v146_v9  ;;  %229 = vmatpush.bf16.xpose.msra.mxu2 %v220_v10 }
  0x88   : > { %v375_v34 = vpop.permute.xlu2 %374 }
  0x89   : > { %v380_v35 = vsel %vm141_vm0, %v375_v34, 0 }
  0x8a   : > { %520 = vmatmul.msk.bf16.vlgmr.msra.gmra.mxu0 %vm141_vm0, %v133_v6  ;;  %522 = vmatmul.msk.bf16.vlgmr.msra.gmra.mxu2 %vm141_vm0, %v213_v11 }
  0x8b   : > { %389 = vmatpush.bf16.xpose.msrb.mxu0 %v380_v35 }
  0x90   : > { %v293_v46 = vpop.permute.xlu2 %292 }
 0x107   : > { %v157_v18 = vpop.f32.mrf.mxu0 }
 0x108   : > { %v158_v19 = vadd.f32 %v157_v18, %v648_v16 }
 0x10a   : > { %v163_v20 = vsel %vm162_vm2, %v158_v19, -inf }
 0x10b   : > { %164 = vmax.xlane.f32.xlu0 %v163_v20 }
 0x10d   : > { %v231_v25 = vpop.f32.mrf.mxu2 }
 0x10e   : > { %v232_v28 = vadd.f32 %v231_v25, %v648_v16 }
 0x10f   : > { %v159_v22 = vpop.f32.mrf.mxu0 }
 0x110   : > { %v160_v23 = vadd.f32 %v159_v22, %v652_v21  ;;  %v236_v30 = vsel %vm162_vm2, %v232_v28, -inf }
 0x111   : > { %237 = vmax.xlane.f32.xlu2 %v236_v30 }
 0x112   : > { %v166_v24 = vsel %vm162_vm2, %v160_v23, -inf }
 0x113   : > { %167 = vmax.xlane.f32.xlu1 %v166_v24 }
 0x115   : > { %v233_v26 = vpop.f32.mrf.mxu2 }
 0x116   : > { %v234_v29 = vadd.f32 %v233_v26, %v652_v21 }
 0x118   : > { %v239_v31 = vsel %vm162_vm2, %v234_v29, -inf }
 0x11f   : > { %257 = vrot.lane.b32.xlu0 %v637_v0, %s604_s19 }
 0x12c   : > { %372 = vrot.lane.b32.xlu1 %v133_v6, %s605_s20 }
 0x156   : > { %240 = vmax.xlane.f32.xlu1 %v239_v31 }
 0x17e   : > { %v165_v36 = vpop.xlane.xlu0 %164 }
 0x17f   : > { %v169_v37 = vsub.f32 %v158_v19, %v165_v36 }
 0x181   : > { %v171_v38 = vmul.f32 1.442695, %v169_v37 }
 0x183   : > { %556 = vpow2.f32 %v171_v38 }
 0x184   : > { %v238_v48 = vpop.xlane.xlu2 %237 }
 0x185   : > { %v242_v50 = vsub.f32 %v232_v28, %v238_v48 }
 0x186   : > { %v168_v39 = vpop.xlane.xlu1 %167 }
 0x187   : > { %v170_v40 = vsub.f32 %v160_v23, %v168_v39  ;;  %v244_v52 = vmul.f32 1.442695, %v242_v50 }
 0x189   : > { %v173_v41 = vmul.f32 1.442695, %v170_v40  ;;  %v663_v42 = vpop.eup %556 }
 0x18a   : > { %v175_v38 = vsel %vm162_vm2, %v663_v42, 0.0 }
 0x18b   : > { %558 = vpow2.f32 %v173_v41 }
 0x18c   : > { %560 = vpow2.f32 %v244_v52 }
 0x191   : > { %v665_v43 = vpop.eup %558  ;;  %v258_v47 = vpop.permute.xlu0 %257 }
 0x192   : > { %v183_v44 = vpack.c.bf16 %v665_v43, %v663_v42  ;;  %270 = vmatpush.bf16.msra.mxu3 %v258_v47  ;;  %v561_v54 = vpop.eup %560  ;;  %v178_v39 = vsel %vm162_vm2, %v665_v43, 0.0 }
 0x193   : > { %v248_v7 = vsel %vm162_vm2, %v561_v54, 0.0 }
 0x194   : > { %521 = vmatmul.msk.bf16.vlgmr.msra.gmra.mxu1 %vm162_vm2, %v183_v44 }
 0x19e   : > { %v373_v45 = vpop.permute.xlu1 %372 }
 0x19f   : > { %526 = vmatmul.msk.bf16.vlgmr.msrb.gmra.mxu0 %vm141_vm0, %v373_v45 }
 0x1a4   : > { %524 = vmatmul.msk.bf16.vlgmr.msrb.gmra.mxu1 %vm141_vm0, %v293_v46 }
 0x1c9   : > { %v241_v49 = vpop.xlane.xlu1 %240 }
 0x1ca   : > { %v243_v51 = vsub.f32 %v234_v29, %v241_v49 }
 0x1cc   : > { %v246_v53 = vmul.f32 1.442695, %v243_v51 }
 0x1ce   : > { %562 = vpow2.f32 %v246_v53 }
 0x1d4   : > { %v563_v55 = vpop.eup %562 }
 0x1d5   : > { %v256_v56 = vpack.c.bf16 %v563_v55, %v561_v54  ;;  %v251_v9 = vsel %vm162_vm2, %v563_v55, 0.0 }
 0x1d7   : > { %523 = vmatmul.msk.bf16.vlgmr.msra.gmra.mxu3 %vm162_vm2, %v256_v56 }
 0x211   : > { %v673_v57 = vpop.f32.mrf.mxu1 }
 0x219   : > { %v675_v58 = vpop.f32.mrf.mxu1 }
 0x21c   : > { %v391_v59 = vpop.f32.mrf.mxu0 }
 0x21d   : > { %v392_v60 = vadd.f32 %v391_v59, %v648_v16 }
 0x21f   : > { %v396_v61 = vsel %vm162_vm2, %v392_v60, -inf }
 0x220   : > { %397 = vmax.xlane.f32.xlu1 %v396_v61 }
 0x221   : > { %v311_v62 = vpop.f32.mrf.mxu1 }
 0x222   : > { %v312_v63 = vadd.f32 %v311_v62, %v648_v16 }
 0x224   : > { %v393_v1 = vpop.f32.mrf.mxu0  ;;  %v316_v2 = vsel %vm162_vm2, %v312_v63, -inf }
 0x225   : > { %v394_v3 = vadd.f32 %v393_v1, %v652_v21  ;;  %317 = vmax.xlane.f32.xlu0 %v316_v2 }
 0x227   : > { %v399_v4 = vsel %vm162_vm2, %v394_v3, -inf }
 0x228   : > { %400 = vmax.xlane.f32.xlu2 %v399_v4 }
 0x229   : > { %v313_v5 = vpop.f32.mrf.mxu1 }
 0x22a   : > { %v314_v6 = vadd.f32 %v313_v5, %v652_v21 }
 0x22c   : > { %v319_v8 = vsel %vm162_vm2, %v314_v6, -inf }
 0x22d   : > { %249 = vadd.xlane.f32.xlu0 %v248_v7 }
 0x230   : > { %320 = vmax.xlane.f32.xlu2 %v319_v8 }
 0x239   : > { %337 = vrot.lane.b32.xlu1 %v637_v0, %s606_s21 }
 0x248   : > { %417 = vrot.lane.b32.xlu2 %v637_v0, %s607_s22 }
 0x25a   : > { %v272_v25 = vpop.f32.mrf.mxu3 }
 0x262   : > { %v274_v44 = vpop.f32.mrf.mxu3 }
 0x263   : > { %252 = vadd.xlane.f32.xlu1 %v251_v9 }
 0x293   : > { %v398_v10 = vpop.xlane.xlu1 %397 }
 0x294   : > { %v402_v13 = vsub.f32 %v392_v60, %v398_v10 }
 0x296   : > { %v404_v17 = vmul.f32 1.442695, %v402_v13 }
 0x298   : > { %v318_v11 = vpop.xlane.xlu0 %317 }
 0x299   : > { %v322_v12 = vsub.f32 %v312_v63, %v318_v11 }
 0x29b   : > { %v324_v14 = vmul.f32 1.442695, %v322_v12  ;;  %v401_v15 = vpop.xlane.xlu2 %400 }
 0x29c   : > { %v403_v16 = vsub.f32 %v394_v3, %v401_v15 }
 0x29d   : > { %564 = vpow2.f32 %v324_v14 }
 0x29e   : > { %v406_v18 = vmul.f32 1.442695, %v403_v16 }
 0x2a0   : > { %v250_v19 = vpop.xlane.xlu0 %249 }
 0x2a1   : > { %566 = vrcp.f32 %v250_v19 }
 0x2a2   : > { %568 = vpow2.f32 %v404_v17 }
 0x2a3   : > { %v565_v20 = vpop.eup %564  ;;  %v321_v21 = vpop.xlane.xlu2 %320  ;;  %570 = vpow2.f32 %v406_v18 }
 0x2a4   : > { %v323_v0 = vsub.f32 %v314_v6, %v321_v21  ;;  %v328_v22 = vsel %vm162_vm2, %v565_v20, 0.0 }
 0x2a5   : > { %329 = vadd.xlane.f32.xlu0 %v328_v22 }
 0x2a6   : > { %v326_v23 = vmul.f32 1.442695, %v323_v0 }
 0x2a7   : > { %v567_v24 = vpop.eup %566 }
 0x2a8   : > { %572 = vpow2.f32 %v326_v23  ;;  %v277_v26 = vmul.f32 %v567_v24, %v272_v25  ;;  %v569_v27 = vpop.eup %568 }
 0x2a9   : > { %v571_v28 = vpop.eup %570  ;;  %v408_v32 = vsel %vm162_vm2, %v569_v27, 0.0 }
 0x2aa   : > { %v279_v29 = vpack.c.bf16 %v277_v26, %v277_v26  ;;  %v416_v33 = vpack.c.bf16 %v571_v28, %v569_v27  ;;  %v411_v37 = vsel %vm162_vm2, %v571_v28, 0.0 }
 0x2ab   : > { %v338_v30 = vpop.permute.xlu1 %337  ;;  %v418_v31 = vpop.permute.xlu2 %417 }
 0x2ac   : > { %350 = vmatpush.bf16.msrb.mxu3 %v338_v30  ;;  %430 = vmatpush.bf16.msrb.mxu2 %v418_v31 }
 0x2ad   : > { %283 = vrot.lane.b32.xlu1 %v279_v29, %s608_s23  ;;  %409 = vadd.xlane.f32.xlu0 %v408_v32 }
 0x2ae   : > { %v573_v34 = vpop.eup %572 }
 0x2af   : > { %527 = vmatmul.msk.bf16.vlgmr.msrb.gmra.mxu2 %vm162_vm2, %v416_v33  ;;  %v331_v35 = vsel %vm162_vm2, %v573_v34, 0.0  ;;  %v336_v36 = vpack.c.bf16 %v573_v34, %v565_v20 }
 0x2b0   : > { %332 = vadd.xlane.f32.xlu2 %v331_v35 }
 0x2b1   : > { %525 = vmatmul.msk.bf16.vlgmr.msrb.gmra.mxu3 %vm162_vm2, %v336_v36 }
 0x2b5   : > { %412 = vadd.xlane.f32.xlu0 %v411_v37 }
 0x2bd   : > { %176 = vadd.xlane.f32.xlu0 %v175_v38 }
 0x2c5   : > { %179 = vadd.xlane.f32.xlu0 %v178_v39 }
 0x2d6   : > { %v253_v40 = vpop.xlane.xlu1 %252 }
 0x2d7   : > { %574 = vrcp.f32 %v253_v40 }
 0x2dd   : > { %v575_v41 = vpop.eup %574 }
 0x2de   : > { %v278_v45 = vmul.f32 %v575_v41, %v274_v44 }
 0x2e0   : > { %v280_v46 = vpack.c.bf16 %v278_v45, %v278_v45 }
 0x2e2   : > { %285 = vrot.lane.b32.xlu0 %v280_v46, %s608_s23 }
 0x318   : > { %v330_v47 = vpop.xlane.xlu0 %329 }
 0x31f   : > { %v284_v4 = vpop.permute.xlu1 %283 }
 0x320   : > { %v410_v48 = vpop.xlane.xlu0 %409 }
 0x321   : > { %576 = vrcp.f32 %v410_v48 }
 0x322   : > { %578 = vrcp.f32 %v330_v47 }
 0x323   : > { %v333_v52 = vpop.xlane.xlu2 %332 }
 0x327   : > { %v577_v42 = vpop.eup %576 }
 0x328   : > { %v413_v49 = vpop.xlane.xlu0 %412  ;;  %v579_v43 = vpop.eup %578 }
 0x330   : > { %v177_v50 = vpop.xlane.xlu0 %176 }
 0x331   : > { %580 = vrcp.f32 %v177_v50 }
 0x332   : > { %v432_v51 = vpop.f32.mrf.mxu2  ;;  %582 = vrcp.f32 %v413_v49 }
 0x333   : > { %v437_v53 = vmul.f32 %v577_v42, %v432_v51  ;;  %584 = vrcp.f32 %v333_v52 }
 0x334   : > { %v352_v54 = vpop.f32.mrf.mxu3 }
 0x335   : > { %v439_v55 = vpack.c.bf16 %v437_v53, %v437_v53  ;;  %v357_v56 = vmul.f32 %v579_v43, %v352_v54 }
 0x337   : > { %v581_v59 = vpop.eup %580  ;;  %v359_v60 = vpack.c.bf16 %v357_v56, %v357_v56  ;;  %443 = vrot.lane.b32.xlu1 %v439_v55, %s609_s24 }
 0x338   : > { %v204_v61 = vmul.f32 %v581_v59, %v673_v57  ;;  %v180_v62 = vpop.xlane.xlu0 %179  ;;  %v583_v63 = vpop.eup %582 }
 0x339   : > { %586 = vrcp.f32 %v180_v62  ;;  %363 = vrot.lane.b32.xlu2 %v359_v60, %s610_s25  ;;  %v585_v57 = vpop.eup %584 }
 0x33a   : > { %v206_v1 = vpack.c.bf16 %v204_v61, %v204_v61  ;;  %v434_v2 = vpop.f32.mrf.mxu2 }
 0x33b   : > { %v438_v3 = vmul.f32 %v583_v63, %v434_v2 }
 0x33c   : > { %v354_v5 = vpop.f32.mrf.mxu3  ;;  %209 = vst.msk [vmem:[%s705_s28] sm:$0xf] %vm208_vm4, %v206_v1 }
 0x33d   : > { %v358_v6 = vmul.f32 %v585_v57, %v354_v5  ;;  %290 = vst.msk [vmem:[%s705_s28] sm:$0xf] %vm289_vm5, %v284_v4  ;;  %v440_v8 = vpack.c.bf16 %v438_v3, %v438_v3 }
 0x33f   : > { %v587_v7 = vpop.eup %586  ;;  %v360_v9 = vpack.c.bf16 %v358_v6, %v358_v6 }
 0x340   : > { %v205_v10 = vmul.f32 %v587_v7, %v675_v58 }
 0x341   : > { %365 = vrot.lane.b32.xlu0 %v360_v9, %s610_s25  ;;  %445 = vrot.lane.b32.xlu2 %v440_v8, %s609_s24 }
 0x342   : > { %v207_v11 = vpack.c.bf16 %v205_v10, %v205_v10 }
 0x344   : > { %210 = vst.msk [vmem:[%s705_s28 + $0x4] sm:$0xf] %vm208_vm4, %v207_v11 }
 0x354   : > { %v286_v12 = vpop.permute.xlu0 %285 }
 0x355   : > { %291 = vst.msk [vmem:[%s705_s28 + $0x4] sm:$0xf] %vm289_vm5, %v286_v12 }
 0x393   : > { %v364_v13 = vpop.permute.xlu2 %363 }
 0x394   : > { %370 = vst.msk [vmem:[%s705_s28] sm:$0xf] %vm369_vm6, %v364_v13 }
 0x39b   : > { %v446_v16 = vpop.permute.xlu2 %445 }
 0x3a9   : > { %v444_v14 = vpop.permute.xlu1 %443 }
 0x3aa   : > { %450 = vst.msk [vmem:[%s705_s28] sm:$0xf] %vm449_vm7, %v444_v14 }
 0x3b3   : > { %v366_v15 = vpop.permute.xlu0 %365 }
 0x3b4   : > { %371 = vst.msk [vmem:[%s705_s28 + $0x4] sm:$0xf] %vm369_vm6, %v366_v15 }
 0x3b5   : > { %451 = vst.msk [vmem:[%s705_s28 + $0x4] sm:$0xf] %vm449_vm7, %v446_v16 }
 0x3b6 PF: > { %s11_s6 = sadd.s32 1, %s594_s6  }
 0x3b7   : > { %p8_p4 = scmp.ge.s32.totalorder %s11_s6, 6  }
 0x3b9   :  { %10 = sbr.rel (!%p8_p4) target bundleno = 1 (0x1), region = 54 }

// kernel: clip_inference.41
= control target key start
LH: loop header
LB: loop body
LE: loop exit
PB: predicated region body
PF: predicated region fallthrough
CT: control target
= control target key end

     0   :  { %vm37_vm0 = vcmask 261120   ;;  %v622_v20 = vmov 32.0   ;;  %s991_s0 = inlined_call_operand.vmem [shape: bf16[64,32], index: 0, kind: input, shape index: {}]   ;;  %s992_s1 = inlined_call_operand.vmem [shape: f32[1,32], index: 1, kind: input, shape index: {}]   ;;  %s993_s2 = inlined_call_operand.vmem [shape: f32[1,32], index: 2, kind: input, shape index: {}]   ;;  %s994_s4 = inlined_call_operand.vmem [shape: f32[1,128], index: 4, kind: input, shape index: {}]   ;;  %s995_s3 = inlined_call_operand.vmem [shape: bf16[32,128], index: 3, kind: input, shape index: {}]   ;;  %s996_s5 = inlined_call_operand.vmem [shape: bf16[64,128], index: 5, kind: output, shape index: {}]  }
   0x1   :  { %v558_v0 = vld [vmem:[%s991_s0 + $0x18] sm:$0xff]   ;;  %v557_v1 = vld [vmem:[%s991_s0 + $0x10] sm:$0xff]   ;;  %v521_v2 = vld [vmem:[%s991_s0] sm:$0xff]   ;;  %572 = vrcp.f32 %v622_v20 }
   0x2   :  { %v534_v3 = vunpack.c.l.bf16 %v558_v0  ;;  %v530_v4 = vunpack.c.l.bf16 %v557_v1  ;;  %v522_v5 = vunpack.c.l.bf16 %v521_v2  ;;  %v535_v9 = vunpack.c.h.bf16 %v558_v0  ;;  %v556_v15 = vld [vmem:[%s991_s0 + $0x8] sm:$0xff]  }
   0x3   :  { %v531_v10 = vunpack.c.h.bf16 %v557_v1  ;;  %v523_v11 = vunpack.c.h.bf16 %v521_v2  ;;  %v526_v16 = vunpack.c.l.bf16 %v556_v15  ;;  %v527_v17 = vunpack.c.h.bf16 %v556_v15 }
   0x4   :  { %v56_v6 = vsel %vm37_vm0, %v534_v3, 0.0  ;;  %v50_v7 = vsel %vm37_vm0, %v530_v4, 0.0  ;;  %v38_v8 = vsel %vm37_vm0, %v522_v5, 0.0  ;;  %v59_v12 = vsel %vm37_vm0, %v535_v9, 0.0 }
   0x5   :  { %57 = vadd.xlane.f32.xlu1 %v56_v6  ;;  %51 = vadd.xlane.f32.xlu0 %v50_v7  ;;  %v53_v13 = vsel %vm37_vm0, %v531_v10, 0.0  ;;  %v41_v14 = vsel %vm37_vm0, %v523_v11, 0.0  ;;  %v44_v18 = vsel %vm37_vm0, %v526_v16, 0.0  ;;  %v47_v19 = vsel %vm37_vm0, %v527_v17, 0.0  ;;  %v519_v7 = vld [vmem:[%s995_s3 + $0x8] sm:$0xff] }
   0x6   :  { %39 = vadd.xlane.f32.xlu2 %v38_v8  ;;  %563 = vmatpush.bf16.msra.mxu2 %v519_v7 }
   0x7   :  { %v573_v21 = vpop.eup %572  ;;  %564 = vmatpush.bf16.msra.mxu3 %v519_v7  ;;  %287 = vmatpush.bf16.msra.mxu0 %v519_v7 }
   0x8   :  { %v63_v22 = vmul.f32 32.0, %v573_v21  ;;  %vm67_vm1 = vweird.f32 %v573_v21  ;;  %562 = vmatpush.bf16.msra.mxu1 %v519_v7 }
   0xa   :  { %v64_v23 = vsub.f32 1.0, %v63_v22 }
   0xc   :  { %v65_v24 = vmul.f32 %v573_v21, %v64_v23 }
   0xd   :  { %60 = vadd.xlane.f32.xlu1 %v59_v12  ;;  %54 = vadd.xlane.f32.xlu0 %v53_v13 }
   0xe   :  { %42 = vadd.xlane.f32.xlu2 %v41_v14  ;;  %v66_v25 = vadd.f32 %v573_v21, %v65_v24 }
  0x10   :  { %v673_v26 = vsel %vm67_vm1, %v573_v21, %v66_v25 }
  0x15   :  { %45 = vadd.xlane.f32.xlu0 %v44_v18  ;;  %48 = vadd.xlane.f32.xlu1 %v47_v19 }
  0x78   :  { %v58_v27 = vpop.xlane.xlu1 %57  ;;  %v52_v28 = vpop.xlane.xlu0 %51 }
  0x79   :  { %v75_v29 = vmul.f32 %v673_v26, %v58_v27  ;;  %v73_v30 = vmul.f32 %v673_v26, %v52_v28  ;;  %v40_v31 = vpop.xlane.xlu2 %39 }
  0x7a   :  { %v69_v40 = vmul.f32 %v673_v26, %v40_v31 }
  0x7b   :  { %v677_v32 = vsub.f32 %v534_v3, %v75_v29  ;;  %v679_v33 = vsub.f32 %v530_v4, %v73_v30 }
  0x7c   :  { %v697_v48 = vsub.f32 %v522_v5, %v69_v40 }
  0x7d   :  { %v91_v34 = vmul.f32 %v677_v32, %v677_v32  ;;  %v89_v35 = vmul.f32 %v679_v33, %v679_v33 }
  0x7e   :  { %v85_v59 = vmul.f32 %v697_v48, %v697_v48 }
  0x7f   :  { %v111_v36 = vsel %vm37_vm0, %v91_v34, 0.0  ;;  %v105_v37 = vsel %vm37_vm0, %v89_v35, 0.0 }
  0x80   :  { %v61_v38 = vpop.xlane.xlu1 %60  ;;  %v55_v39 = vpop.xlane.xlu0 %54  ;;  %112 = vadd.xlane.f32.xlu1 %v111_v36  ;;  %106 = vadd.xlane.f32.xlu2 %v105_v37  ;;  %v93_v63 = vsel %vm37_vm0, %v85_v59, 0.0 }
  0x81   :  { %v76_v41 = vmul.f32 %v673_v26, %v61_v38  ;;  %v74_v42 = vmul.f32 %v673_v26, %v55_v39  ;;  %v43_v43 = vpop.xlane.xlu2 %42 }
  0x82   :  { %v70_v44 = vmul.f32 %v673_v26, %v43_v43 }
  0x83   :  { %v691_v45 = vsub.f32 %v535_v9, %v76_v41  ;;  %v693_v46 = vsub.f32 %v531_v10, %v74_v42  ;;  %v518_v10 = vld [vmem:[%s995_s3] sm:$0xff] }
  0x84   :  { %v695_v47 = vsub.f32 %v523_v11, %v70_v44  ;;  %566 = vmatpush.bf16.msra.mxu2 %v518_v10  ;;  %567 = vmatpush.bf16.msra.mxu3 %v518_v10 }
  0x85   :  { %v90_v49 = vmul.f32 %v693_v46, %v693_v46  ;;  %v92_v50 = vmul.f32 %v691_v45, %v691_v45  ;;  %288 = vmatpush.bf16.msra.mxu0 %v518_v10  ;;  %565 = vmatpush.bf16.msra.mxu1 %v518_v10 }
  0x86   :  { %v86_v51 = vmul.f32 %v695_v47, %v695_v47 }
  0x87   :  { %v108_v52 = vsel %vm37_vm0, %v90_v49, 0.0  ;;  %v114_v53 = vsel %vm37_vm0, %v92_v50, 0.0 }
  0x88   :  { %109 = vadd.xlane.f32.xlu0 %v108_v52  ;;  %v46_v54 = vpop.xlane.xlu0 %45  ;;  %115 = vadd.xlane.f32.xlu2 %v114_v53  ;;  %v96_v55 = vsel %vm37_vm0, %v86_v51, 0.0  ;;  %v49_v56 = vpop.xlane.xlu1 %48 }
  0x89   :  { %v71_v57 = vmul.f32 %v673_v26, %v46_v54  ;;  %97 = vadd.xlane.f32.xlu1 %v96_v55  ;;  %v72_v58 = vmul.f32 %v673_v26, %v49_v56 }
  0x8b   :  { %v712_v60 = vsub.f32 %v526_v16, %v71_v57  ;;  %v714_v61 = vsub.f32 %v527_v17, %v72_v58 }
  0x8d   :  { %v87_v62 = vmul.f32 %v712_v60, %v712_v60  ;;  %v88_v1 = vmul.f32 %v714_v61, %v714_v61 }
  0x8f   :  { %v99_v0 = vsel %vm37_vm0, %v87_v62, 0.0  ;;  %v102_v2 = vsel %vm37_vm0, %v88_v1, 0.0 }
  0x90   :  { %100 = vadd.xlane.f32.xlu2 %v99_v0  ;;  %94 = vadd.xlane.f32.xlu0 %v93_v63 }
  0x98   :  { %103 = vadd.xlane.f32.xlu0 %v102_v2 }
  0xf3   :  { %v113_v3 = vpop.xlane.xlu1 %112  ;;  %v107_v4 = vpop.xlane.xlu2 %106 }
  0xf4   :  { %v123_v5 = vmul.f32 %v113_v3, %v673_v26  ;;  %v121_v6 = vmul.f32 %v107_v4, %v673_v26  ;;  %v770_v3 = vld [vmem:[%s992_s1] ss:$0 sm:$0xff] }
  0xf6   :  { %v131_v8 = vadd.f32 1e-05, %v123_v5  ;;  %v129_v9 = vadd.f32 1e-05, %v121_v6 }
  0xf8   :  { %574 = vrsqrt.f32 %v131_v8  ;;  %vm199_vm2 = vweird.f32 %v131_v8  ;;  %vm179_vm5 = vweird.f32 %v129_v9 }
  0xf9   :  { %576 = vrsqrt.f32 %v129_v9 }
  0xfb   :  { %v110_v11 = vpop.xlane.xlu0 %109  ;;  %v116_v12 = vpop.xlane.xlu2 %115 }
  0xfc   :  { %v122_v13 = vmul.f32 %v110_v11, %v673_v26  ;;  %v98_v14 = vpop.xlane.xlu1 %97  ;;  %v124_v15 = vmul.f32 %v116_v12, %v673_v26 }
  0xfd   :  { %v118_v16 = vmul.f32 %v98_v14, %v673_v26 }
  0xfe   :  { %v575_v17 = vpop.eup %574  ;;  %v130_v18 = vadd.f32 1e-05, %v122_v13  ;;  %v734_v19 = vadd.f32 1e-05, %v124_v15  ;;  %v570_v15 = vld [vmem:[%s993_s2] ss:$0 sm:$0xff] }
  0xff   :  { %v577_v20 = vpop.eup %576  ;;  %v194_v21 = vmul.f32 %v575_v17, %v131_v8  ;;  %v126_v22 = vadd.f32 1e-05, %v118_v16  ;;  %vm200_vm4 = vweird.f32 %v575_v17 }
 0x100   :  { %v174_v23 = vmul.f32 %v577_v20, %v129_v9  ;;  %578 = vrsqrt.f32 %v130_v18  ;;  %vm180_vm3 = vweird.f32 %v577_v20  ;;  %vm189_vm7 = vweird.f32 %v130_v18  ;;  %vm757_vm8 = vmor %vm199_vm2, %vm200_vm4 }
 0x101   :  { %v195_v24 = vmul.f32 %v575_v17, %v194_v21  ;;  %580 = vrsqrt.f32 %v126_v22  ;;  %vm747_vm6 = vmor %vm179_vm5, %vm180_vm3  ;;  %vm149_vm9 = vweird.f32 %v126_v22  ;;  %vm209_vm12 = vweird.f32 %v734_v19 }
 0x102   :  { %v175_v25 = vmul.f32 %v577_v20, %v174_v23  ;;  %582 = vrsqrt.f32 %v734_v19 }
 0x103   :  { %v196_v27 = vmul.f32 0.5, %v195_v24  ;;  %v95_v28 = vpop.xlane.xlu0 %94  ;;  %v101_v29 = vpop.xlane.xlu2 %100 }
 0x104   :  { %v176_v30 = vmul.f32 0.5, %v175_v25  ;;  %v117_v31 = vmul.f32 %v95_v28, %v673_v26  ;;  %v119_v34 = vmul.f32 %v101_v29, %v673_v26 }
 0x105   :  { %v197_v35 = vsub.f32 1.5, %v196_v27 }
 0x106   :  { %v579_v36 = vpop.eup %578  ;;  %v177_v37 = vsub.f32 1.5, %v176_v30  ;;  %v739_v38 = vadd.f32 1e-05, %v117_v31  ;;  %v743_v41 = vadd.f32 1e-05, %v119_v34 }
 0x107   :  { %v741_v39 = vpop.eup %580  ;;  %v184_v40 = vmul.f32 %v579_v36, %v130_v18  ;;  %v198_v43 = vmul.f32 %v575_v17, %v197_v35  ;;  %vm190_vm10 = vweird.f32 %v579_v36 }
 0x108   :  { %v583_v42 = vpop.eup %582  ;;  %v178_v44 = vmul.f32 %v577_v20, %v177_v37  ;;  %v144_v49 = vmul.f32 %v741_v39, %v126_v22  ;;  %584 = vrsqrt.f32 %v739_v38  ;;  %vm150_vm11 = vweird.f32 %v741_v39  ;;  %vm191_vm14 = vmor %vm189_vm7, %vm190_vm10 }
 0x109   :  { %v185_v51 = vmul.f32 %v579_v36, %v184_v40  ;;  %v204_v52 = vmul.f32 %v583_v42, %v734_v19  ;;  %586 = vrsqrt.f32 %v743_v41  ;;  %v202_v59 = vsel %vm757_vm8, %v575_v17, %v198_v43  ;;  %vm779_vm15 = vmor %vm149_vm9, %vm150_vm11 }
 0x10a   :  { %v182_v53 = vsel %vm747_vm6, %v577_v20, %v178_v44  ;;  %v145_v54 = vmul.f32 %v741_v39, %v144_v49  ;;  %vm210_vm13 = vweird.f32 %v583_v42  ;;  %v219_v7 = vmul.f32 %v202_v59, %v677_v32 }
 0x10b   :  { %v186_v56 = vmul.f32 0.5, %v185_v51  ;;  %v205_v57 = vmul.f32 %v583_v42, %v204_v52  ;;  %v104_v58 = vpop.xlane.xlu0 %103  ;;  %v217_v0 = vmul.f32 %v182_v53, %v679_v33  ;;  %vm211_vm1 = vmor %vm209_vm12, %vm210_vm13  ;;  %vm139_vm2 = vweird.f32 %v739_v38 }
 0x10c   :  { %v146_v62 = vmul.f32 0.5, %v145_v54  ;;  %v120_v63 = vmul.f32 %v104_v58, %v673_v26  ;;  %v231_v22 = vmul.f32 %v770_v3, %v219_v7  ;;  %vm159_vm4 = vweird.f32 %v743_v41 }
 0x10d   :  { %v187_v1 = vsub.f32 1.5, %v186_v56  ;;  %v206_v2 = vmul.f32 0.5, %v205_v57  ;;  %v229_v32 = vmul.f32 %v770_v3, %v217_v0 }
 0x10e   :  { %v585_v4 = vpop.eup %584  ;;  %v147_v5 = vsub.f32 1.5, %v146_v62  ;;  %v128_v6 = vadd.f32 1e-05, %v120_v63 }
 0x10f   :  { %v188_v26 = vmul.f32 %v579_v36, %v187_v1  ;;  %v207_v33 = vsub.f32 1.5, %v206_v2  ;;  %v134_v8 = vmul.f32 %v585_v4, %v739_v38  ;;  %v587_v11 = vpop.eup %586  ;;  %vm140_vm3 = vweird.f32 %v585_v4 }
 0x110   :  { %v148_v9 = vmul.f32 %v741_v39, %v147_v5  ;;  %588 = vrsqrt.f32 %v128_v6  ;;  %v154_v17 = vmul.f32 %v587_v11, %v743_v41  ;;  %v241_v19 = vadd.f32 %v570_v15, %v229_v32  ;;  %vm141_vm5 = vmor %vm139_vm2, %vm140_vm3 }
 0x111   :  { %v192_v12 = vsel %vm191_vm14, %v579_v36, %v188_v26  ;;  %v208_v13 = vmul.f32 %v583_v42, %v207_v33  ;;  %v135_v14 = vmul.f32 %v585_v4, %v134_v8  ;;  %vm160_vm6 = vweird.f32 %v587_v11 }
 0x112   :  { %v218_v16 = vmul.f32 %v192_v12, %v693_v46  ;;  %v152_v18 = vsel %vm779_vm15, %v741_v39, %v148_v9  ;;  %v155_v24 = vmul.f32 %v587_v11, %v154_v17  ;;  %vm161_vm7 = vmor %vm159_vm4, %vm160_vm6  ;;  %vm169_vm9 = vweird.f32 %v128_v6 }
 0x113   :  { %v212_v20 = vsel %vm211_vm1, %v583_v42, %v208_v13  ;;  %v136_v21 = vmul.f32 0.5, %v135_v14  ;;  %v214_v28 = vmul.f32 %v152_v18, %v695_v47 }
 0x114   :  { %v220_v23 = vmul.f32 %v212_v20, %v691_v45  ;;  %v230_v25 = vmul.f32 %v770_v3, %v218_v16  ;;  %v156_v29 = vmul.f32 0.5, %v155_v24  ;;  %v243_v45 = vadd.f32 %v570_v15, %v231_v22 }
 0x115   :  { %v137_v46 = vsub.f32 1.5, %v136_v21  ;;  %v226_v44 = vmul.f32 %v770_v3, %v214_v28 }
 0x116   :  { %v589_v27 = vpop.eup %588  ;;  %v242_v30 = vadd.f32 %v570_v15, %v230_v25  ;;  %v232_v31 = vmul.f32 %v770_v3, %v220_v23  ;;  %v157_v36 = vsub.f32 1.5, %v156_v29 }
 0x117   :  { %v138_v34 = vmul.f32 %v585_v4, %v137_v46  ;;  %v164_v35 = vmul.f32 %v589_v27, %v128_v6  ;;  %vm170_vm8 = vweird.f32 %v589_v27  ;;  %v238_v54 = vadd.f32 %v570_v15, %v226_v44 }
 0x118   :  { %v247_v37 = vpack.c.bf16 %v242_v30, %v241_v19  ;;  %v244_v39 = vadd.f32 %v570_v15, %v232_v31  ;;  %v158_v43 = vmul.f32 %v587_v11, %v157_v36  ;;  %vm171_vm10 = vmor %vm169_vm9, %vm170_vm8 }
 0x119   :  { %v142_v38 = vsel %vm141_vm5, %v585_v4, %v138_v34  ;;  %v165_v40 = vmul.f32 %v589_v27, %v164_v35 }
 0x11a   :  { %v213_v42 = vmul.f32 %v142_v38, %v697_v48  ;;  %508 = vmatmul.msk.bf16.vlgmr.msra.gmra.mxu2 %vm37_vm0, %v247_v37  ;;  %v248_v47 = vpack.c.bf16 %v244_v39, %v243_v45  ;;  %v162_v50 = vsel %vm161_vm7, %v587_v11, %v158_v43 }
 0x11b   :  { %v166_v49 = vmul.f32 0.5, %v165_v40  ;;  %v215_v53 = vmul.f32 %v162_v50, %v712_v60  ;;  %v571_v60 = vld [vmem:[%s994_s4] ss:$0 sm:$0xff] }
 0x11c   :  { %509 = vmatmul.msk.bf16.vlgmr.msra.gmra.mxu3 %vm37_vm0, %v248_v47  ;;  %v225_v51 = vmul.f32 %v770_v3, %v213_v42 }
 0x11d   :  { %v167_v52 = vsub.f32 1.5, %v166_v49  ;;  %v227_v58 = vmul.f32 %v770_v3, %v215_v53 }
 0x11e   :  { %v237_v48 = vadd.f32 %v570_v15, %v225_v51 }
 0x11f   :  { %v168_v55 = vmul.f32 %v589_v27, %v167_v52  ;;  %v239_v62 = vadd.f32 %v570_v15, %v227_v58 }
 0x120   :  { %v245_v56 = vpack.c.bf16 %v238_v54, %v237_v48 }
 0x121   :  { %v172_v57 = vsel %vm171_vm10, %v589_v27, %v168_v55 }
 0x122   :  { %v216_v41 = vmul.f32 %v172_v57, %v714_v61  ;;  %506 = vmatmul.msk.bf16.vlgmr.msra.gmra.mxu0 %vm37_vm0, %v245_v56 }
 0x124   :  { %v228_v59 = vmul.f32 %v770_v3, %v216_v41 }
 0x126   :  { %v240_v63 = vadd.f32 %v570_v15, %v228_v59 }
 0x128   :  { %v246_v0 = vpack.c.bf16 %v240_v63, %v239_v62 }
 0x12a   :  { %507 = vmatmul.msk.bf16.vlgmr.msra.gmra.mxu1 %vm37_vm0, %v246_v0 }
 0x19d   :  { %v300_v1 = vpop.f32.mrf.mxu2 }
 0x19e   :  { %v818_v2 = vadd.f32 %v571_v60, %v300_v1 }
 0x19f   :  { %v305_v4 = vpop.f32.mrf.mxu3  ;;  %v290_v61 = vpop.f32.mrf.mxu0 }
 0x1a0   :  { %v514_v5 = vmul.f32 -1.702, %v818_v2  ;;  %v821_v6 = vadd.f32 %v571_v60, %v305_v4  ;;  %v823_v7 = vadd.f32 %v571_v60, %v290_v61 }
 0x1a2   :  { %v334_v3 = vmul.f32 1.442695, %v514_v5  ;;  %v516_v26 = vmul.f32 -1.702, %v821_v6  ;;  %v510_v33 = vmul.f32 -1.702, %v823_v7 }
 0x1a4   :  { %590 = vpow2.f32 %v334_v3  ;;  %v338_v8 = vmul.f32 1.442695, %v516_v26  ;;  %v326_v9 = vmul.f32 1.442695, %v510_v33 }
 0x1a5   :  { %v302_v10 = vpop.f32.mrf.mxu2 }
 0x1a6   :  { %592 = vpow2.f32 %v338_v8  ;;  %v827_v11 = vadd.f32 %v571_v60, %v302_v10 }
 0x1a7   :  { %594 = vpow2.f32 %v326_v9  ;;  %v307_v12 = vpop.f32.mrf.mxu3  ;;  %v292_v13 = vpop.f32.mrf.mxu0 }
 0x1a8   :  { %v515_v14 = vmul.f32 -1.702, %v827_v11  ;;  %v830_v32 = vadd.f32 %v571_v60, %v307_v12  ;;  %v832_v15 = vadd.f32 %v571_v60, %v292_v13  ;;  %v295_v16 = vpop.f32.mrf.mxu1 }
 0x1a9   :  { %v834_v17 = vadd.f32 %v571_v60, %v295_v16 }
 0x1aa   :  { %v591_v18 = vpop.eup %590  ;;  %v336_v20 = vmul.f32 1.442695, %v515_v14  ;;  %v517_v21 = vmul.f32 -1.702, %v830_v32  ;;  %v511_v22 = vmul.f32 -1.702, %v832_v15 }
 0x1ab   :  { %v838_v23 = vadd.f32 1.0, %v591_v18  ;;  %v512_v19 = vmul.f32 -1.702, %v834_v17 }
 0x1ac   :  { %v593_v24 = vpop.eup %592  ;;  %596 = vpow2.f32 %v336_v20  ;;  %v340_v25 = vmul.f32 1.442695, %v517_v21  ;;  %v328_v46 = vmul.f32 1.442695, %v511_v22 }
 0x1ad   :  { %v595_v27 = vpop.eup %594  ;;  %598 = vrcp.f32 %v838_v23  ;;  %v842_v28 = vadd.f32 1.0, %v593_v24  ;;  %v330_v30 = vmul.f32 1.442695, %v512_v19  ;;  %v421_v45 = vand.u32 2147483648, %v838_v23 }
 0x1ae   :  { %v844_v29 = vadd.f32 1.0, %v595_v27  ;;  %600 = vpow2.f32 %v340_v25  ;;  %v419_v40 = vand.u32 2147483647, %v838_v23  ;;  %vm415_vm0 = vweird.f32 %v838_v23 }
 0x1af   :  { %602 = vpow2.f32 %v328_v46  ;;  %v422_v51 = vor.u32 1.1754944e-38, %v421_v45  ;;  %v449_v53 = vand.u32 2147483647, %v842_v28  ;;  %v451_v48 = vand.u32 2147483648, %v842_v28 }
 0x1b0   :  { %604 = vrcp.f32 %v842_v28  ;;  %v297_v34 = vpop.f32.mrf.mxu1  ;;  %v361_v56 = vand.u32 2147483648, %v844_v29  ;;  %vm877_vm11 = vcmp.eq.f32.partialorder %v419_v40, 8.507059e+37  ;;  %vm445_vm12 = vweird.f32 %v842_v28 }
 0x1b1   :  { %606 = vrcp.f32 %v844_v29  ;;  %v857_v42 = vadd.f32 %v571_v60, %v297_v34  ;;  %vm355_vm13 = vweird.f32 %v844_v29  ;;  %v359_v61 = vand.u32 2147483647, %v844_v29 }
 0x1b2   :  { %v597_v31 = vpop.eup %596  ;;  %608 = vpow2.f32 %v330_v30  ;;  %v452_v5 = vor.u32 1.1754944e-38, %v451_v48  ;;  %v362_v26 = vor.u32 1.1754944e-38, %v361_v56  ;;  %vm894_vm1 = vcmp.eq.f32.partialorder %v449_v53, 8.507059e+37 }
 0x1b3   :  { %v848_v35 = vpop.eup %598  ;;  %v851_v36 = vadd.f32 1.0, %v597_v31  ;;  %v513_v59 = vmul.f32 -1.702, %v857_v42  ;;  %vm916_vm6 = vcmp.eq.f32.partialorder %v359_v61, 8.507059e+37 }
 0x1b4   :  { %v601_v37 = vpop.eup %600  ;;  %v411_v39 = vmul.f32 %v848_v35, %v838_v23  ;;  %vm416_vm14 = vweird.f32 %v848_v35 }
 0x1b5   :  { %v603_v38 = vpop.eup %602  ;;  %610 = vrcp.f32 %v851_v36  ;;  %v862_v44 = vadd.f32 1.0, %v601_v37  ;;  %v434_v58 = vand.u32 2147483647, %v851_v36  ;;  %v436_v0 = vand.u32 2147483648, %v851_v36  ;;  %vm905_vm4 = vmor %vm415_vm0, %vm416_vm14 }
 0x1b6   :  { %v859_v43 = vpop.eup %604  ;;  %v412_v47 = vsub.f32 1.0, %v411_v39  ;;  %v864_v49 = vadd.f32 1.0, %v603_v38  ;;  %vm430_vm2 = vweird.f32 %v851_v36  ;;  %v332_v10 = vmul.f32 1.442695, %v513_v59 }
 0x1b7   :  { %v866_v50 = vpop.eup %606  ;;  %v441_v52 = vmul.f32 %v859_v43, %v842_v28  ;;  %612 = vrcp.f32 %v862_v44  ;;  %vm446_vm15 = vweird.f32 %v859_v43  ;;  %vm899_vm3 = vcmp.eq.f32.partialorder %v434_v58, 8.507059e+37 }
 0x1b8   :  { %v413_v54 = vmul.f32 %v848_v35, %v412_v47  ;;  %v351_v55 = vmul.f32 %v866_v50, %v844_v29  ;;  %v609_v62 = vpop.eup %608  ;;  %614 = vrcp.f32 %v864_v49  ;;  %vm356_vm5 = vweird.f32 %v866_v50  ;;  %vm928_vm9 = vmor %vm445_vm12, %vm446_vm15 }
 0x1b9   :  { %v442_v41 = vsub.f32 1.0, %v441_v52  ;;  %v437_v16 = vor.u32 1.1754944e-38, %v436_v0  ;;  %v910_v18 = vadd.f32 1.0, %v609_v62  ;;  %vm460_vm7 = vweird.f32 %v862_v44  ;;  %vm941_vm10 = vmor %vm355_vm13, %vm356_vm5 }
 0x1ba   :  { %v352_v63 = vsub.f32 1.0, %v351_v55  ;;  %v414_v1 = vadd.f32 %v848_v35, %v413_v54  ;;  %v464_v30 = vand.u32 2147483647, %v862_v44  ;;  %v466_v31 = vand.u32 2147483648, %v862_v44 }
 0x1bb   :  { %v611_v60 = vpop.eup %610  ;;  %v443_v4 = vmul.f32 %v859_v43, %v442_v41  ;;  %616 = vrcp.f32 %v910_v18  ;;  %vm370_vm0 = vweird.f32 %v864_v49  ;;  %v376_v37 = vand.u32 2147483648, %v864_v49 }
 0x1bc   :  { %v353_v3 = vmul.f32 %v866_v50, %v352_v63  ;;  %v426_v33 = vmul.f32 %v611_v60, %v851_v36  ;;  %v418_v20 = vsel %vm905_vm4, %v848_v35, %v414_v1  ;;  %vm431_vm8 = vweird.f32 %v611_v60 }
 0x1bd   :  { %v613_v12 = vpop.eup %612  ;;  %v444_v21 = vadd.f32 %v859_v43, %v443_v4  ;;  %v423_v35 = vsel %vm877_vm11, %v422_v51, %v418_v20  ;;  %vm432_vm11 = vmor %vm430_vm2, %vm431_vm8  ;;  %v374_v51 = vand.u32 2147483647, %v864_v49  ;;  %618 = vpow2.f32 %v332_v10 }
 0x1be   :  { %v427_v14 = vsub.f32 1.0, %v426_v33  ;;  %v456_v23 = vmul.f32 %v613_v12, %v862_v44  ;;  %v615_v24 = vpop.eup %614  ;;  %v354_v25 = vadd.f32 %v866_v50, %v353_v3  ;;  %vm461_vm12 = vweird.f32 %v613_v12 }
 0x1bf   :  { %v366_v34 = vmul.f32 %v615_v24, %v864_v49  ;;  %v448_v39 = vsel %vm928_vm9, %v859_v43, %v444_v21  ;;  %vm371_vm13 = vweird.f32 %v615_v24  ;;  %v474_v36 = vmul.f32 %v423_v35, %v818_v2  ;;  %vm462_vm14 = vmor %vm460_vm7, %vm461_vm12 }
 0x1c0   :  { %v428_v46 = vmul.f32 %v611_v60, %v427_v14  ;;  %v457_v27 = vsub.f32 1.0, %v456_v23  ;;  %v358_v29 = vsel %vm941_vm10, %v866_v50, %v354_v25  ;;  %v453_v54 = vsel %vm894_vm1, %v452_v5, %v448_v39  ;;  %vm372_vm2 = vmor %vm370_vm0, %vm371_vm13 }
 0x1c1   :  { %v367_v40 = vsub.f32 1.0, %v366_v34  ;;  %v617_v43 = vpop.eup %616  ;;  %v467_v50 = vor.u32 1.1754944e-38, %v466_v31  ;;  %vm465_vm15 = vcmp.eq.f32.partialorder %v464_v30, 8.507059e+37  ;;  %v377_v41 = vor.u32 1.1754944e-38, %v376_v37 }
 0x1c2   :  { %v429_v45 = vadd.f32 %v611_v60, %v428_v46  ;;  %v458_v38 = vmul.f32 %v613_v12, %v457_v27  ;;  %v363_v58 = vsel %vm916_vm6, %v362_v26, %v358_v29  ;;  %v381_v2 = vmul.f32 %v617_v43, %v910_v18 }
 0x1c3   :  { %v368_v48 = vmul.f32 %v615_v24, %v367_v40  ;;  %vm375_vm1 = vcmp.eq.f32.partialorder %v374_v51, 8.507059e+37  ;;  %v619_v0 = vpop.eup %618  ;;  %v470_v1 = vmul.f32 %v363_v58, %v823_v7  ;;  %v391_v33 = vand.u32 2147483648, %v910_v18 }
 0x1c4   :  { %v433_v47 = vsel %vm432_vm11, %v611_v60, %v429_v45  ;;  %v459_v53 = vadd.f32 %v613_v12, %v458_v38  ;;  %v345_v61 = vadd.f32 1.0, %v619_v0  ;;  %v382_v5 = vsub.f32 1.0, %v381_v2 }
 0x1c5   :  { %v438_v52 = vsel %vm899_vm3, %v437_v16, %v433_v47  ;;  %v369_v57 = vadd.f32 %v615_v24, %v368_v48  ;;  %vm386_vm3 = vweird.f32 %v617_v43  ;;  %vm385_vm4 = vweird.f32 %v910_v18 }
 0x1c6   :  { %v475_v55 = vmul.f32 %v438_v52, %v827_v11  ;;  %v463_v56 = vsel %vm462_vm14, %v613_v12, %v459_v53  ;;  %v476_v11 = vmul.f32 %v453_v54, %v821_v6  ;;  %620 = vrcp.f32 %v345_v61  ;;  %vm387_vm5 = vmor %vm385_vm4, %vm386_vm3 }
 0x1c7   :  { %v468_v62 = vsel %vm465_vm15, %v467_v50, %v463_v56  ;;  %v373_v63 = vsel %vm372_vm2, %v615_v24, %v369_v57  ;;  %v406_v9 = vand.u32 2147483648, %v345_v61  ;;  %v404_v13 = vand.u32 2147483647, %v345_v61 }
 0x1c8   :  { %v549_v59 = vpack.c.bf16 %v475_v55, %v474_v36  ;;  %v477_v44 = vmul.f32 %v468_v62, %v830_v32  ;;  %v378_v60 = vsel %vm375_vm1, %v377_v41, %v373_v63  ;;  %v383_v32 = vmul.f32 %v617_v43, %v382_v5 }
 0x1c9   :  { %v471_v49 = vmul.f32 %v378_v60, %v832_v15  ;;  %v389_v15 = vand.u32 2147483647, %v910_v18  ;;  %v392_v14 = vor.u32 1.1754944e-38, %v391_v33  ;;  %vm400_vm8 = vweird.f32 %v345_v61 }
 0x1ca   :  { %560 = vst [vmem:[%s996_s5 + $0x10] sm:$0xff] %v549_v59   ;;  %v554_v4 = vpack.c.bf16 %v477_v44, %v476_v11  ;;  %v384_v26 = vadd.f32 %v617_v43, %v383_v32  ;;  %v407_v21 = vor.u32 1.1754944e-38, %v406_v9  ;;  %vm405_vm10 = vcmp.eq.f32.partialorder %v404_v13, 8.507059e+37 }
 0x1cb   :  { %v539_v6 = vpack.c.bf16 %v471_v49, %v470_v1  ;;  %vm390_vm7 = vcmp.eq.f32.partialorder %v389_v15, 8.507059e+37 }
 0x1cc   :  { %561 = vst [vmem:[%s996_s5 + $0x18] sm:$0xff] %v554_v4   ;;  %v621_v3 = vpop.eup %620  ;;  %v388_v10 = vsel %vm387_vm5, %v617_v43, %v384_v26 }
 0x1cd   :  { %540 = vst [vmem:[%s996_s5] sm:$0xff] %v539_v6   ;;  %v396_v7 = vmul.f32 %v621_v3, %v345_v61  ;;  %vm401_vm6 = vweird.f32 %v621_v3  ;;  %v393_v20 = vsel %vm390_vm7, %v392_v14, %v388_v10 }
 0x1ce   :  { %vm402_vm9 = vmor %vm400_vm8, %vm401_vm6  ;;  %v472_v24 = vmul.f32 %v393_v20, %v834_v17 }
 0x1cf   :  { %v397_v8 = vsub.f32 1.0, %v396_v7 }
 0x1d1   :  { %v398_v12 = vmul.f32 %v621_v3, %v397_v8 }
 0x1d3   :  { %v399_v16 = vadd.f32 %v621_v3, %v398_v12 }
 0x1d5   :  { %v403_v22 = vsel %vm402_vm9, %v621_v3, %v399_v16 }
 0x1d6   :  { %v408_v23 = vsel %vm405_vm10, %v407_v21, %v403_v22 }
 0x1d7   :  { %v473_v18 = vmul.f32 %v408_v23, %v857_v42 }
 0x1d9   :  { %v544_v25 = vpack.c.bf16 %v473_v18, %v472_v24 }
 0x1db   :  { %559 = vst [vmem:[%s996_s5 + $0x8] sm:$0xff] %v544_v25  }

// kernel: clip_inference.42
= control target key start
LH: loop header
LB: loop body
LE: loop exit
PB: predicated region body
PF: predicated region fallthrough
CT: control target
= control target key end

     0   :  { %vm178_vm0 = vcmask 257024   ;;  %s403_s1 = inlined_call_operand.vmem [shape: bf16[128,32], index: 1, kind: input, shape index: {}]   ;;  %s404_s2 = inlined_call_operand.vmem [shape: f32[1,32], index: 2, kind: input, shape index: {}]   ;;  %s405_s0 = inlined_call_operand.vmem [shape: bf16[64,128], index: 0, kind: input, shape index: {}]   ;;  %s406_s3 = inlined_call_operand.vmem [shape: bf16[64,32], index: 3, kind: input, shape index: {}]   ;;  %s407_s4 = inlined_call_operand.vmem [shape: bf16[64,32], index: 4, kind: output, shape index: {}]  }
   0x1   :  { %v250_v0 = vld [vmem:[%s403_s1 + $0x38] sm:$0xff]  ;;  %v249_v1 = vld [vmem:[%s403_s1 + $0x30] sm:$0xff]  ;;  %v248_v2 = vld [vmem:[%s403_s1 + $0x28] sm:$0xff] }
   0x2   :  { %117 = vmatpush.bf16.msra.mxu0 %v250_v0  ;;  %270 = vmatpush.bf16.msra.mxu1 %v250_v0  ;;  %v247_v3 = vld [vmem:[%s403_s1 + $0x20] sm:$0xff]  ;;  %v246_v4 = vld [vmem:[%s403_s1 + $0x18] sm:$0xff]  ;;  %v245_v5 = vld [vmem:[%s403_s1 + $0x10] sm:$0xff] }
   0x3   :  { %271 = vmatpush.bf16.msra.mxu2 %v250_v0  ;;  %272 = vmatpush.bf16.msra.mxu3 %v250_v0  ;;  %v244_v6 = vld [vmem:[%s403_s1 + $0x8] sm:$0xff]  ;;  %v243_v7 = vld [vmem:[%s403_s1] sm:$0xff]  ;;  %v241_v10 = vld [vmem:[%s405_s0 + $0x10] sm:$0xff] }
   0x4   :  { %v239_v8 = vld [vmem:[%s405_s0] sm:$0xff]  ;;  %v240_v9 = vld [vmem:[%s405_s0 + $0x8] sm:$0xff]  ;;  %v242_v11 = vld [vmem:[%s405_s0 + $0x18] sm:$0xff] }
   0x5   :  { %v252_v12 = vld [vmem:[%s406_s3] sm:$0xff]   ;;  %v267_v13 = vld [vmem:[%s406_s3 + $0x8] sm:$0xff]   ;;  %v268_v23 = vld [vmem:[%s406_s3 + $0x10] sm:$0xff]  }
   0x6   :  { %118 = vmatpush.bf16.msra.mxu0 %v249_v1  ;;  %273 = vmatpush.bf16.msra.mxu1 %v249_v1  ;;  %v294_v14 = vld [vmem:[%s404_s2] ss:$0 sm:$0xff]  ;;  %v253_v15 = vunpack.c.l.bf16 %v252_v12  ;;  %v257_v16 = vunpack.c.l.bf16 %v267_v13  ;;  %v269_v24 = vld [vmem:[%s406_s3 + $0x18] sm:$0xff]   ;;  %v261_v27 = vunpack.c.l.bf16 %v268_v23  ;;  %v254_v31 = vunpack.c.h.bf16 %v252_v12 }
   0x7   :  { %274 = vmatpush.bf16.msra.mxu2 %v249_v1  ;;  %275 = vmatpush.bf16.msra.mxu3 %v249_v1  ;;  %v265_v28 = vunpack.c.l.bf16 %v269_v24  ;;  %v258_v32 = vunpack.c.h.bf16 %v267_v13  ;;  %v262_v47 = vunpack.c.h.bf16 %v268_v23  ;;  %v266_v48 = vunpack.c.h.bf16 %v269_v24 }
   0xa   :  { %119 = vmatpush.bf16.msra.mxu0 %v248_v2  ;;  %276 = vmatpush.bf16.msra.mxu1 %v248_v2 }
   0xb   :  { %277 = vmatpush.bf16.msra.mxu2 %v248_v2  ;;  %278 = vmatpush.bf16.msra.mxu3 %v248_v2 }
   0xe   :  { %120 = vmatpush.bf16.msra.mxu0 %v247_v3  ;;  %279 = vmatpush.bf16.msra.mxu1 %v247_v3 }
   0xf   :  { %280 = vmatpush.bf16.msra.mxu2 %v247_v3  ;;  %281 = vmatpush.bf16.msra.mxu3 %v247_v3 }
  0x12   :  { %121 = vmatpush.bf16.msra.mxu0 %v246_v4  ;;  %282 = vmatpush.bf16.msra.mxu1 %v246_v4 }
  0x13   :  { %283 = vmatpush.bf16.msra.mxu2 %v246_v4  ;;  %284 = vmatpush.bf16.msra.mxu3 %v246_v4 }
  0x16   :  { %122 = vmatpush.bf16.msra.mxu0 %v245_v5  ;;  %285 = vmatpush.bf16.msra.mxu1 %v245_v5 }
  0x17   :  { %286 = vmatpush.bf16.msra.mxu2 %v245_v5  ;;  %287 = vmatpush.bf16.msra.mxu3 %v245_v5 }
  0x1a   :  { %123 = vmatpush.bf16.msra.mxu0 %v244_v6  ;;  %288 = vmatpush.bf16.msra.mxu1 %v244_v6 }
  0x1b   :  { %289 = vmatpush.bf16.msra.mxu2 %v244_v6  ;;  %290 = vmatpush.bf16.msra.mxu3 %v244_v6 }
  0x1e   :  { %124 = vmatpush.bf16.msra.mxu0 %v243_v7  ;;  %291 = vmatpush.bf16.msra.mxu1 %v243_v7 }
  0x1f   :  { %292 = vmatpush.bf16.msra.mxu2 %v243_v7  ;;  %293 = vmatpush.bf16.msra.mxu3 %v243_v7 }
  0x21   :  { %125 = vmatmul.bf16.vlgmr.msra.gmra.mxu0 %v239_v8  ;;  %130 = vmatmul.bf16.vlgmr.msra.gmra.mxu1 %v240_v9 }
  0x22   :  { %135 = vmatmul.bf16.vlgmr.msra.gmra.mxu2 %v241_v10  ;;  %140 = vmatmul.bf16.vlgmr.msra.gmra.mxu3 %v242_v11 }
  0x9e   :  { %v126_v17 = vpop.f32.mrf.mxu0  ;;  %v131_v18 = vpop.f32.mrf.mxu1 }
  0x9f   :  { %v127_v19 = vadd.f32 %v294_v14, %v126_v17  ;;  %v132_v20 = vadd.f32 %v294_v14, %v131_v18 }
  0xa1   :  { %v162_v21 = vadd.f32 %v253_v15, %v127_v19  ;;  %v164_v22 = vadd.f32 %v257_v16, %v132_v20 }
  0xa3   :  { %v170_v25 = vpack.c.bf16 %v162_v21, %v162_v21  ;;  %v172_v26 = vpack.c.bf16 %v164_v22, %v164_v22 }
  0xa5   :  { %179 = vst.msk [vmem:[%s407_s4] sm:$0xf] %vm178_vm0, %v170_v25  ;;  %v136_v29 = vpop.f32.mrf.mxu2  ;;  %v141_v30 = vpop.f32.mrf.mxu3 }
  0xa6   :  { %181 = vst.msk [vmem:[%s407_s4 + $0x8] sm:$0xf] %vm178_vm0, %v172_v26  ;;  %v137_v33 = vadd.f32 %v294_v14, %v136_v29  ;;  %v142_v34 = vadd.f32 %v294_v14, %v141_v30  ;;  %v128_v35 = vpop.f32.mrf.mxu0  ;;  %v133_v36 = vpop.f32.mrf.mxu1 }
  0xa7   :  { %v129_v37 = vadd.f32 %v294_v14, %v128_v35  ;;  %v134_v38 = vadd.f32 %v294_v14, %v133_v36 }
  0xa8   :  { %v166_v39 = vadd.f32 %v261_v27, %v137_v33  ;;  %v168_v40 = vadd.f32 %v265_v28, %v142_v34 }
  0xa9   :  { %v163_v41 = vadd.f32 %v254_v31, %v129_v37  ;;  %v165_v42 = vadd.f32 %v258_v32, %v134_v38 }
  0xaa   :  { %v174_v43 = vpack.c.bf16 %v166_v39, %v166_v39  ;;  %v176_v44 = vpack.c.bf16 %v168_v40, %v168_v40 }
  0xab   :  { %v171_v45 = vpack.c.bf16 %v163_v41, %v163_v41  ;;  %v173_v46 = vpack.c.bf16 %v165_v42, %v165_v42 }
  0xac   :  { %183 = vst.msk [vmem:[%s407_s4 + $0x10] sm:$0xf] %vm178_vm0, %v174_v43 }
  0xad   :  { %185 = vst.msk [vmem:[%s407_s4 + $0x18] sm:$0xf] %vm178_vm0, %v176_v44  ;;  %v138_v49 = vpop.f32.mrf.mxu2  ;;  %v143_v50 = vpop.f32.mrf.mxu3 }
  0xae   :  { %180 = vst.msk [vmem:[%s407_s4 + $0x4] sm:$0xf] %vm178_vm0, %v171_v45  ;;  %v139_v51 = vadd.f32 %v294_v14, %v138_v49  ;;  %v144_v52 = vadd.f32 %v294_v14, %v143_v50 }
  0xaf   :  { %182 = vst.msk [vmem:[%s407_s4 + $0xc] sm:$0xf] %vm178_vm0, %v173_v46 }
  0xb0   :  { %v167_v53 = vadd.f32 %v262_v47, %v139_v51  ;;  %v169_v54 = vadd.f32 %v266_v48, %v144_v52 }
  0xb2   :  { %v175_v55 = vpack.c.bf16 %v167_v53, %v167_v53  ;;  %v177_v56 = vpack.c.bf16 %v169_v54, %v169_v54 }
  0xb4   :  { %184 = vst.msk [vmem:[%s407_s4 + $0x14] sm:$0xf] %vm178_vm0, %v175_v55 }
  0xb5   :  { %186 = vst.msk [vmem:[%s407_s4 + $0x1c] sm:$0xf] %vm178_vm0, %v177_v56 }

// kernel: clip_inference.48
= control target key start
LH: loop header
LB: loop body
LE: loop exit
PB: predicated region body
PF: predicated region fallthrough
CT: control target
= control target key end

     0   :  { %vm23_vm0 = vcmask 257024   ;;  %v127_v3 = vmov 32.0   ;;  %vm84_vm5 = vcmask 261120   ;;  %vm102_vm6 = vcmask 254976   ;;  %s181_s0 = inlined_call_operand.vmem [shape: bf16[4,32], index: 0, kind: input, shape index: {}]   ;;  %s182_s1 = inlined_call_operand.vmem [shape: f32[1,32], index: 1, kind: input, shape index: {}]   ;;  %s183_s2 = inlined_call_operand.vmem [shape: f32[1,32], index: 2, kind: input, shape index: {}]   ;;  %s184_s4 = inlined_call_operand.vmem [shape: f32[1,32], index: 4, kind: input, shape index: {}]   ;;  %s185_s3 = inlined_call_operand.vmem [shape: bf16[32,32], index: 3, kind: input, shape index: {}]   ;;  %s186_s5 = inlined_call_operand.vmem [shape: bf16[4,32], index: 5, kind: output, shape index: {}]  }
   0x1   :  { %v21_v0 = vld [vmem:[%s181_s0] sm:$0x3]  ;;  %123 = vrcp.f32 %v127_v3  ;;  %v118_v15 = vld [vmem:[%s185_s3 + $0x8] sm:$0xff] }
   0x2   :  { %v22_v1 = vunpack.c.l.bf16 %v21_v0  ;;  %94 = vmatpush.bf16.msra.mxu0 %v118_v15  ;;  %v117_v16 = vld [vmem:[%s185_s3] sm:$0xff] }
   0x3   :  { %v120_v26 = vld [vmem:[%s182_s1] ss:$0 sm:$0xff] }
   0x4   :  { %v24_v2 = vsel %vm23_vm0, %v22_v1, 0.0  ;;  %v121_v29 = vld [vmem:[%s183_s2] ss:$0 sm:$0xff] }
   0x5   :  { %25 = vadd.xlane.f32.xlu0 %v24_v2  ;;  %v122_v33 = vld [vmem:[%s184_s4] ss:$0 sm:$0xff] }
   0x6   :  { %95 = vmatpush.bf16.msra.mxu0 %v117_v16 }
   0x7   :  { %v124_v4 = vpop.eup %123 }
   0x8   :  { %v28_v5 = vmul.f32 32.0, %v124_v4  ;;  %vm32_vm1 = vweird.f32 %v124_v4 }
   0xa   :  { %v29_v6 = vsub.f32 1.0, %v28_v5 }
   0xc   :  { %v30_v7 = vmul.f32 %v124_v4, %v29_v6 }
   0xe   :  { %v31_v8 = vadd.f32 %v124_v4, %v30_v7 }
  0x10   :  { %v33_v9 = vsel %vm32_vm1, %v124_v4, %v31_v8 }
  0x78   :  { %v26_v10 = vpop.xlane.xlu0 %25 }
  0x79   :  { %v34_v11 = vmul.f32 %v33_v9, %v26_v10 }
  0x7b   :  { %v35_v12 = vsub.f32 %v22_v1, %v34_v11 }
  0x7d   :  { %v36_v13 = vmul.f32 %v35_v12, %v35_v12 }
  0x7f   :  { %v37_v14 = vsel %vm23_vm0, %v36_v13, 0.0 }
  0x80   :  { %38 = vadd.xlane.f32.xlu0 %v37_v14 }
  0xf3   :  { %v39_v17 = vpop.xlane.xlu0 %38 }
  0xf4   :  { %v40_v18 = vmul.f32 %v39_v17, %v33_v9 }
  0xf6   :  { %v41_v19 = vadd.f32 1e-05, %v40_v18 }
  0xf8   :  { %125 = vrsqrt.f32 %v41_v19  ;;  %vm48_vm3 = vweird.f32 %v41_v19 }
  0xfe   :  { %v126_v20 = vpop.eup %125 }
  0xff   :  { %v43_v21 = vmul.f32 %v126_v20, %v41_v19  ;;  %vm49_vm2 = vweird.f32 %v126_v20 }
 0x100   :  { %vm50_vm4 = vmor %vm48_vm3, %vm49_vm2 }
 0x101   :  { %v44_v22 = vmul.f32 %v126_v20, %v43_v21 }
 0x103   :  { %v45_v23 = vmul.f32 0.5, %v44_v22 }
 0x105   :  { %v46_v24 = vsub.f32 1.5, %v45_v23 }
 0x107   :  { %v47_v25 = vmul.f32 %v126_v20, %v46_v24 }
 0x109   :  { %v51_v27 = vsel %vm50_vm4, %v126_v20, %v47_v25 }
 0x10a   :  { %v52_v28 = vmul.f32 %v51_v27, %v35_v12 }
 0x10c   :  { %v57_v30 = vmul.f32 %v120_v26, %v52_v28 }
 0x10e   :  { %v62_v31 = vadd.f32 %v121_v29, %v57_v30 }
 0x110   :  { %v63_v32 = vpack.c.bf16 %v62_v31, %v62_v31 }
 0x112   :  { %116 = vmatmul.msk.bf16.vlgmr.msra.gmra.mxu0 %vm84_vm5, %v63_v32 }
 0x18f   :  { %v97_v34 = vpop.f32.mrf.mxu0 }
 0x190   :  { %v98_v35 = vadd.f32 %v122_v33, %v97_v34 }
 0x192   :  { %v101_v36 = vpack.c.bf16 %v98_v35, %v98_v35 }
 0x194   :  { %103 = vst.msk [vmem:[%s186_s5] sm:$0x3] %vm102_vm6, %v101_v36 }
 0x197   :  { %v99_v37 = vpop.f32.mrf.mxu0 }

// kernel: clip_inference.49
= control target key start
LH: loop header
LB: loop body
LE: loop exit
PB: predicated region body
PF: predicated region fallthrough
CT: control target
= control target key end

     0   :  { %s176_s0 = inlined_call_operand.vmem [shape: bf16[2,32], index: 0, kind: input, shape index: {}]   ;;  %s177_s1 = inlined_call_operand.vmem [shape: bf16[4,32], index: 1, kind: input, shape index: {}]   ;;  %s178_s2 = inlined_call_operand.<no memory space> [shape: f32[1,1], index: 2, kind: input, shape index: {}]   ;;  %s179_s3 = inlined_call_operand.hbm [shape: f32[2,4], index: 3, kind: output, shape index: {}]  }
   0x1   :  { %v18_v0 = vld [vmem:[%s177_s1] sm:$0x3] }
   0x2   :  { %v16_v1 = vld [vmem:[%s176_s0] sm:$0x1]  ;;  %v19_v2 = vunpack.c.l.bf16 %v18_v0 }
   0x3   :  { %9 = vsyncpa [#allocation4], 0  ;;  %vm38_vm0 = vcmask 257024   ;;  %v17_v4 = vunpack.c.l.bf16 %v16_v1  ;;  %vm21_vm1 = vcmask 254976   ;;  %v82_v8 = vstv %s178_s2  ;;  %s143_s1 = smov [#allocation3]   ;;  %s97_s20 = sshll.u32 %s179_s3, 4  ;;  %s98_s20 = int_to_ptr.hbm [resolvable:$true] %s97_s20 }
   0x4   :  { %v37_v3 = vmul.f32 %v19_v2, %v19_v2  ;;  %v83_v10 = vmul.f32 1.442695, %v82_v8  ;;  %vm54_vm5 = vcmask 261120   ;;  %s95_s2 = sshll.u32 %s143_s1, 4  ;;  %vm88_vm9 = vcmask 25600   ;;  %s96_s2 = int_to_ptr.vmem [resolvable:$true] %s95_s2 }
   0x5   :  { %v20_v6 = vmul.f32 %v17_v4, %v17_v4 }
   0x6   :  { %v39_v5 = vsel %vm38_vm0, %v37_v3, 0.0  ;;  %111 = vpow2.f32 %v83_v10 }
   0x7   :  { %40 = vadd.xlane.f32.xlu0 %v39_v5  ;;  %v22_v7 = vsel %vm21_vm1, %v20_v6, 0.0 }
   0xc   :  { %v112_v12 = vpop.eup %111 }
   0xd   :  { %108 = vpush %v112_v12 }
   0xf   :  { %23 = vadd.xlane.f32.xlu0 %v22_v7 }
  0x3e   :  { %s109_s0 = spop %108 }
  0x3f   :  { %v86_v31 = vstv %s109_s0 }
  0x7a   :  { %v41_v9 = vpop.xlane.xlu0 %40 }
  0x7b   :  { %v42_v11 = vmax.f32 %v41_v9, 1e-24 }
  0x7d   :  { %113 = vrsqrt.f32 %v42_v11  ;;  %vm49_vm3 = vweird.f32 %v42_v11 }
  0x82   :  { %v24_v13 = vpop.xlane.xlu0 %23 }
  0x83   :  { %v114_v14 = vpop.eup %113  ;;  %v25_v15 = vmax.f32 %v24_v13, 1e-24 }
  0x84   :  { %v44_v16 = vmul.f32 %v114_v14, %v42_v11  ;;  %vm50_vm2 = vweird.f32 %v114_v14 }
  0x85   :  { %115 = vrsqrt.f32 %v25_v15  ;;  %vm51_vm4 = vmor %vm49_vm3, %vm50_vm2  ;;  %vm32_vm7 = vweird.f32 %v25_v15 }
  0x86   :  { %v45_v17 = vmul.f32 %v114_v14, %v44_v16 }
  0x88   :  { %v46_v18 = vmul.f32 0.5, %v45_v17 }
  0x8a   :  { %v47_v19 = vsub.f32 1.5, %v46_v18 }
  0x8b   :  { %v116_v20 = vpop.eup %115 }
  0x8c   :  { %v27_v21 = vmul.f32 %v116_v20, %v25_v15  ;;  %v48_v22 = vmul.f32 %v114_v14, %v47_v19  ;;  %vm33_vm6 = vweird.f32 %v116_v20 }
  0x8d   :  { %vm34_vm8 = vmor %vm32_vm7, %vm33_vm6 }
  0x8e   :  { %v28_v23 = vmul.f32 %v116_v20, %v27_v21  ;;  %v52_v24 = vsel %vm51_vm4, %v114_v14, %v48_v22 }
  0x8f   :  { %v53_v25 = vmul.f32 %v52_v24, %v19_v2 }
  0x90   :  { %v29_v26 = vmul.f32 0.5, %v28_v23 }
  0x91   :  { %106 = vmatpush.xpose.msk.msra.mxu0 %vm54_vm5, %v53_v25 }
  0x92   :  { %v30_v27 = vsub.f32 1.5, %v29_v26 }
  0x94   :  { %v31_v28 = vmul.f32 %v116_v20, %v30_v27 }
  0x96   :  { %v35_v29 = vsel %vm34_vm8, %v116_v20, %v31_v28 }
  0x97   :  { %v36_v30 = vmul.f32 %v35_v29, %v17_v4 }
  0x99   :  { %107 = vmatmul.msk.f32.vlgmr.msra.gmra.mxu0 %vm54_vm5, %v36_v30 }
 0x116   :  { %v78_v32 = vpop.f32.mrf.mxu0 }
 0x117   :  { %v87_v33 = vmul.f32 %v86_v31, %v78_v32 }
 0x119   :  { %89 = vst.msk [vmem:[#allocation3] sm:$0x3] %vm88_vm9, %v87_v33 }
 0x11a   :  { %100 = dma.vmem_to_hbm [thread:$0]  %s96_s2, 32, %s98_s20, [#allocation4]  }
 0x11b   :  { %141 = dma.done.wait [#allocation4], 32  }
 0x11c   :  { %142 = vsyncadd [#allocation4], 4294967264 }
 0x11d   :  { %105 = vsyncpa [#allocation4], 1 }

</bundles_post_ra>
